<compile_context>
chip_gen: v7x
topology: tpu7x:2x2x1
jax: 0.10.0
libtpu: 0.0.40
codegen_flags: <defaults>
</compile_context>

<pallas_src>
import functools
import math

import jax
import jax.numpy as jnp
from jax.experimental import pallas as pl
from jax.experimental.pallas import tpu as pltpu

C_PAD = 128  # lane-dense channel width used for every internal activation / weight


# ---------------------------------------------------------------------------
# Fused kernel: normalization + conv_head + all stages, one batch element / grid step
# ---------------------------------------------------------------------------
def _fused_kernel(x_ref, w1_ref, wstack_ref, bstack_ref, o_ref, bufP, bufQ, *,
                  n_stages):
    """x_ref    : (1, L4, 4)       f32  raw audio grouped into stride-4 frames
       w1_ref   : (4, 128)         bf16 head conv1 weight (k, c_out)
       wstack_ref: (NW, 128, 128)  bf16 all k=3/k=5 conv weights, (k, c_in, c_out) slices
       bstack_ref: (NB, 128)       f32  all biases (head b1, head b2, per-stage b3/b5)
       o_ref    : (1, L_final, 128) f32
       bufP/bufQ: (L4+4, 128)      f32  ping-pong zero-halo scratch buffers
    """
    L4 = x_ref.shape[1]
    bufs = (bufP, bufQ)

    def bias(i):                                    # (1, 128) row, broadcasts over L
        return bstack_ref[pl.ds(i, 1), :]

    def pad_store(buf, act, length, halo):
        z = jnp.zeros((halo, C_PAD), jnp.float32)
        buf[pl.ds(0, halo), :] = z
        buf[pl.ds(length + halo, halo), :] = z
        buf[pl.ds(halo, length), :] = act

    def conv(buf, l_out, w0, k_size, stride):
        def tap(k):
            if stride == 1:
                rows = buf[pl.ds(k, l_out), :]
            else:
                rows = buf[pl.ds(k, l_out, stride=stride), :]
            return jnp.dot(rows.astype(jnp.bfloat16), wstack_ref[w0 + k],
                           preferred_element_type=jnp.float32)
        acc = tap(0)
        for k in range(1, k_size):
            acc += tap(k)
        return acc

    # --- per-sample normalization over all raw samples (torch: mean/std over (C, L)) ---
    x = x_ref[0]                                    # (L4, 4) = every sample of this item
    n = x.size
    s1 = jnp.sum(x)
    s2 = jnp.sum(x * x)
    mean = s1 / n
    var = jnp.maximum((s2 - s1 * mean) / (n - 1), 0.0)   # unbiased, matches torch.std
    xn = (x - mean) / (jnp.sqrt(var) + 1e-9)

    # --- conv_head: Conv1d(1, d0, 4, s=4) == per-frame matmul, + bias, ReLU ---
    h = jnp.dot(xn.astype(jnp.bfloat16), w1_ref[...],
                preferred_element_type=jnp.float32)
    h = jnp.maximum(h + bias(0), 0.0)

    # --- conv_head: Conv1d(d0, d0, 3, p=1) ---
    pad_store(bufs[0], h, L4, 1)
    act = conv(bufs[0], L4, 0, 3, 1) + bias(1)

    # --- stages ---
    widx, bidx, cur, length = 3, 2, 1, L4
    for i in range(n_stages):
        # Conv1d(c_in, c_out, 3, s=1, p=1)
        pad_store(bufs[cur], act, length, 1)
        act = conv(bufs[cur], length, widx, 3, 1) + bias(bidx)
        widx += 3
        bidx += 1
        cur ^= 1
        # TODO(synk): n_blocks[i] MultiScaleFusion blocks (undefined in the reference
        # source) would go here.
        if i < n_stages - 1:
            # down-sample: Conv1d(c_out, c_out, 5, s=2, p=2)
            pad_store(bufs[cur], act, length, 2)
            length = length // 2
            act = conv(bufs[cur], length, widx, 5, 2) + bias(bidx)
            widx += 5
            bidx += 1
            cur ^= 1

    o_ref[0] = act.astype(o_ref.dtype)


# ---------------------------------------------------------------------------
# Wrapper
# ---------------------------------------------------------------------------
def feature_extractor_forward(params, x, dims=(32, 32, 64, 64, 128)):
    """x: (B, 1, L) raw audio (NCW). Returns (B, dims[-1], L // (4 * 2**(len(dims)-1)))."""
    B, C, L = x.shape
    assert C == 1
    n_stages = len(dims)
    total_down = 4 * (2 ** (n_stages - 1))
    assert L % total_down == 0, (L, total_down)
    L4 = L // 4
    L_final = L // total_down

    w1, wstack, bstack = params["w1"], params["wstack"], params["bstack"]
    NW, NB = wstack.shape[0], bstack.shape[0]

    # free reshape into stride-4 frames: no transpose, no gather
    xf = x.reshape(B, L4, 4)

    est = ((L4 * 4 + L_final * C_PAD) * 4 * 2            # in/out blocks, double-buffered
           + (NW * C_PAD * C_PAD + 4 * C_PAD) * 2 * 2    # bf16 weight stacks
           + NB * C_PAD * 4
           + 2 * (L4 + 4) * C_PAD * 4                    # ping-pong scratch
           + 4 * L4 * C_PAD * 4)                         # headroom for live activations
    limit = int(min(max(2 * est, 32 * 2**20), 48 * 2**20))

    kernel = functools.partial(_fused_kernel, n_stages=n_stages)
    out = pl.pallas_call(
        kernel,
        out_shape=jax.ShapeDtypeStruct((B, L_final, C_PAD), jnp.float32),
        grid=(B,),
        in_specs=[
            pl.BlockSpec((1, L4, 4), lambda b: (b, 0, 0)),
            pl.BlockSpec((4, C_PAD), lambda b: (0, 0)),
            pl.BlockSpec((NW, C_PAD, C_PAD), lambda b: (0, 0, 0)),
            pl.BlockSpec((NB, C_PAD), lambda b: (0, 0)),
        ],
        out_specs=pl.BlockSpec((1, L_final, C_PAD), lambda b: (b, 0, 0)),
        scratch_shapes=[
            pltpu.VMEM((L4 + 4, C_PAD), jnp.float32),
            pltpu.VMEM((L4 + 4, C_PAD), jnp.float32),
        ],
        compiler_params=pltpu.CompilerParams(
            dimension_semantics=("parallel",), vmem_limit_bytes=limit),
    )(xf, w1, wstack, bstack)

    # single boundary transpose back to NCW; channel-pad slice is a no-op for dims[-1]=128
    return jnp.transpose(out[:, :, :dims[-1]], (0, 2, 1))


# ---------------------------------------------------------------------------
# Parameters (deterministic, matches nn.Conv1d shapes; packed for the kernel)
# ---------------------------------------------------------------------------
def _init_conv(key, c_out, c_in, k):
    k1, k2 = jax.random.split(key)
    bound = 1.0 / math.sqrt(c_in * k)
    w = jax.random.uniform(k1, (c_out, c_in, k), jnp.float32, -bound, bound)
    b = jax.random.uniform(k2, (c_out,), jnp.float32, -bound, bound)
    return w, b


def _pack_w(w):
    """PyTorch (C_out, C_in, K) weight -> (K, 128, 128) f32 (k, c_in, c_out), zero-padded."""
    c_out, c_in, k = w.shape
    wk = jnp.transpose(w, (2, 1, 0))                                 # (K, C_in, C_out)
    return jnp.pad(wk, ((0, 0), (0, C_PAD - c_in), (0, C_PAD - c_out)))


def _pad_b(b):
    return jnp.pad(b, (0, C_PAD - b.shape[0]))


def init_feature_extractor_params(key, dims=(32, 32, 64, 64, 128)):
    assert max(dims) <= C_PAD
    n_stage = len(dims)
    keys = jax.random.split(key, 2 + 2 * n_stage)

    # conv_head: Conv1d(1, d0, 4, s=4) -> ReLU -> Conv1d(d0, d0, 3, p=1)
    w1, b1 = _init_conv(keys[0], dims[0], 1, 4)
    w1_mat = jnp.transpose(w1, (2, 1, 0)).reshape(4, dims[0])         # (k, c_out)
    w1_mat = jnp.pad(w1_mat, ((0, 0), (0, C_PAD - dims[0]))).astype(jnp.bfloat16)

    w_slices = []
    b_rows = [_pad_b(b1)]                                             # bias index 0 = head b1

    w2, b2 = _init_conv(keys[1], dims[0], dims[0], 3)                 # head conv2
    w_slices.append(_pack_w(w2))
    b_rows.append(_pad_b(b2))

    for i in range(n_stage):
        c_in, c_out = dims[max(i - 1, 0)], dims[i]
        w3, b3 = _init_conv(keys[2 + 2 * i], c_out, c_in, 3)
        w_slices.append(_pack_w(w3))
        b_rows.append(_pad_b(b3))
        if i < n_stage - 1:
            w5, b5 = _init_conv(keys[3 + 2 * i], c_out, c_out, 5)
            w_slices.append(_pack_w(w5))
            b_rows.append(_pad_b(b5))

    wstack = jnp.concatenate(w_slices, axis=0).astype(jnp.bfloat16)   # (38, 128, 128)
    bstack = jnp.stack(b_rows, axis=0).astype(jnp.float32)            # (11, 128)
    return {"w1": w1_mat, "wstack": wstack, "bstack": bstack}


# ---------------------------------------------------------------------------
if __name__ == "__main__":
    key = jax.random.PRNGKey(0)
    k_param, k_x = jax.random.split(key)

    B, L = 2, 1024  # small synthetic audio: (batch, 1 channel, samples)
    x = jax.random.normal(k_x, (B, 1, L), dtype=jnp.float32)
    params = init_feature_extractor_params(k_param)

    fwd = jax.jit(feature_extractor_forward)
    out = jax.block_until_ready(fwd(params, x))

    # expected: (B, 128, L // 64) = (2, 128, 16)
    assert out.shape == (B, 128, L // 64), out.shape
    assert bool(jnp.all(jnp.isfinite(out)))
    print("KERNEL_OK")
</pallas_src>

<mosaic_0001>
module attributes {stable_mosaic.version = 11 : i64} {
  func.func @_fused_kernel(%arg0: i32, %arg1: memref<1x256x4xf32, #tpu.memory_space<vmem>>, %arg2: memref<4x128xbf16, #tpu.memory_space<vmem>>, %arg3: memref<38x128x128xbf16, #tpu.memory_space<vmem>>, %arg4: memref<11x128xf32, #tpu.memory_space<vmem>>, %arg5: memref<1x16x128xf32, #tpu.memory_space<vmem>>, %arg6: memref<260x128xf32, #tpu.memory_space<vmem>>, %arg7: memref<260x128xf32, #tpu.memory_space<vmem>>) attributes {dimension_semantics = [#tpu.dimension_semantics<parallel>], iteration_bounds = array<i64: 2>, scalar_prefetch = 0 : i64, scratch_operands = 2 : i64, tpu.core_type = #tpu.core_type<tc>, window_params = [{transform_indices = @transform_0, window_bounds = array<i64: 1, 256, 4>}, {pipeline_mode = #tpu.pipeline_mode<synchronous>, transform_indices = @transform_1, window_bounds = array<i64: 4, 128>}, {pipeline_mode = #tpu.pipeline_mode<synchronous>, transform_indices = @transform_2, window_bounds = array<i64: 38, 128, 128>}, {pipeline_mode = #tpu.pipeline_mode<synchronous>, transform_indices = @transform_3, window_bounds = array<i64: 11, 128>}, {transform_indices = @transform_4, window_bounds = array<i64: 1, 16, 128>}]} {
    %c0 = arith.constant 0 : index
    %c0_0 = arith.constant 0 : index
    %c0_1 = arith.constant 0 : index
    %0 = vector.load %arg1[%c0, %c0_0, %c0_1] : memref<1x256x4xf32, #tpu.memory_space<vmem>>, vector<1x256x4xf32>
    %1 = vector.shape_cast %0 : vector<1x256x4xf32> to vector<256x4xf32>
    %2 = vector.shape_cast %1 : vector<256x4xf32> to vector<1x256x4xf32>
    %cst = arith.constant dense<0.000000e+00> : vector<1xf32>
    %3 = vector.multi_reduction <add>, %2, %cst [1, 2] : vector<1x256x4xf32> to vector<1xf32>
    %4 = vector.shape_cast %3 : vector<1xf32> to vector<1x1x1xf32>
    %5 = vector.extract %4[0, 0, 0] : f32 from vector<1x1x1xf32>
    %6 = arith.mulf %1, %1 : vector<256x4xf32>
    %7 = vector.shape_cast %6 : vector<256x4xf32> to vector<1x256x4xf32>
    %cst_2 = arith.constant dense<0.000000e+00> : vector<1xf32>
    %8 = vector.multi_reduction <add>, %7, %cst_2 [1, 2] : vector<1x256x4xf32> to vector<1xf32>
    %9 = vector.shape_cast %8 : vector<1xf32> to vector<1x1x1xf32>
    %10 = vector.extract %9[0, 0, 0] : f32 from vector<1x1x1xf32>
    %cst_3 = arith.constant 1.024000e+03 : f32
    %11 = arith.divf %5, %cst_3 : f32
    %12 = arith.mulf %5, %11 : f32
    %13 = arith.subf %10, %12 : f32
    %cst_4 = arith.constant 1.023000e+03 : f32
    %14 = arith.divf %13, %cst_4 : f32
    %cst_5 = arith.constant 0.000000e+00 : f32
    %15 = arith.maximumf %14, %cst_5 : f32
    %16 = vector.broadcast %11 : f32 to vector<256x4xf32>
    %17 = arith.subf %1, %16 : vector<256x4xf32>
    %18 = math.sqrt %15 : f32
    %cst_6 = arith.constant 9.99999971E-10 : f32
    %19 = arith.addf %18, %cst_6 : f32
    %20 = vector.broadcast %19 : f32 to vector<256x4xf32>
    %21 = arith.divf %17, %20 : vector<256x4xf32>
    %22 = arith.truncf %21 : vector<256x4xf32> to vector<256x4xbf16>
    %c0_7 = arith.constant 0 : index
    %c0_8 = arith.constant 0 : index
    %23 = vector.load %arg2[%c0_7, %c0_8] : memref<4x128xbf16, #tpu.memory_space<vmem>>, vector<4x128xbf16>
    %cst_9 = arith.constant dense<0.000000e+00> : vector<256x128xf32>
    %24 = tpu.matmul %22, %23, %cst_9 {dimension_numbers = #tpu.dot_dimension_numbers<[1], [0], [0], [1], [0, 0, 1, 1], [], []>} : vector<256x4xbf16>, vector<4x128xbf16>, vector<256x128xf32> -> vector<256x128xf32>
    %c0_10 = arith.constant 0 : index
    %c0_11 = arith.constant 0 : index
    %25 = vector.load %arg4[%c0_10, %c0_11] : memref<11x128xf32, #tpu.memory_space<vmem>>, vector<1x128xf32>
    %26 = vector.broadcast %25 : vector<1x128xf32> to vector<256x128xf32>
    %27 = arith.addf %24, %26 : vector<256x128xf32>
    %cst_12 = arith.constant 0.000000e+00 : f32
    %28 = vector.broadcast %cst_12 : f32 to vector<256x128xf32>
    %29 = arith.maximumf %27, %28 : vector<256x128xf32>
    %cst_13 = arith.constant 0.000000e+00 : f32
    %30 = vector.broadcast %cst_13 : f32 to vector<1x128xf32>
    %c0_14 = arith.constant 0 : index
    %c0_15 = arith.constant 0 : index
    %31 = vector.load %arg6[%c0_14, %c0_15] : memref<260x128xf32, #tpu.memory_space<vmem>>, vector<1x128xf32>
    tpu.vector_store %arg6[%c0_14, %c0_15], %30 {strides = array<i32>} : memref<260x128xf32, #tpu.memory_space<vmem>>, vector<1x128xf32>,
    %c257 = arith.constant 257 : index
    %c0_16 = arith.constant 0 : index
    %32 = vector.load %arg6[%c257, %c0_16] : memref<260x128xf32, #tpu.memory_space<vmem>>, vector<1x128xf32>
    tpu.vector_store %arg6[%c257, %c0_16], %30 {strides = array<i32>} : memref<260x128xf32, #tpu.memory_space<vmem>>, vector<1x128xf32>,
    %c1 = arith.constant 1 : index
    %c0_17 = arith.constant 0 : index
    %33 = vector.load %arg6[%c1, %c0_17] : memref<260x128xf32, #tpu.memory_space<vmem>>, vector<256x128xf32>
    tpu.vector_store %arg6[%c1, %c0_17], %29 {strides = array<i32>} : memref<260x128xf32, #tpu.memory_space<vmem>>, vector<256x128xf32>,
    %c0_18 = arith.constant 0 : index
    %c0_19 = arith.constant 0 : index
    %34 = vector.load %arg6[%c0_18, %c0_19] : memref<260x128xf32, #tpu.memory_space<vmem>>, vector<256x128xf32>
    %35 = arith.truncf %34 : vector<256x128xf32> to vector<256x128xbf16>
    %c0_20 = arith.constant 0 : index
    %c0_21 = arith.constant 0 : index
    %c0_22 = arith.constant 0 : index
    %36 = vector.load %arg3[%c0_20, %c0_21, %c0_22] : memref<38x128x128xbf16, #tpu.memory_space<vmem>>, vector<1x128x128xbf16>
    %37 = vector.shape_cast %36 : vector<1x128x128xbf16> to vector<128x128xbf16>
    %cst_23 = arith.constant dense<0.000000e+00> : vector<256x128xf32>
    %38 = tpu.matmul %35, %37, %cst_23 {dimension_numbers = #tpu.dot_dimension_numbers<[1], [0], [0], [1], [0, 0, 1, 1], [], []>} : vector<256x128xbf16>, vector<128x128xbf16>, vector<256x128xf32> -> vector<256x128xf32>
    %c1_24 = arith.constant 1 : index
    %c0_25 = arith.constant 0 : index
    %39 = vector.load %arg6[%c1_24, %c0_25] : memref<260x128xf32, #tpu.memory_space<vmem>>, vector<256x128xf32>
    %40 = arith.truncf %39 : vector<256x128xf32> to vector<256x128xbf16>
    %c1_26 = arith.constant 1 : index
    %c0_27 = arith.constant 0 : index
    %c0_28 = arith.constant 0 : index
    %41 = vector.load %arg3[%c1_26, %c0_27, %c0_28] : memref<38x128x128xbf16, #tpu.memory_space<vmem>>, vector<1x128x128xbf16>
    %42 = vector.shape_cast %41 : vector<1x128x128xbf16> to vector<128x128xbf16>
    %cst_29 = arith.constant dense<0.000000e+00> : vector<256x128xf32>
    %43 = tpu.matmul %40, %42, %cst_29 {dimension_numbers = #tpu.dot_dimension_numbers<[1], [0], [0], [1], [0, 0, 1, 1], [], []>} : vector<256x128xbf16>, vector<128x128xbf16>, vector<256x128xf32> -> vector<256x128xf32>
    %44 = arith.addf %38, %43 : vector<256x128xf32>
    %c2 = arith.constant 2 : index
    %c0_30 = arith.constant 0 : index
    %45 = vector.load %arg6[%c2, %c0_30] : memref<260x128xf32, #tpu.memory_space<vmem>>, vector<256x128xf32>
    %46 = arith.truncf %45 : vector<256x128xf32> to vector<256x128xbf16>
    %c2_31 = arith.constant 2 : index
    %c0_32 = arith.constant 0 : index
    %c0_33 = arith.constant 0 : index
    %47 = vector.load %arg3[%c2_31, %c0_32, %c0_33] : memref<38x128x128xbf16, #tpu.memory_space<vmem>>, vector<1x128x128xbf16>
    %48 = vector.shape_cast %47 : vector<1x128x128xbf16> to vector<128x128xbf16>
    %cst_34 = arith.constant dense<0.000000e+00> : vector<256x128xf32>
    %49 = tpu.matmul %46, %48, %cst_34 {dimension_numbers = #tpu.dot_dimension_numbers<[1], [0], [0], [1], [0, 0, 1, 1], [], []>} : vector<256x128xbf16>, vector<128x128xbf16>, vector<256x128xf32> -> vector<256x128xf32>
    %50 = arith.addf %44, %49 : vector<256x128xf32>
    %c1_35 = arith.constant 1 : index
    %c0_36 = arith.constant 0 : index
    %51 = vector.load %arg4[%c1_35, %c0_36] : memref<11x128xf32, #tpu.memory_space<vmem>>, vector<1x128xf32>
    %52 = vector.broadcast %51 : vector<1x128xf32> to vector<256x128xf32>
    %53 = arith.addf %50, %52 : vector<256x128xf32>
    %cst_37 = arith.constant 0.000000e+00 : f32
    %54 = vector.broadcast %cst_37 : f32 to vector<1x128xf32>
    %c0_38 = arith.constant 0 : index
    %c0_39 = arith.constant 0 : index
    %55 = vector.load %arg7[%c0_38, %c0_39] : memref<260x128xf32, #tpu.memory_space<vmem>>, vector<1x128xf32>
    tpu.vector_store %arg7[%c0_38, %c0_39], %54 {strides = array<i32>} : memref<260x128xf32, #tpu.memory_space<vmem>>, vector<1x128xf32>,
    %c257_40 = arith.constant 257 : index
    %c0_41 = arith.constant 0 : index
    %56 = vector.load %arg7[%c257_40, %c0_41] : memref<260x128xf32, #tpu.memory_space<vmem>>, vector<1x128xf32>
    tpu.vector_store %arg7[%c257_40, %c0_41], %54 {strides = array<i32>} : memref<260x128xf32, #tpu.memory_space<vmem>>, vector<1x128xf32>,
    %c1_42 = arith.constant 1 : index
    %c0_43 = arith.constant 0 : index
    %57 = vector.load %arg7[%c1_42, %c0_43] : memref<260x128xf32, #tpu.memory_space<vmem>>, vector<256x128xf32>
    tpu.vector_store %arg7[%c1_42, %c0_43], %53 {strides = array<i32>} : memref<260x128xf32, #tpu.memory_space<vmem>>, vector<256x128xf32>,
    %c0_44 = arith.constant 0 : index
    %c0_45 = arith.constant 0 : index
    %58 = vector.load %arg7[%c0_44, %c0_45] : memref<260x128xf32, #tpu.memory_space<vmem>>, vector<256x128xf32>
    %59 = arith.truncf %58 : vector<256x128xf32> to vector<256x128xbf16>
    %c3 = arith.constant 3 : index
    %c0_46 = arith.constant 0 : index
    %c0_47 = arith.constant 0 : index
    %60 = vector.load %arg3[%c3, %c0_46, %c0_47] : memref<38x128x128xbf16, #tpu.memory_space<vmem>>, vector<1x128x128xbf16>
    %61 = vector.shape_cast %60 : vector<1x128x128xbf16> to vector<128x128xbf16>
    %cst_48 = arith.constant dense<0.000000e+00> : vector<256x128xf32>
    %62 = tpu.matmul %59, %61, %cst_48 {dimension_numbers = #tpu.dot_dimension_numbers<[1], [0], [0], [1], [0, 0, 1, 1], [], []>} : vector<256x128xbf16>, vector<128x128xbf16>, vector<256x128xf32> -> vector<256x128xf32>
    %c1_49 = arith.constant 1 : index
    %c0_50 = arith.constant 0 : index
    %63 = vector.load %arg7[%c1_49, %c0_50] : memref<260x128xf32, #tpu.memory_space<vmem>>, vector<256x128xf32>
    %64 = arith.truncf %63 : vector<256x128xf32> to vector<256x128xbf16>
    %c4 = arith.constant 4 : index
    %c0_51 = arith.constant 0 : index
    %c0_52 = arith.constant 0 : index
    %65 = vector.load %arg3[%c4, %c0_51, %c0_52] : memref<38x128x128xbf16, #tpu.memory_space<vmem>>, vector<1x128x128xbf16>
    %66 = vector.shape_cast %65 : vector<1x128x128xbf16> to vector<128x128xbf16>
    %cst_53 = arith.constant dense<0.000000e+00> : vector<256x128xf32>
    %67 = tpu.matmul %64, %66, %cst_53 {dimension_numbers = #tpu.dot_dimension_numbers<[1], [0], [0], [1], [0, 0, 1, 1], [], []>} : vector<256x128xbf16>, vector<128x128xbf16>, vector<256x128xf32> -> vector<256x128xf32>
    %68 = arith.addf %62, %67 : vector<256x128xf32>
    %c2_54 = arith.constant 2 : index
    %c0_55 = arith.constant 0 : index
    %69 = vector.load %arg7[%c2_54, %c0_55] : memref<260x128xf32, #tpu.memory_space<vmem>>, vector<256x128xf32>
    %70 = arith.truncf %69 : vector<256x128xf32> to vector<256x128xbf16>
    %c5 = arith.constant 5 : index
    %c0_56 = arith.constant 0 : index
    %c0_57 = arith.constant 0 : index
    %71 = vector.load %arg3[%c5, %c0_56, %c0_57] : memref<38x128x128xbf16, #tpu.memory_space<vmem>>, vector<1x128x128xbf16>
    %72 = vector.shape_cast %71 : vector<1x128x128xbf16> to vector<128x128xbf16>
    %cst_58 = arith.constant dense<0.000000e+00> : vector<256x128xf32>
    %73 = tpu.matmul %70, %72, %cst_58 {dimension_numbers = #tpu.dot_dimension_numbers<[1], [0], [0], [1], [0, 0, 1, 1], [], []>} : vector<256x128xbf16>, vector<128x128xbf16>, vector<256x128xf32> -> vector<256x128xf32>
    %74 = arith.addf %68, %73 : vector<256x128xf32>
    %c2_59 = arith.constant 2 : index
    %c0_60 = arith.constant 0 : index
    %75 = vector.load %arg4[%c2_59, %c0_60] : memref<11x128xf32, #tpu.memory_space<vmem>>, vector<1x128xf32>
    %76 = vector.broadcast %75 : vector<1x128xf32> to vector<256x128xf32>
    %77 = arith.addf %74, %76 : vector<256x128xf32>
    %cst_61 = arith.constant 0.000000e+00 : f32
    %78 = vector.broadcast %cst_61 : f32 to vector<2x128xf32>
    %c0_62 = arith.constant 0 : index
    %c0_63 = arith.constant 0 : index
    %79 = vector.load %arg6[%c0_62, %c0_63] : memref<260x128xf32, #tpu.memory_space<vmem>>, vector<2x128xf32>
    tpu.vector_store %arg6[%c0_62, %c0_63], %78 {strides = array<i32>} : memref<260x128xf32, #tpu.memory_space<vmem>>, vector<2x128xf32>,
    %c258 = arith.constant 258 : index
    %c0_64 = arith.constant 0 : index
    %80 = vector.load %arg6[%c258, %c0_64] : memref<260x128xf32, #tpu.memory_space<vmem>>, vector<2x128xf32>
    tpu.vector_store %arg6[%c258, %c0_64], %78 {strides = array<i32>} : memref<260x128xf32, #tpu.memory_space<vmem>>, vector<2x128xf32>,
    %c2_65 = arith.constant 2 : index
    %c0_66 = arith.constant 0 : index
    %81 = vector.load %arg6[%c2_65, %c0_66] : memref<260x128xf32, #tpu.memory_space<vmem>>, vector<256x128xf32>
    tpu.vector_store %arg6[%c2_65, %c0_66], %77 {strides = array<i32>} : memref<260x128xf32, #tpu.memory_space<vmem>>, vector<256x128xf32>,
    %c0_67 = arith.constant 0 : index
    %c0_68 = arith.constant 0 : index
    %82 = tpu.strided_load %arg6[%c0_67, %c0_68] {strides = array<i32: 2, 1>} : memref<260x128xf32, #tpu.memory_space<vmem>>, vector<128x128xf32>
    %83 = arith.truncf %82 : vector<128x128xf32> to vector<128x128xbf16>
    %c6 = arith.constant 6 : index
    %c0_69 = arith.constant 0 : index
    %c0_70 = arith.constant 0 : index
    %84 = vector.load %arg3[%c6, %c0_69, %c0_70] : memref<38x128x128xbf16, #tpu.memory_space<vmem>>, vector<1x128x128xbf16>
    %85 = vector.shape_cast %84 : vector<1x128x128xbf16> to vector<128x128xbf16>
    %cst_71 = arith.constant dense<0.000000e+00> : vector<128x128xf32>
    %86 = tpu.matmul %83, %85, %cst_71 {dimension_numbers = #tpu.dot_dimension_numbers<[1], [0], [0], [1], [0, 0, 1, 1], [], []>} : vector<128x128xbf16>, vector<128x128xbf16>, vector<128x128xf32> -> vector<128x128xf32>
    %c1_72 = arith.constant 1 : index
    %c0_73 = arith.constant 0 : index
    %87 = tpu.strided_load %arg6[%c1_72, %c0_73] {strides = array<i32: 2, 1>} : memref<260x128xf32, #tpu.memory_space<vmem>>, vector<128x128xf32>
    %88 = arith.truncf %87 : vector<128x128xf32> to vector<128x128xbf16>
    %c7 = arith.constant 7 : index
    %c0_74 = arith.constant 0 : index
    %c0_75 = arith.constant 0 : index
    %89 = vector.load %arg3[%c7, %c0_74, %c0_75] : memref<38x128x128xbf16, #tpu.memory_space<vmem>>, vector<1x128x128xbf16>
    %90 = vector.shape_cast %89 : vector<1x128x128xbf16> to vector<128x128xbf16>
    %cst_76 = arith.constant dense<0.000000e+00> : vector<128x128xf32>
    %91 = tpu.matmul %88, %90, %cst_76 {dimension_numbers = #tpu.dot_dimension_numbers<[1], [0], [0], [1], [0, 0, 1, 1], [], []>} : vector<128x128xbf16>, vector<128x128xbf16>, vector<128x128xf32> -> vector<128x128xf32>
    %92 = arith.addf %86, %91 : vector<128x128xf32>
    %c2_77 = arith.constant 2 : index
    %c0_78 = arith.constant 0 : index
    %93 = tpu.strided_load %arg6[%c2_77, %c0_78] {strides = array<i32: 2, 1>} : memref<260x128xf32, #tpu.memory_space<vmem>>, vector<128x128xf32>
    %94 = arith.truncf %93 : vector<128x128xf32> to vector<128x128xbf16>
    %c8 = arith.constant 8 : index
    %c0_79 = arith.constant 0 : index
    %c0_80 = arith.constant 0 : index
    %95 = vector.load %arg3[%c8, %c0_79, %c0_80] : memref<38x128x128xbf16, #tpu.memory_space<vmem>>, vector<1x128x128xbf16>
    %96 = vector.shape_cast %95 : vector<1x128x128xbf16> to vector<128x128xbf16>
    %cst_81 = arith.constant dense<0.000000e+00> : vector<128x128xf32>
    %97 = tpu.matmul %94, %96, %cst_81 {dimension_numbers = #tpu.dot_dimension_numbers<[1], [0], [0], [1], [0, 0, 1, 1], [], []>} : vector<128x128xbf16>, vector<128x128xbf16>, vector<128x128xf32> -> vector<128x128xf32>
    %98 = arith.addf %92, %97 : vector<128x128xf32>
    %c3_82 = arith.constant 3 : index
    %c0_83 = arith.constant 0 : index
    %99 = tpu.strided_load %arg6[%c3_82, %c0_83] {strides = array<i32: 2, 1>} : memref<260x128xf32, #tpu.memory_space<vmem>>, vector<128x128xf32>
    %100 = arith.truncf %99 : vector<128x128xf32> to vector<128x128xbf16>
    %c9 = arith.constant 9 : index
    %c0_84 = arith.constant 0 : index
    %c0_85 = arith.constant 0 : index
    %101 = vector.load %arg3[%c9, %c0_84, %c0_85] : memref<38x128x128xbf16, #tpu.memory_space<vmem>>, vector<1x128x128xbf16>
    %102 = vector.shape_cast %101 : vector<1x128x128xbf16> to vector<128x128xbf16>
    %cst_86 = arith.constant dense<0.000000e+00> : vector<128x128xf32>
    %103 = tpu.matmul %100, %102, %cst_86 {dimension_numbers = #tpu.dot_dimension_numbers<[1], [0], [0], [1], [0, 0, 1, 1], [], []>} : vector<128x128xbf16>, vector<128x128xbf16>, vector<128x128xf32> -> vector<128x128xf32>
    %104 = arith.addf %98, %103 : vector<128x128xf32>
    %c4_87 = arith.constant 4 : index
    %c0_88 = arith.constant 0 : index
    %105 = tpu.strided_load %arg6[%c4_87, %c0_88] {strides = array<i32: 2, 1>} : memref<260x128xf32, #tpu.memory_space<vmem>>, vector<128x128xf32>
    %106 = arith.truncf %105 : vector<128x128xf32> to vector<128x128xbf16>
    %c10 = arith.constant 10 : index
    %c0_89 = arith.constant 0 : index
    %c0_90 = arith.constant 0 : index
    %107 = vector.load %arg3[%c10, %c0_89, %c0_90] : memref<38x128x128xbf16, #tpu.memory_space<vmem>>, vector<1x128x128xbf16>
    %108 = vector.shape_cast %107 : vector<1x128x128xbf16> to vector<128x128xbf16>
    %cst_91 = arith.constant dense<0.000000e+00> : vector<128x128xf32>
    %109 = tpu.matmul %106, %108, %cst_91 {dimension_numbers = #tpu.dot_dimension_numbers<[1], [0], [0], [1], [0, 0, 1, 1], [], []>} : vector<128x128xbf16>, vector<128x128xbf16>, vector<128x128xf32> -> vector<128x128xf32>
    %110 = arith.addf %104, %109 : vector<128x128xf32>
    %c3_92 = arith.constant 3 : index
    %c0_93 = arith.constant 0 : index
    %111 = vector.load %arg4[%c3_92, %c0_93] : memref<11x128xf32, #tpu.memory_space<vmem>>, vector<1x128xf32>
    %112 = vector.broadcast %111 : vector<1x128xf32> to vector<128x128xf32>
    %113 = arith.addf %110, %112 : vector<128x128xf32>
    %cst_94 = arith.constant 0.000000e+00 : f32
    %114 = vector.broadcast %cst_94 : f32 to vector<1x128xf32>
    %c0_95 = arith.constant 0 : index
    %c0_96 = arith.constant 0 : index
    %115 = vector.load %arg7[%c0_95, %c0_96] : memref<260x128xf32, #tpu.memory_space<vmem>>, vector<1x128xf32>
    tpu.vector_store %arg7[%c0_95, %c0_96], %114 {strides = array<i32>} : memref<260x128xf32, #tpu.memory_space<vmem>>, vector<1x128xf32>,
    %c129 = arith.constant 129 : index
    %c0_97 = arith.constant 0 : index
    %116 = vector.load %arg7[%c129, %c0_97] : memref<260x128xf32, #tpu.memory_space<vmem>>, vector<1x128xf32>
    tpu.vector_store %arg7[%c129, %c0_97], %114 {strides = array<i32>} : memref<260x128xf32, #tpu.memory_space<vmem>>, vector<1x128xf32>,
    %c1_98 = arith.constant 1 : index
    %c0_99 = arith.constant 0 : index
    %117 = vector.load %arg7[%c1_98, %c0_99] : memref<260x128xf32, #tpu.memory_space<vmem>>, vector<128x128xf32>
    tpu.vector_store %arg7[%c1_98, %c0_99], %113 {strides = array<i32>} : memref<260x128xf32, #tpu.memory_space<vmem>>, vector<128x128xf32>,
    %c0_100 = arith.constant 0 : index
    %c0_101 = arith.constant 0 : index
    %118 = vector.load %arg7[%c0_100, %c0_101] : memref<260x128xf32, #tpu.memory_space<vmem>>, vector<128x128xf32>
    %119 = arith.truncf %118 : vector<128x128xf32> to vector<128x128xbf16>
    %c11 = arith.constant 11 : index
    %c0_102 = arith.constant 0 : index
    %c0_103 = arith.constant 0 : index
    %120 = vector.load %arg3[%c11, %c0_102, %c0_103] : memref<38x128x128xbf16, #tpu.memory_space<vmem>>, vector<1x128x128xbf16>
    %121 = vector.shape_cast %120 : vector<1x128x128xbf16> to vector<128x128xbf16>
    %cst_104 = arith.constant dense<0.000000e+00> : vector<128x128xf32>
    %122 = tpu.matmul %119, %121, %cst_104 {dimension_numbers = #tpu.dot_dimension_numbers<[1], [0], [0], [1], [0, 0, 1, 1], [], []>} : vector<128x128xbf16>, vector<128x128xbf16>, vector<128x128xf32> -> vector<128x128xf32>
    %c1_105 = arith.constant 1 : index
    %c0_106 = arith.constant 0 : index
    %123 = vector.load %arg7[%c1_105, %c0_106] : memref<260x128xf32, #tpu.memory_space<vmem>>, vector<128x128xf32>
    %124 = arith.truncf %123 : vector<128x128xf32> to vector<128x128xbf16>
    %c12 = arith.constant 12 : index
    %c0_107 = arith.constant 0 : index
    %c0_108 = arith.constant 0 : index
    %125 = vector.load %arg3[%c12, %c0_107, %c0_108] : memref<38x128x128xbf16, #tpu.memory_space<vmem>>, vector<1x128x128xbf16>
    %126 = vector.shape_cast %125 : vector<1x128x128xbf16> to vector<128x128xbf16>
    %cst_109 = arith.constant dense<0.000000e+00> : vector<128x128xf32>
    %127 = tpu.matmul %124, %126, %cst_109 {dimension_numbers = #tpu.dot_dimension_numbers<[1], [0], [0], [1], [0, 0, 1, 1], [], []>} : vector<128x128xbf16>, vector<128x128xbf16>, vector<128x128xf32> -> vector<128x128xf32>
    %128 = arith.addf %122, %127 : vector<128x128xf32>
    %c2_110 = arith.constant 2 : index
    %c0_111 = arith.constant 0 : index
    %129 = vector.load %arg7[%c2_110, %c0_111] : memref<260x128xf32, #tpu.memory_space<vmem>>, vector<128x128xf32>
    %130 = arith.truncf %129 : vector<128x128xf32> to vector<128x128xbf16>
    %c13 = arith.constant 13 : index
    %c0_112 = arith.constant 0 : index
    %c0_113 = arith.constant 0 : index
    %131 = vector.load %arg3[%c13, %c0_112, %c0_113] : memref<38x128x128xbf16, #tpu.memory_space<vmem>>, vector<1x128x128xbf16>
    %132 = vector.shape_cast %131 : vector<1x128x128xbf16> to vector<128x128xbf16>
    %cst_114 = arith.constant dense<0.000000e+00> : vector<128x128xf32>
    %133 = tpu.matmul %130, %132, %cst_114 {dimension_numbers = #tpu.dot_dimension_numbers<[1], [0], [0], [1], [0, 0, 1, 1], [], []>} : vector<128x128xbf16>, vector<128x128xbf16>, vector<128x128xf32> -> vector<128x128xf32>
    %134 = arith.addf %128, %133 : vector<128x128xf32>
    %c4_115 = arith.constant 4 : index
    %c0_116 = arith.constant 0 : index
    %135 = vector.load %arg4[%c4_115, %c0_116] : memref<11x128xf32, #tpu.memory_space<vmem>>, vector<1x128xf32>
    %136 = vector.broadcast %135 : vector<1x128xf32> to vector<128x128xf32>
    %137 = arith.addf %134, %136 : vector<128x128xf32>
    %cst_117 = arith.constant 0.000000e+00 : f32
    %138 = vector.broadcast %cst_117 : f32 to vector<2x128xf32>
    %c0_118 = arith.constant 0 : index
    %c0_119 = arith.constant 0 : index
    %139 = vector.load %arg6[%c0_118, %c0_119] : memref<260x128xf32, #tpu.memory_space<vmem>>, vector<2x128xf32>
    tpu.vector_store %arg6[%c0_118, %c0_119], %138 {strides = array<i32>} : memref<260x128xf32, #tpu.memory_space<vmem>>, vector<2x128xf32>,
    %c130 = arith.constant 130 : index
    %c0_120 = arith.constant 0 : index
    %140 = vector.load %arg6[%c130, %c0_120] : memref<260x128xf32, #tpu.memory_space<vmem>>, vector<2x128xf32>
    tpu.vector_store %arg6[%c130, %c0_120], %138 {strides = array<i32>} : memref<260x128xf32, #tpu.memory_space<vmem>>, vector<2x128xf32>,
    %c2_121 = arith.constant 2 : index
    %c0_122 = arith.constant 0 : index
    %141 = vector.load %arg6[%c2_121, %c0_122] : memref<260x128xf32, #tpu.memory_space<vmem>>, vector<128x128xf32>
    tpu.vector_store %arg6[%c2_121, %c0_122], %137 {strides = array<i32>} : memref<260x128xf32, #tpu.memory_space<vmem>>, vector<128x128xf32>,
    %c0_123 = arith.constant 0 : index
    %c0_124 = arith.constant 0 : index
    %142 = tpu.strided_load %arg6[%c0_123, %c0_124] {strides = array<i32: 2, 1>} : memref<260x128xf32, #tpu.memory_space<vmem>>, vector<64x128xf32>
    %143 = arith.truncf %142 : vector<64x128xf32> to vector<64x128xbf16>
    %c14 = arith.constant 14 : index
    %c0_125 = arith.constant 0 : index
    %c0_126 = arith.constant 0 : index
    %144 = vector.load %arg3[%c14, %c0_125, %c0_126] : memref<38x128x128xbf16, #tpu.memory_space<vmem>>, vector<1x128x128xbf16>
    %145 = vector.shape_cast %144 : vector<1x128x128xbf16> to vector<128x128xbf16>
    %cst_127 = arith.constant dense<0.000000e+00> : vector<64x128xf32>
    %146 = tpu.matmul %143, %145, %cst_127 {dimension_numbers = #tpu.dot_dimension_numbers<[1], [0], [0], [1], [0, 0, 1, 1], [], []>} : vector<64x128xbf16>, vector<128x128xbf16>, vector<64x128xf32> -> vector<64x128xf32>
    %c1_128 = arith.constant 1 : index
    %c0_129 = arith.constant 0 : index
    %147 = tpu.strided_load %arg6[%c1_128, %c0_129] {strides = array<i32: 2, 1>} : memref<260x128xf32, #tpu.memory_space<vmem>>, vector<64x128xf32>
    %148 = arith.truncf %147 : vector<64x128xf32> to vector<64x128xbf16>
    %c15 = arith.constant 15 : index
    %c0_130 = arith.constant 0 : index
    %c0_131 = arith.constant 0 : index
    %149 = vector.load %arg3[%c15, %c0_130, %c0_131] : memref<38x128x128xbf16, #tpu.memory_space<vmem>>, vector<1x128x128xbf16>
    %150 = vector.shape_cast %149 : vector<1x128x128xbf16> to vector<128x128xbf16>
    %cst_132 = arith.constant dense<0.000000e+00> : vector<64x128xf32>
    %151 = tpu.matmul %148, %150, %cst_132 {dimension_numbers = #tpu.dot_dimension_numbers<[1], [0], [0], [1], [0, 0, 1, 1], [], []>} : vector<64x128xbf16>, vector<128x128xbf16>, vector<64x128xf32> -> vector<64x128xf32>
    %152 = arith.addf %146, %151 : vector<64x128xf32>
    %c2_133 = arith.constant 2 : index
    %c0_134 = arith.constant 0 : index
    %153 = tpu.strided_load %arg6[%c2_133, %c0_134] {strides = array<i32: 2, 1>} : memref<260x128xf32, #tpu.memory_space<vmem>>, vector<64x128xf32>
    %154 = arith.truncf %153 : vector<64x128xf32> to vector<64x128xbf16>
    %c16 = arith.constant 16 : index
    %c0_135 = arith.constant 0 : index
    %c0_136 = arith.constant 0 : index
    %155 = vector.load %arg3[%c16, %c0_135, %c0_136] : memref<38x128x128xbf16, #tpu.memory_space<vmem>>, vector<1x128x128xbf16>
    %156 = vector.shape_cast %155 : vector<1x128x128xbf16> to vector<128x128xbf16>
    %cst_137 = arith.constant dense<0.000000e+00> : vector<64x128xf32>
    %157 = tpu.matmul %154, %156, %cst_137 {dimension_numbers = #tpu.dot_dimension_numbers<[1], [0], [0], [1], [0, 0, 1, 1], [], []>} : vector<64x128xbf16>, vector<128x128xbf16>, vector<64x128xf32> -> vector<64x128xf32>
    %158 = arith.addf %152, %157 : vector<64x128xf32>
    %c3_138 = arith.constant 3 : index
    %c0_139 = arith.constant 0 : index
    %159 = tpu.strided_load %arg6[%c3_138, %c0_139] {strides = array<i32: 2, 1>} : memref<260x128xf32, #tpu.memory_space<vmem>>, vector<64x128xf32>
    %160 = arith.truncf %159 : vector<64x128xf32> to vector<64x128xbf16>
    %c17 = arith.constant 17 : index
    %c0_140 = arith.constant 0 : index
    %c0_141 = arith.constant 0 : index
    %161 = vector.load %arg3[%c17, %c0_140, %c0_141] : memref<38x128x128xbf16, #tpu.memory_space<vmem>>, vector<1x128x128xbf16>
    %162 = vector.shape_cast %161 : vector<1x128x128xbf16> to vector<128x128xbf16>
    %cst_142 = arith.constant dense<0.000000e+00> : vector<64x128xf32>
    %163 = tpu.matmul %160, %162, %cst_142 {dimension_numbers = #tpu.dot_dimension_numbers<[1], [0], [0], [1], [0, 0, 1, 1], [], []>} : vector<64x128xbf16>, vector<128x128xbf16>, vector<64x128xf32> -> vector<64x128xf32>
    %164 = arith.addf %158, %163 : vector<64x128xf32>
    %c4_143 = arith.constant 4 : index
    %c0_144 = arith.constant 0 : index
    %165 = tpu.strided_load %arg6[%c4_143, %c0_144] {strides = array<i32: 2, 1>} : memref<260x128xf32, #tpu.memory_space<vmem>>, vector<64x128xf32>
    %166 = arith.truncf %165 : vector<64x128xf32> to vector<64x128xbf16>
    %c18 = arith.constant 18 : index
    %c0_145 = arith.constant 0 : index
    %c0_146 = arith.constant 0 : index
    %167 = vector.load %arg3[%c18, %c0_145, %c0_146] : memref<38x128x128xbf16, #tpu.memory_space<vmem>>, vector<1x128x128xbf16>
    %168 = vector.shape_cast %167 : vector<1x128x128xbf16> to vector<128x128xbf16>
    %cst_147 = arith.constant dense<0.000000e+00> : vector<64x128xf32>
    %169 = tpu.matmul %166, %168, %cst_147 {dimension_numbers = #tpu.dot_dimension_numbers<[1], [0], [0], [1], [0, 0, 1, 1], [], []>} : vector<64x128xbf16>, vector<128x128xbf16>, vector<64x128xf32> -> vector<64x128xf32>
    %170 = arith.addf %164, %169 : vector<64x128xf32>
    %c5_148 = arith.constant 5 : index
    %c0_149 = arith.constant 0 : index
    %171 = vector.load %arg4[%c5_148, %c0_149] : memref<11x128xf32, #tpu.memory_space<vmem>>, vector<1x128xf32>
    %172 = vector.broadcast %171 : vector<1x128xf32> to vector<64x128xf32>
    %173 = arith.addf %170, %172 : vector<64x128xf32>
    %cst_150 = arith.constant 0.000000e+00 : f32
    %174 = vector.broadcast %cst_150 : f32 to vector<1x128xf32>
    %c0_151 = arith.constant 0 : index
    %c0_152 = arith.constant 0 : index
    %175 = vector.load %arg7[%c0_151, %c0_152] : memref<260x128xf32, #tpu.memory_space<vmem>>, vector<1x128xf32>
    tpu.vector_store %arg7[%c0_151, %c0_152], %174 {strides = array<i32>} : memref<260x128xf32, #tpu.memory_space<vmem>>, vector<1x128xf32>,
    %c65 = arith.constant 65 : index
    %c0_153 = arith.constant 0 : index
    %176 = vector.load %arg7[%c65, %c0_153] : memref<260x128xf32, #tpu.memory_space<vmem>>, vector<1x128xf32>
    tpu.vector_store %arg7[%c65, %c0_153], %174 {strides = array<i32>} : memref<260x128xf32, #tpu.memory_space<vmem>>, vector<1x128xf32>,
    %c1_154 = arith.constant 1 : index
    %c0_155 = arith.constant 0 : index
    %177 = vector.load %arg7[%c1_154, %c0_155] : memref<260x128xf32, #tpu.memory_space<vmem>>, vector<64x128xf32>
    tpu.vector_store %arg7[%c1_154, %c0_155], %173 {strides = array<i32>} : memref<260x128xf32, #tpu.memory_space<vmem>>, vector<64x128xf32>,
    %c0_156 = arith.constant 0 : index
    %c0_157 = arith.constant 0 : index
    %178 = vector.load %arg7[%c0_156, %c0_157] : memref<260x128xf32, #tpu.memory_space<vmem>>, vector<64x128xf32>
    %179 = arith.truncf %178 : vector<64x128xf32> to vector<64x128xbf16>
    %c19 = arith.constant 19 : index
    %c0_158 = arith.constant 0 : index
    %c0_159 = arith.constant 0 : index
    %180 = vector.load %arg3[%c19, %c0_158, %c0_159] : memref<38x128x128xbf16, #tpu.memory_space<vmem>>, vector<1x128x128xbf16>
    %181 = vector.shape_cast %180 : vector<1x128x128xbf16> to vector<128x128xbf16>
    %cst_160 = arith.constant dense<0.000000e+00> : vector<64x128xf32>
    %182 = tpu.matmul %179, %181, %cst_160 {dimension_numbers = #tpu.dot_dimension_numbers<[1], [0], [0], [1], [0, 0, 1, 1], [], []>} : vector<64x128xbf16>, vector<128x128xbf16>, vector<64x128xf32> -> vector<64x128xf32>
    %c1_161 = arith.constant 1 : index
    %c0_162 = arith.constant 0 : index
    %183 = vector.load %arg7[%c1_161, %c0_162] : memref<260x128xf32, #tpu.memory_space<vmem>>, vector<64x128xf32>
    %184 = arith.truncf %183 : vector<64x128xf32> to vector<64x128xbf16>
    %c20 = arith.constant 20 : index
    %c0_163 = arith.constant 0 : index
    %c0_164 = arith.constant 0 : index
    %185 = vector.load %arg3[%c20, %c0_163, %c0_164] : memref<38x128x128xbf16, #tpu.memory_space<vmem>>, vector<1x128x128xbf16>
    %186 = vector.shape_cast %185 : vector<1x128x128xbf16> to vector<128x128xbf16>
    %cst_165 = arith.constant dense<0.000000e+00> : vector<64x128xf32>
    %187 = tpu.matmul %184, %186, %cst_165 {dimension_numbers = #tpu.dot_dimension_numbers<[1], [0], [0], [1], [0, 0, 1, 1], [], []>} : vector<64x128xbf16>, vector<128x128xbf16>, vector<64x128xf32> -> vector<64x128xf32>
    %188 = arith.addf %182, %187 : vector<64x128xf32>
    %c2_166 = arith.constant 2 : index
    %c0_167 = arith.constant 0 : index
    %189 = vector.load %arg7[%c2_166, %c0_167] : memref<260x128xf32, #tpu.memory_space<vmem>>, vector<64x128xf32>
    %190 = arith.truncf %189 : vector<64x128xf32> to vector<64x128xbf16>
    %c21 = arith.constant 21 : index
    %c0_168 = arith.constant 0 : index
    %c0_169 = arith.constant 0 : index
    %191 = vector.load %arg3[%c21, %c0_168, %c0_169] : memref<38x128x128xbf16, #tpu.memory_space<vmem>>, vector<1x128x128xbf16>
    %192 = vector.shape_cast %191 : vector<1x128x128xbf16> to vector<128x128xbf16>
    %cst_170 = arith.constant dense<0.000000e+00> : vector<64x128xf32>
    %193 = tpu.matmul %190, %192, %cst_170 {dimension_numbers = #tpu.dot_dimension_numbers<[1], [0], [0], [1], [0, 0, 1, 1], [], []>} : vector<64x128xbf16>, vector<128x128xbf16>, vector<64x128xf32> -> vector<64x128xf32>
    %194 = arith.addf %188, %193 : vector<64x128xf32>
    %c6_171 = arith.constant 6 : index
    %c0_172 = arith.constant 0 : index
    %195 = vector.load %arg4[%c6_171, %c0_172] : memref<11x128xf32, #tpu.memory_space<vmem>>, vector<1x128xf32>
    %196 = vector.broadcast %195 : vector<1x128xf32> to vector<64x128xf32>
    %197 = arith.addf %194, %196 : vector<64x128xf32>
    %cst_173 = arith.constant 0.000000e+00 : f32
    %198 = vector.broadcast %cst_173 : f32 to vector<2x128xf32>
    %c0_174 = arith.constant 0 : index
    %c0_175 = arith.constant 0 : index
    %199 = vector.load %arg6[%c0_174, %c0_175] : memref<260x128xf32, #tpu.memory_space<vmem>>, vector<2x128xf32>
    tpu.vector_store %arg6[%c0_174, %c0_175], %198 {strides = array<i32>} : memref<260x128xf32, #tpu.memory_space<vmem>>, vector<2x128xf32>,
    %c66 = arith.constant 66 : index
    %c0_176 = arith.constant 0 : index
    %200 = vector.load %arg6[%c66, %c0_176] : memref<260x128xf32, #tpu.memory_space<vmem>>, vector<2x128xf32>
    tpu.vector_store %arg6[%c66, %c0_176], %198 {strides = array<i32>} : memref<260x128xf32, #tpu.memory_space<vmem>>, vector<2x128xf32>,
    %c2_177 = arith.constant 2 : index
    %c0_178 = arith.constant 0 : index
    %201 = vector.load %arg6[%c2_177, %c0_178] : memref<260x128xf32, #tpu.memory_space<vmem>>, vector<64x128xf32>
    tpu.vector_store %arg6[%c2_177, %c0_178], %197 {strides = array<i32>} : memref<260x128xf32, #tpu.memory_space<vmem>>, vector<64x128xf32>,
    %c0_179 = arith.constant 0 : index
    %c0_180 = arith.constant 0 : index
    %202 = tpu.strided_load %arg6[%c0_179, %c0_180] {strides = array<i32: 2, 1>} : memref<260x128xf32, #tpu.memory_space<vmem>>, vector<32x128xf32>
    %203 = arith.truncf %202 : vector<32x128xf32> to vector<32x128xbf16>
    %c22 = arith.constant 22 : index
    %c0_181 = arith.constant 0 : index
    %c0_182 = arith.constant 0 : index
    %204 = vector.load %arg3[%c22, %c0_181, %c0_182] : memref<38x128x128xbf16, #tpu.memory_space<vmem>>, vector<1x128x128xbf16>
    %205 = vector.shape_cast %204 : vector<1x128x128xbf16> to vector<128x128xbf16>
    %cst_183 = arith.constant dense<0.000000e+00> : vector<32x128xf32>
    %206 = tpu.matmul %203, %205, %cst_183 {dimension_numbers = #tpu.dot_dimension_numbers<[1], [0], [0], [1], [0, 0, 1, 1], [], []>} : vector<32x128xbf16>, vector<128x128xbf16>, vector<32x128xf32> -> vector<32x128xf32>
    %c1_184 = arith.constant 1 : index
    %c0_185 = arith.constant 0 : index
    %207 = tpu.strided_load %arg6[%c1_184, %c0_185] {strides = array<i32: 2, 1>} : memref<260x128xf32, #tpu.memory_space<vmem>>, vector<32x128xf32>
    %208 = arith.truncf %207 : vector<32x128xf32> to vector<32x128xbf16>
    %c23 = arith.constant 23 : index
    %c0_186 = arith.constant 0 : index
    %c0_187 = arith.constant 0 : index
    %209 = vector.load %arg3[%c23, %c0_186, %c0_187] : memref<38x128x128xbf16, #tpu.memory_space<vmem>>, vector<1x128x128xbf16>
    %210 = vector.shape_cast %209 : vector<1x128x128xbf16> to vector<128x128xbf16>
    %cst_188 = arith.constant dense<0.000000e+00> : vector<32x128xf32>
    %211 = tpu.matmul %208, %210, %cst_188 {dimension_numbers = #tpu.dot_dimension_numbers<[1], [0], [0], [1], [0, 0, 1, 1], [], []>} : vector<32x128xbf16>, vector<128x128xbf16>, vector<32x128xf32> -> vector<32x128xf32>
    %212 = arith.addf %206, %211 : vector<32x128xf32>
    %c2_189 = arith.constant 2 : index
    %c0_190 = arith.constant 0 : index
    %213 = tpu.strided_load %arg6[%c2_189, %c0_190] {strides = array<i32: 2, 1>} : memref<260x128xf32, #tpu.memory_space<vmem>>, vector<32x128xf32>
    %214 = arith.truncf %213 : vector<32x128xf32> to vector<32x128xbf16>
    %c24 = arith.constant 24 : index
    %c0_191 = arith.constant 0 : index
    %c0_192 = arith.constant 0 : index
    %215 = vector.load %arg3[%c24, %c0_191, %c0_192] : memref<38x128x128xbf16, #tpu.memory_space<vmem>>, vector<1x128x128xbf16>
    %216 = vector.shape_cast %215 : vector<1x128x128xbf16> to vector<128x128xbf16>
    %cst_193 = arith.constant dense<0.000000e+00> : vector<32x128xf32>
    %217 = tpu.matmul %214, %216, %cst_193 {dimension_numbers = #tpu.dot_dimension_numbers<[1], [0], [0], [1], [0, 0, 1, 1], [], []>} : vector<32x128xbf16>, vector<128x128xbf16>, vector<32x128xf32> -> vector<32x128xf32>
    %218 = arith.addf %212, %217 : vector<32x128xf32>
    %c3_194 = arith.constant 3 : index
    %c0_195 = arith.constant 0 : index
    %219 = tpu.strided_load %arg6[%c3_194, %c0_195] {strides = array<i32: 2, 1>} : memref<260x128xf32, #tpu.memory_space<vmem>>, vector<32x128xf32>
    %220 = arith.truncf %219 : vector<32x128xf32> to vector<32x128xbf16>
    %c25 = arith.constant 25 : index
    %c0_196 = arith.constant 0 : index
    %c0_197 = arith.constant 0 : index
    %221 = vector.load %arg3[%c25, %c0_196, %c0_197] : memref<38x128x128xbf16, #tpu.memory_space<vmem>>, vector<1x128x128xbf16>
    %222 = vector.shape_cast %221 : vector<1x128x128xbf16> to vector<128x128xbf16>
    %cst_198 = arith.constant dense<0.000000e+00> : vector<32x128xf32>
    %223 = tpu.matmul %220, %222, %cst_198 {dimension_numbers = #tpu.dot_dimension_numbers<[1], [0], [0], [1], [0, 0, 1, 1], [], []>} : vector<32x128xbf16>, vector<128x128xbf16>, vector<32x128xf32> -> vector<32x128xf32>
    %224 = arith.addf %218, %223 : vector<32x128xf32>
    %c4_199 = arith.constant 4 : index
    %c0_200 = arith.constant 0 : index
    %225 = tpu.strided_load %arg6[%c4_199, %c0_200] {strides = array<i32: 2, 1>} : memref<260x128xf32, #tpu.memory_space<vmem>>, vector<32x128xf32>
    %226 = arith.truncf %225 : vector<32x128xf32> to vector<32x128xbf16>
    %c26 = arith.constant 26 : index
    %c0_201 = arith.constant 0 : index
    %c0_202 = arith.constant 0 : index
    %227 = vector.load %arg3[%c26, %c0_201, %c0_202] : memref<38x128x128xbf16, #tpu.memory_space<vmem>>, vector<1x128x128xbf16>
    %228 = vector.shape_cast %227 : vector<1x128x128xbf16> to vector<128x128xbf16>
    %cst_203 = arith.constant dense<0.000000e+00> : vector<32x128xf32>
    %229 = tpu.matmul %226, %228, %cst_203 {dimension_numbers = #tpu.dot_dimension_numbers<[1], [0], [0], [1], [0, 0, 1, 1], [], []>} : vector<32x128xbf16>, vector<128x128xbf16>, vector<32x128xf32> -> vector<32x128xf32>
    %230 = arith.addf %224, %229 : vector<32x128xf32>
    %c7_204 = arith.constant 7 : index
    %c0_205 = arith.constant 0 : index
    %231 = vector.load %arg4[%c7_204, %c0_205] : memref<11x128xf32, #tpu.memory_space<vmem>>, vector<1x128xf32>
    %232 = vector.broadcast %231 : vector<1x128xf32> to vector<32x128xf32>
    %233 = arith.addf %230, %232 : vector<32x128xf32>
    %cst_206 = arith.constant 0.000000e+00 : f32
    %234 = vector.broadcast %cst_206 : f32 to vector<1x128xf32>
    %c0_207 = arith.constant 0 : index
    %c0_208 = arith.constant 0 : index
    %235 = vector.load %arg7[%c0_207, %c0_208] : memref<260x128xf32, #tpu.memory_space<vmem>>, vector<1x128xf32>
    tpu.vector_store %arg7[%c0_207, %c0_208], %234 {strides = array<i32>} : memref<260x128xf32, #tpu.memory_space<vmem>>, vector<1x128xf32>,
    %c33 = arith.constant 33 : index
    %c0_209 = arith.constant 0 : index
    %236 = vector.load %arg7[%c33, %c0_209] : memref<260x128xf32, #tpu.memory_space<vmem>>, vector<1x128xf32>
    tpu.vector_store %arg7[%c33, %c0_209], %234 {strides = array<i32>} : memref<260x128xf32, #tpu.memory_space<vmem>>, vector<1x128xf32>,
    %c1_210 = arith.constant 1 : index
    %c0_211 = arith.constant 0 : index
    %237 = vector.load %arg7[%c1_210, %c0_211] : memref<260x128xf32, #tpu.memory_space<vmem>>, vector<32x128xf32>
    tpu.vector_store %arg7[%c1_210, %c0_211], %233 {strides = array<i32>} : memref<260x128xf32, #tpu.memory_space<vmem>>, vector<32x128xf32>,
    %c0_212 = arith.constant 0 : index
    %c0_213 = arith.constant 0 : index
    %238 = vector.load %arg7[%c0_212, %c0_213] : memref<260x128xf32, #tpu.memory_space<vmem>>, vector<32x128xf32>
    %239 = arith.truncf %238 : vector<32x128xf32> to vector<32x128xbf16>
    %c27 = arith.constant 27 : index
    %c0_214 = arith.constant 0 : index
    %c0_215 = arith.constant 0 : index
    %240 = vector.load %arg3[%c27, %c0_214, %c0_215] : memref<38x128x128xbf16, #tpu.memory_space<vmem>>, vector<1x128x128xbf16>
    %241 = vector.shape_cast %240 : vector<1x128x128xbf16> to vector<128x128xbf16>
    %cst_216 = arith.constant dense<0.000000e+00> : vector<32x128xf32>
    %242 = tpu.matmul %239, %241, %cst_216 {dimension_numbers = #tpu.dot_dimension_numbers<[1], [0], [0], [1], [0, 0, 1, 1], [], []>} : vector<32x128xbf16>, vector<128x128xbf16>, vector<32x128xf32> -> vector<32x128xf32>
    %c1_217 = arith.constant 1 : index
    %c0_218 = arith.constant 0 : index
    %243 = vector.load %arg7[%c1_217, %c0_218] : memref<260x128xf32, #tpu.memory_space<vmem>>, vector<32x128xf32>
    %244 = arith.truncf %243 : vector<32x128xf32> to vector<32x128xbf16>
    %c28 = arith.constant 28 : index
    %c0_219 = arith.constant 0 : index
    %c0_220 = arith.constant 0 : index
    %245 = vector.load %arg3[%c28, %c0_219, %c0_220] : memref<38x128x128xbf16, #tpu.memory_space<vmem>>, vector<1x128x128xbf16>
    %246 = vector.shape_cast %245 : vector<1x128x128xbf16> to vector<128x128xbf16>
    %cst_221 = arith.constant dense<0.000000e+00> : vector<32x128xf32>
    %247 = tpu.matmul %244, %246, %cst_221 {dimension_numbers = #tpu.dot_dimension_numbers<[1], [0], [0], [1], [0, 0, 1, 1], [], []>} : vector<32x128xbf16>, vector<128x128xbf16>, vector<32x128xf32> -> vector<32x128xf32>
    %248 = arith.addf %242, %247 : vector<32x128xf32>
    %c2_222 = arith.constant 2 : index
    %c0_223 = arith.constant 0 : index
    %249 = vector.load %arg7[%c2_222, %c0_223] : memref<260x128xf32, #tpu.memory_space<vmem>>, vector<32x128xf32>
    %250 = arith.truncf %249 : vector<32x128xf32> to vector<32x128xbf16>
    %c29 = arith.constant 29 : index
    %c0_224 = arith.constant 0 : index
    %c0_225 = arith.constant 0 : index
    %251 = vector.load %arg3[%c29, %c0_224, %c0_225] : memref<38x128x128xbf16, #tpu.memory_space<vmem>>, vector<1x128x128xbf16>
    %252 = vector.shape_cast %251 : vector<1x128x128xbf16> to vector<128x128xbf16>
    %cst_226 = arith.constant dense<0.000000e+00> : vector<32x128xf32>
    %253 = tpu.matmul %250, %252, %cst_226 {dimension_numbers = #tpu.dot_dimension_numbers<[1], [0], [0], [1], [0, 0, 1, 1], [], []>} : vector<32x128xbf16>, vector<128x128xbf16>, vector<32x128xf32> -> vector<32x128xf32>
    %254 = arith.addf %248, %253 : vector<32x128xf32>
    %c8_227 = arith.constant 8 : index
    %c0_228 = arith.constant 0 : index
    %255 = vector.load %arg4[%c8_227, %c0_228] : memref<11x128xf32, #tpu.memory_space<vmem>>, vector<1x128xf32>
    %256 = vector.broadcast %255 : vector<1x128xf32> to vector<32x128xf32>
    %257 = arith.addf %254, %256 : vector<32x128xf32>
    %cst_229 = arith.constant 0.000000e+00 : f32
    %258 = vector.broadcast %cst_229 : f32 to vector<2x128xf32>
    %c0_230 = arith.constant 0 : index
    %c0_231 = arith.constant 0 : index
    %259 = vector.load %arg6[%c0_230, %c0_231] : memref<260x128xf32, #tpu.memory_space<vmem>>, vector<2x128xf32>
    tpu.vector_store %arg6[%c0_230, %c0_231], %258 {strides = array<i32>} : memref<260x128xf32, #tpu.memory_space<vmem>>, vector<2x128xf32>,
    %c34 = arith.constant 34 : index
    %c0_232 = arith.constant 0 : index
    %260 = vector.load %arg6[%c34, %c0_232] : memref<260x128xf32, #tpu.memory_space<vmem>>, vector<2x128xf32>
    tpu.vector_store %arg6[%c34, %c0_232], %258 {strides = array<i32>} : memref<260x128xf32, #tpu.memory_space<vmem>>, vector<2x128xf32>,
    %c2_233 = arith.constant 2 : index
    %c0_234 = arith.constant 0 : index
    %261 = vector.load %arg6[%c2_233, %c0_234] : memref<260x128xf32, #tpu.memory_space<vmem>>, vector<32x128xf32>
    tpu.vector_store %arg6[%c2_233, %c0_234], %257 {strides = array<i32>} : memref<260x128xf32, #tpu.memory_space<vmem>>, vector<32x128xf32>,
    %c0_235 = arith.constant 0 : index
    %c0_236 = arith.constant 0 : index
    %262 = tpu.strided_load %arg6[%c0_235, %c0_236] {strides = array<i32: 2, 1>} : memref<260x128xf32, #tpu.memory_space<vmem>>, vector<16x128xf32>
    %263 = arith.truncf %262 : vector<16x128xf32> to vector<16x128xbf16>
    %c30 = arith.constant 30 : index
    %c0_237 = arith.constant 0 : index
    %c0_238 = arith.constant 0 : index
    %264 = vector.load %arg3[%c30, %c0_237, %c0_238] : memref<38x128x128xbf16, #tpu.memory_space<vmem>>, vector<1x128x128xbf16>
    %265 = vector.shape_cast %264 : vector<1x128x128xbf16> to vector<128x128xbf16>
    %cst_239 = arith.constant dense<0.000000e+00> : vector<16x128xf32>
    %266 = tpu.matmul %263, %265, %cst_239 {dimension_numbers = #tpu.dot_dimension_numbers<[1], [0], [0], [1], [0, 0, 1, 1], [], []>} : vector<16x128xbf16>, vector<128x128xbf16>, vector<16x128xf32> -> vector<16x128xf32>
    %c1_240 = arith.constant 1 : index
    %c0_241 = arith.constant 0 : index
    %267 = tpu.strided_load %arg6[%c1_240, %c0_241] {strides = array<i32: 2, 1>} : memref<260x128xf32, #tpu.memory_space<vmem>>, vector<16x128xf32>
    %268 = arith.truncf %267 : vector<16x128xf32> to vector<16x128xbf16>
    %c31 = arith.constant 31 : index
    %c0_242 = arith.constant 0 : index
    %c0_243 = arith.constant 0 : index
    %269 = vector.load %arg3[%c31, %c0_242, %c0_243] : memref<38x128x128xbf16, #tpu.memory_space<vmem>>, vector<1x128x128xbf16>
    %270 = vector.shape_cast %269 : vector<1x128x128xbf16> to vector<128x128xbf16>
    %cst_244 = arith.constant dense<0.000000e+00> : vector<16x128xf32>
    %271 = tpu.matmul %268, %270, %cst_244 {dimension_numbers = #tpu.dot_dimension_numbers<[1], [0], [0], [1], [0, 0, 1, 1], [], []>} : vector<16x128xbf16>, vector<128x128xbf16>, vector<16x128xf32> -> vector<16x128xf32>
    %272 = arith.addf %266, %271 : vector<16x128xf32>
    %c2_245 = arith.constant 2 : index
    %c0_246 = arith.constant 0 : index
    %273 = tpu.strided_load %arg6[%c2_245, %c0_246] {strides = array<i32: 2, 1>} : memref<260x128xf32, #tpu.memory_space<vmem>>, vector<16x128xf32>
    %274 = arith.truncf %273 : vector<16x128xf32> to vector<16x128xbf16>
    %c32 = arith.constant 32 : index
    %c0_247 = arith.constant 0 : index
    %c0_248 = arith.constant 0 : index
    %275 = vector.load %arg3[%c32, %c0_247, %c0_248] : memref<38x128x128xbf16, #tpu.memory_space<vmem>>, vector<1x128x128xbf16>
    %276 = vector.shape_cast %275 : vector<1x128x128xbf16> to vector<128x128xbf16>
    %cst_249 = arith.constant dense<0.000000e+00> : vector<16x128xf32>
    %277 = tpu.matmul %274, %276, %cst_249 {dimension_numbers = #tpu.dot_dimension_numbers<[1], [0], [0], [1], [0, 0, 1, 1], [], []>} : vector<16x128xbf16>, vector<128x128xbf16>, vector<16x128xf32> -> vector<16x128xf32>
    %278 = arith.addf %272, %277 : vector<16x128xf32>
    %c3_250 = arith.constant 3 : index
    %c0_251 = arith.constant 0 : index
    %279 = tpu.strided_load %arg6[%c3_250, %c0_251] {strides = array<i32: 2, 1>} : memref<260x128xf32, #tpu.memory_space<vmem>>, vector<16x128xf32>
    %280 = arith.truncf %279 : vector<16x128xf32> to vector<16x128xbf16>
    %c33_252 = arith.constant 33 : index
    %c0_253 = arith.constant 0 : index
    %c0_254 = arith.constant 0 : index
    %281 = vector.load %arg3[%c33_252, %c0_253, %c0_254] : memref<38x128x128xbf16, #tpu.memory_space<vmem>>, vector<1x128x128xbf16>
    %282 = vector.shape_cast %281 : vector<1x128x128xbf16> to vector<128x128xbf16>
    %cst_255 = arith.constant dense<0.000000e+00> : vector<16x128xf32>
    %283 = tpu.matmul %280, %282, %cst_255 {dimension_numbers = #tpu.dot_dimension_numbers<[1], [0], [0], [1], [0, 0, 1, 1], [], []>} : vector<16x128xbf16>, vector<128x128xbf16>, vector<16x128xf32> -> vector<16x128xf32>
    %284 = arith.addf %278, %283 : vector<16x128xf32>
    %c4_256 = arith.constant 4 : index
    %c0_257 = arith.constant 0 : index
    %285 = tpu.strided_load %arg6[%c4_256, %c0_257] {strides = array<i32: 2, 1>} : memref<260x128xf32, #tpu.memory_space<vmem>>, vector<16x128xf32>
    %286 = arith.truncf %285 : vector<16x128xf32> to vector<16x128xbf16>
    %c34_258 = arith.constant 34 : index
    %c0_259 = arith.constant 0 : index
    %c0_260 = arith.constant 0 : index
    %287 = vector.load %arg3[%c34_258, %c0_259, %c0_260] : memref<38x128x128xbf16, #tpu.memory_space<vmem>>, vector<1x128x128xbf16>
    %288 = vector.shape_cast %287 : vector<1x128x128xbf16> to vector<128x128xbf16>
    %cst_261 = arith.constant dense<0.000000e+00> : vector<16x128xf32>
    %289 = tpu.matmul %286, %288, %cst_261 {dimension_numbers = #tpu.dot_dimension_numbers<[1], [0], [0], [1], [0, 0, 1, 1], [], []>} : vector<16x128xbf16>, vector<128x128xbf16>, vector<16x128xf32> -> vector<16x128xf32>
    %290 = arith.addf %284, %289 : vector<16x128xf32>
    %c9_262 = arith.constant 9 : index
    %c0_263 = arith.constant 0 : index
    %291 = vector.load %arg4[%c9_262, %c0_263] : memref<11x128xf32, #tpu.memory_space<vmem>>, vector<1x128xf32>
    %292 = vector.broadcast %291 : vector<1x128xf32> to vector<16x128xf32>
    %293 = arith.addf %290, %292 : vector<16x128xf32>
    %cst_264 = arith.constant 0.000000e+00 : f32
    %294 = vector.broadcast %cst_264 : f32 to vector<1x128xf32>
    %c0_265 = arith.constant 0 : index
    %c0_266 = arith.constant 0 : index
    %295 = vector.load %arg7[%c0_265, %c0_266] : memref<260x128xf32, #tpu.memory_space<vmem>>, vector<1x128xf32>
    tpu.vector_store %arg7[%c0_265, %c0_266], %294 {strides = array<i32>} : memref<260x128xf32, #tpu.memory_space<vmem>>, vector<1x128xf32>,
    %c17_267 = arith.constant 17 : index
    %c0_268 = arith.constant 0 : index
    %296 = vector.load %arg7[%c17_267, %c0_268] : memref<260x128xf32, #tpu.memory_space<vmem>>, vector<1x128xf32>
    tpu.vector_store %arg7[%c17_267, %c0_268], %294 {strides = array<i32>} : memref<260x128xf32, #tpu.memory_space<vmem>>, vector<1x128xf32>,
    %c1_269 = arith.constant 1 : index
    %c0_270 = arith.constant 0 : index
    %297 = vector.load %arg7[%c1_269, %c0_270] : memref<260x128xf32, #tpu.memory_space<vmem>>, vector<16x128xf32>
    tpu.vector_store %arg7[%c1_269, %c0_270], %293 {strides = array<i32>} : memref<260x128xf32, #tpu.memory_space<vmem>>, vector<16x128xf32>,
    %c0_271 = arith.constant 0 : index
    %c0_272 = arith.constant 0 : index
    %298 = vector.load %arg7[%c0_271, %c0_272] : memref<260x128xf32, #tpu.memory_space<vmem>>, vector<16x128xf32>
    %299 = arith.truncf %298 : vector<16x128xf32> to vector<16x128xbf16>
    %c35 = arith.constant 35 : index
    %c0_273 = arith.constant 0 : index
    %c0_274 = arith.constant 0 : index
    %300 = vector.load %arg3[%c35, %c0_273, %c0_274] : memref<38x128x128xbf16, #tpu.memory_space<vmem>>, vector<1x128x128xbf16>
    %301 = vector.shape_cast %300 : vector<1x128x128xbf16> to vector<128x128xbf16>
    %cst_275 = arith.constant dense<0.000000e+00> : vector<16x128xf32>
    %302 = tpu.matmul %299, %301, %cst_275 {dimension_numbers = #tpu.dot_dimension_numbers<[1], [0], [0], [1], [0, 0, 1, 1], [], []>} : vector<16x128xbf16>, vector<128x128xbf16>, vector<16x128xf32> -> vector<16x128xf32>
    %c1_276 = arith.constant 1 : index
    %c0_277 = arith.constant 0 : index
    %303 = vector.load %arg7[%c1_276, %c0_277] : memref<260x128xf32, #tpu.memory_space<vmem>>, vector<16x128xf32>
    %304 = arith.truncf %303 : vector<16x128xf32> to vector<16x128xbf16>
    %c36 = arith.constant 36 : index
    %c0_278 = arith.constant 0 : index
    %c0_279 = arith.constant 0 : index
    %305 = vector.load %arg3[%c36, %c0_278, %c0_279] : memref<38x128x128xbf16, #tpu.memory_space<vmem>>, vector<1x128x128xbf16>
    %306 = vector.shape_cast %305 : vector<1x128x128xbf16> to vector<128x128xbf16>
    %cst_280 = arith.constant dense<0.000000e+00> : vector<16x128xf32>
    %307 = tpu.matmul %304, %306, %cst_280 {dimension_numbers = #tpu.dot_dimension_numbers<[1], [0], [0], [1], [0, 0, 1, 1], [], []>} : vector<16x128xbf16>, vector<128x128xbf16>, vector<16x128xf32> -> vector<16x128xf32>
    %308 = arith.addf %302, %307 : vector<16x128xf32>
    %c2_281 = arith.constant 2 : index
    %c0_282 = arith.constant 0 : index
    %309 = vector.load %arg7[%c2_281, %c0_282] : memref<260x128xf32, #tpu.memory_space<vmem>>, vector<16x128xf32>
    %310 = arith.truncf %309 : vector<16x128xf32> to vector<16x128xbf16>
    %c37 = arith.constant 37 : index
    %c0_283 = arith.constant 0 : index
    %c0_284 = arith.constant 0 : index
    %311 = vector.load %arg3[%c37, %c0_283, %c0_284] : memref<38x128x128xbf16, #tpu.memory_space<vmem>>, vector<1x128x128xbf16>
    %312 = vector.shape_cast %311 : vector<1x128x128xbf16> to vector<128x128xbf16>
    %cst_285 = arith.constant dense<0.000000e+00> : vector<16x128xf32>
    %313 = tpu.matmul %310, %312, %cst_285 {dimension_numbers = #tpu.dot_dimension_numbers<[1], [0], [0], [1], [0, 0, 1, 1], [], []>} : vector<16x128xbf16>, vector<128x128xbf16>, vector<16x128xf32> -> vector<16x128xf32>
    %314 = arith.addf %308, %313 : vector<16x128xf32>
    %c10_286 = arith.constant 10 : index
    %c0_287 = arith.constant 0 : index
    %315 = vector.load %arg4[%c10_286, %c0_287] : memref<11x128xf32, #tpu.memory_space<vmem>>, vector<1x128xf32>
    %316 = vector.broadcast %315 : vector<1x128xf32> to vector<16x128xf32>
    %317 = arith.addf %314, %316 : vector<16x128xf32>
    %c0_288 = arith.constant 0 : index
    %c0_289 = arith.constant 0 : index
    %c0_290 = arith.constant 0 : index
    %318 = vector.load %arg5[%c0_288, %c0_289, %c0_290] : memref<1x16x128xf32, #tpu.memory_space<vmem>>, vector<1x16x128xf32>
    %319 = vector.shape_cast %318 : vector<1x16x128xf32> to vector<16x128xf32>
    %320 = vector.shape_cast %317 : vector<16x128xf32> to vector<1x16x128xf32>
    tpu.vector_store %arg5[%c0_288, %c0_289, %c0_290], %320 {strides = array<i32>} : memref<1x16x128xf32, #tpu.memory_space<vmem>>, vector<1x16x128xf32>,
    return
  }
  func.func @transform_0(%arg0: i32) -> (i32, i32, i32) {
    %c0_i32 = arith.constant 0 : i32
    %c0_i32_0 = arith.constant 0 : i32
    %c0_i32_1 = arith.constant 0 : i32
    return %arg0, %c0_i32, %c0_i32_0 : i32, i32, i32
  }
  func.func @transform_1(%arg0: i32) -> (i32, i32) {
    %c0_i32 = arith.constant 0 : i32
    %c0_i32_0 = arith.constant 0 : i32
    %c0_i32_1 = arith.constant 0 : i32
    return %c0_i32, %c0_i32_0 : i32, i32
  }
  func.func @transform_2(%arg0: i32) -> (i32, i32, i32) {
    %c0_i32 = arith.constant 0 : i32
    %c0_i32_0 = arith.constant 0 : i32
    %c0_i32_1 = arith.constant 0 : i32
    %c0_i32_2 = arith.constant 0 : i32
    return %c0_i32, %c0_i32_0, %c0_i32_1 : i32, i32, i32
  }
  func.func @transform_3(%arg0: i32) -> (i32, i32) {
    %c0_i32 = arith.constant 0 : i32
    %c0_i32_0 = arith.constant 0 : i32
    %c0_i32_1 = arith.constant 0 : i32
    return %c0_i32, %c0_i32_0 : i32, i32
  }
  func.func @transform_4(%arg0: i32) -> (i32, i32, i32) {
    %c0_i32 = arith.constant 0 : i32
    %c0_i32_0 = arith.constant 0 : i32
    %c0_i32_1 = arith.constant 0 : i32
    return %arg0, %c0_i32, %c0_i32_0 : i32, i32, i32
  }
}

</mosaic_0001>

<bundles_post_ra>
// kernel: feature_extractor_forward.1
= control target key start
LH: loop header
LB: loop body
LE: loop exit
PB: predicated region body
PF: predicated region fallthrough
CT: control target
= control target key end

     0   :  { %9 = vsyncpa [#allocation5], 0  ;;  %s11359_s0 = inlined_call_operand.vmem [shape: f32[2,256,4], index: 0, kind: input, shape index: {}]   ;;  %s11360_s1 = inlined_call_operand.hbm [shape: bf16[4,128], index: 1, kind: input, shape index: {}]   ;;  %s11361_s2 = inlined_call_operand.hbm [shape: bf16[38,128,128], index: 2, kind: input, shape index: {}]   ;;  %s11362_s3 = inlined_call_operand.hbm [shape: f32[11,128], index: 3, kind: input, shape index: {}]   ;;  %s11363_s4 = inlined_call_operand.hbm [shape: f32[2,16,128], index: 4, kind: output, shape index: {}]  }
   0x1   :  { %10 = vsyncpa [#allocation8], 0 }
   0x2   :  { %11 = vsyncpa [#allocation6], 0 }
   0x3   :  { %13 = vsyncpa [#allocation6 + $0x1], 0  ;;  %s10522_s15 = smov 0   ;;  %s10524_s16 = smov 0  }
   0x4   :  { %s10526_s17 = smov 0   ;;  %s10528_s18 = smov 0  }
   0x5 LB: > { %s10543_s19 = sadd.s32 4294967295, %s10482_s18   ;;  %s7628_s20 = sadd.s32 4294967294, %s10482_s18   ;;  %s10482_s18 = sphi %s10528_s18, %s11406_s18   ;;  %s10478_s17 = sphi %s10526_s17, %s11405_s17   ;;  %s10474_s16 = sphi %s10524_s16, %s11404_s16   ;;  %s10470_s15 = sphi %s10522_s15, %s11403_s15  }
   0x6   : > { %s10547_s21 = sadd.s32 1, %s10482_s18   ;;  %s115_s22 = sadd.s32 1, %s10478_s17 }
   0x7   : > { %s112_s23 = ssub.s32 %s10482_s18, %s10547_s21  ;;  %p125_p0 = scmp.ne.s32.totalorder %s10478_s17, %s10474_s16 }
   0x8   : > { %p113_p1 = scmp.eq.s32.totalorder %s112_s23, 0  ;;  %p126_p2 = scmp.eq.s32.totalorder %s10543_s19, 1 }
   0x9   : > { %p131_p3 = scmp.ne.s32.totalorder %s10474_s16, %s10470_s15  ;;  %p132_p4 = scmp.eq.s32.totalorder %s7628_s20, 1 }
   0xa   : > { %s10558_s24 = scalar_select %p113_p1, %s10478_s17, %s115_s22  }
   0xb   : > { %p10560_p5 = por %p126_p2, %p125_p0  ;;  %p10564_p6 = por %p132_p4, %p131_p3 }
   0xc   : > { %p7629_p7 = scmp.ge.s32.totalorder %s10482_s18, 1  ;;  %p139_p8 = scmp.lt.s32.totalorder %s10482_s18, 3 }
   0xd   : > { %s11367_s25 = scalar_select %p10560_p5, 1, 0 }
   0xe   : > { %s11368_s26 = scalar_select %p10564_p6, 1, 0 }
   0xf   : > { %p11364_p9 = scmp.eq.s32.totalorder %s10543_s19, 0  ;;  %p10571_p10 = pnand %p7629_p7, %p139_p8 }
  0x10   : > { %s10484_s28 = smov [#allocation7]   ;;  %s10485_s5 = smov [#allocation4]  }
  0x11   : > { %s11369_s27 = scalar_select %p10571_p10, 1, 0 }
  0x12   : > { %s162_s29 = sshll.u32 %s10484_s28, 4  ;;  %p9923_p11 = pneg %p10571_p10  ;;  %s10577_s29 = int_to_ptr.vmem [resolvable:$true] %s162_s29 }
  0x13   : > { %s152_s6 = sshll.u32 %s10485_s5, 4  ;;  %s10486_s7 = smov [#allocation9]   ;;  %s10585_s6 = int_to_ptr.vmem [resolvable:$true] %s152_s6 }
  0x14   : > { %p10581_p12 = pnand %p11364_p9, %p9923_p11  ;;  %s10587_s8 = sshll.u32 %s10486_s7, 4  ;;  %s176_s8 = int_to_ptr.vmem [resolvable:$true] %s10587_s8 }
  0x15   : > { %s10328_s11 = scalar_lea.hbm %s11361_s2, 38912 }
  0x16   : > { %p10329_p13 = scmp.ne.s32.totalorder %s11361_s2, %s10328_s11  ;;  %p10597_p0 = pneg %p10581_p12 }
  0x17   : > { %p10335_p3 = scmp.lt.u32.totalorder %s10328_s11, %s11361_s2 }
  0x18   : > { %p10331_p1 = pnand %p10597_p0, %p10329_p13 }
  0x1a   : > { %p10332_p2 = pneg %p10331_p1 }
  0x1c   : > { %p10337_p4 = pnand %p10335_p3, %p10332_p2 }
  0x1e   : > { %10340 = shalt.err (!%p10337_p4)
}
  0x1f   : > { %s10341_s23 = scalar_lea.vmem %s10577_s29, 38912  ;;  %p10349_p9 = scmp.lt.s32.totalorder %s10577_s29, %s10577_s29 }
  0x20   : > { %p10342_p7 = scmp.ne.s32.totalorder %s10577_s29, %s10341_s23  ;;  %p10350_p6 = scmp.lt.s32.totalorder %s10341_s23, %s10341_s23 }
  0x22   : > { %p10344_p8 = pnand %p10342_p7, %p10597_p0  ;;  %p10351_p13 = por %p10350_p6, %p10349_p9 }
  0x24   : > { %p10345_p11 = pneg %p10344_p8 }
  0x26   : > { %p10352_p1 = pnand %p10351_p13, %p10345_p11 }
  0x28   : > { %10355 = shalt.err (!%p10352_p1)
}
  0x29   : > { %s10487_s28 = smov 64   ;;  %s10488_s5 = smov 4  }
  0x2a   : > { %9929 = dma.hbm_to_vmem [thread:$0]  (!%p10581_p12), %s11361_s2, 38912, %s10577_s29, [#allocation8], %s10487_s28, %s10487_s28, %s10488_s5  }
  0x2b   : > { %s10356_s12 = scalar_lea.hbm %s11360_s1, 32 }
  0x2c   : > { %p10357_p6 = scmp.ne.s32.totalorder %s11360_s1, %s10356_s12  ;;  %p10363_p3 = scmp.lt.u32.totalorder %s10356_s12, %s11360_s1 }
  0x2e   : > { %p10359_p9 = pnand %p10357_p6, %p10597_p0 }
  0x30   : > { %p10360_p2 = pneg %p10359_p9 }
  0x32   : > { %p10365_p4 = pnand %p10363_p3, %p10360_p2 }
  0x34   : > { %10368 = shalt.err (!%p10365_p4)
}
  0x35   : > { %s10369_s29 = scalar_lea.vmem %s10585_s6, 32  ;;  %p10377_p13 = scmp.lt.s32.totalorder %s10585_s6, %s10585_s6 }
  0x36   : > { %p10370_p7 = scmp.ne.s32.totalorder %s10585_s6, %s10369_s29  ;;  %p10378_p1 = scmp.lt.s32.totalorder %s10369_s29, %s10369_s29 }
  0x38   : > { %p10372_p8 = pnand %p10370_p7, %p10597_p0  ;;  %p10379_p6 = por %p10378_p1, %p10377_p13 }
  0x3a   : > { %p10373_p11 = pneg %p10372_p8 }
  0x3c   : > { %p10380_p9 = pnand %p10379_p6, %p10373_p11 }
  0x3e   : > { %10383 = shalt.err (!%p10380_p9)
}
  0x3f   : > { %9926 = dma.hbm_to_vmem [thread:$0]  (!%p10581_p12), %s11360_s1, 32, %s10585_s6, [#allocation5]  }
  0x40   : > { %s10384_s10 = scalar_lea.hbm %s11362_s3, 256 }
  0x41   : > { %p10385_p2 = scmp.ne.s32.totalorder %s11362_s3, %s10384_s10  ;;  %p10391_p7 = scmp.lt.u32.totalorder %s10384_s10, %s11362_s3 }
  0x43   : > { %p10387_p3 = pnand %p10385_p2, %p10597_p0 }
  0x45   : > { %p10388_p4 = pneg %p10387_p3 }
  0x47   : > { %p10393_p8 = pnand %p10391_p7, %p10388_p4 }
  0x49   : > { %10396 = shalt.err (!%p10393_p8)
}
  0x4a   : > { %s10397_s22 = scalar_lea.vmem %s176_s8, 256  ;;  %p10405_p6 = scmp.lt.s32.totalorder %s176_s8, %s176_s8 }
  0x4b   : > { %p10398_p11 = scmp.ne.s32.totalorder %s176_s8, %s10397_s22  ;;  %p10406_p9 = scmp.lt.s32.totalorder %s10397_s22, %s10397_s22 }
  0x4d   : > { %p10400_p13 = pnand %p10398_p11, %p10597_p0  ;;  %p10407_p5 = por %p10406_p9, %p10405_p6 }
  0x4f   : > { %p10401_p1 = pneg %p10400_p13 }
  0x51   : > { %p10408_p10 = pnand %p10407_p5, %p10401_p1 }
  0x53   : > { %10411 = shalt.err (!%p10408_p10)
}
  0x54   : > { %s10489_s6 = smov 128   ;;  %s10490_s23 = smov 8  }
  0x55   : > { %9932 = dma.hbm_to_vmem [thread:$0]  (!%p10581_p12), %s11362_s3, 256, %s176_s8, [#allocation8], %s10489_s6, %s10489_s6, %s10490_s23  }
  0x56   : > { %p11372_p2 = scmp.ne.s32.totalorder %s11369_s27, 0 }
  0x58   : > { %199 = sbr.rel (%p11372_p2) target bundleno = 3923 (0xf53), region = 36 }
  0x5f   : > { %p11373_p3 = scmp.eq.s32.totalorder %s10543_s19, 0 }
  0x61   : > { %10457 = dma.done.wait (%p11373_p3), [#allocation5], 32   ;;  %p11374_p0 = pmov %p11373_p3 }
  0x63   : > { %10459 = vsyncadd (%p11374_p0), [#allocation5], 4294967264  ;;  %p11375_p5 = pmov %p11374_p0 }
  0x64   : > { %p11376_p10 = pmov %p11374_p0 }
  0x65   : > { %10461 = dma.done.wait (%p11375_p5), [#allocation8], 39168  }
  0x66   : > { %10463 = vsyncadd (%p11376_p10), [#allocation8], 4294928128  ;;  %p233_p4 = scmp.lt.s32.totalorder %s10543_s19, 1  ;;  %vm271_vm0 = vcmask 31744   ;;  %vm604_vm1 = vcmask 1041408   ;;  %s10491_s20 = smov 0.0  }
  0x67   : > { %vm10493_vm4 = vmmov 0   ;;  %s230_s29 = sand.u32 1, %s10474_s16   ;;  %s7978_s14 = sshll.u32 %s10543_s19, 8 }
  0x68   : > { %s234_s30 = scalar_select %p233_p4, %s10543_s19, 1 }
  0x69   : > { %s7638_s28 = sshll.u32 %s230_s29, 4  ;;  %p11401_p7 = scmp.ne.s32.totalorder %s11367_s25, 0 }
  0x6a   : > { %s7977_s8 = sshll.u32 %s234_s30, 8  ;;  %s232_s30 = scalar_lea.vmem [#allocation10], %s7638_s28 }
  0x6b   : > { %s10675_s5 = scalar_lea.vmem %s11359_s0, %s7977_s8  ;;  %s7535_s8 = sshll.u32 %s232_s30, 4  ;;  %s11311_s8 = int_to_ptr.vmem [resolvable:$true] %s7535_s8 }
  0x6c   : > { %v239_v0 = vld [vmem:[%s10675_s5] sm:$0xff]  ;;  %v240_v1 = vld [vmem:[%s10675_s5 + $0x8] sm:$0xff]  ;;  %v241_v2 = vld [vmem:[%s10675_s5 + $0x10] sm:$0xff]  ;;  %s10494_s19 = smov [#allocation10]  }
  0x6d   : > { %v242_v3 = vld [vmem:[%s10675_s5 + $0x18] sm:$0xff]  ;;  %v10682_v4 = vld [vmem:[%s10675_s5 + $0x20] sm:$0xff]  ;;  %v10685_v5 = vld [vmem:[%s10675_s5 + $0x28] sm:$0xff]  ;;  %v272_v6 = vsel %vm271_vm0, %v239_v0, 0.0  ;;  %v273_v7 = vsel %vm271_vm0, %v240_v1, 0.0  ;;  %v275_v8 = vsel %vm271_vm0, %v241_v2, 0.0  ;;  %v10723_v22 = vmul.f32 %v239_v0, %v239_v0 }
  0x6e   : > { %v10691_v9 = vld [vmem:[%s10675_s5 + $0x30] sm:$0xff]  ;;  %v10694_v10 = vld [vmem:[%s10675_s5 + $0x38] sm:$0xff]  ;;  %v10697_v11 = vld [vmem:[%s10675_s5 + $0x40] sm:$0xff]  ;;  %v274_v12 = vadd.f32 %v273_v7, %v272_v6  ;;  %v277_v13 = vsel %vm271_vm0, %v242_v3, 0.0  ;;  %v279_v14 = vsel %vm271_vm0, %v10682_v4, 0.0  ;;  %v281_v15 = vsel %vm271_vm0, %v10685_v5, 0.0 }
  0x6f   : > { %v10705_v16 = vld [vmem:[%s10675_s5 + $0x48] sm:$0xff]  ;;  %v10708_v17 = vld [vmem:[%s10675_s5 + $0x50] sm:$0xff]  ;;  %v10711_v18 = vld [vmem:[%s10675_s5 + $0x58] sm:$0xff]  ;;  %v283_v19 = vsel %vm271_vm0, %v10691_v9, 0.0  ;;  %v10717_v20 = vsel %vm271_vm0, %v10694_v10, 0.0  ;;  %v10721_v21 = vsel %vm271_vm0, %v10697_v11, 0.0  ;;  %v10752_v36 = vmul.f32 %v240_v1, %v240_v1 }
  0x70   : > { %v251_v23 = vld [vmem:[%s10675_s5 + $0x60] sm:$0xff]  ;;  %v252_v24 = vld [vmem:[%s10675_s5 + $0x68] sm:$0xff]  ;;  %v253_v25 = vld [vmem:[%s10675_s5 + $0x70] sm:$0xff]  ;;  %v276_v26 = vadd.f32 %v275_v8, %v274_v12  ;;  %v10730_v27 = vsel %vm271_vm0, %v10705_v16, 0.0  ;;  %v10734_v28 = vsel %vm271_vm0, %v10708_v17, 0.0  ;;  %v10738_v29 = vsel %vm271_vm0, %v10711_v18, 0.0 }
  0x71   : > { %v254_v30 = vld [vmem:[%s10675_s5 + $0x78] sm:$0xff]  ;;  %v255_v31 = vld [vmem:[%s10675_s5 + $0x80] sm:$0xff]  ;;  %v256_v32 = vld [vmem:[%s10675_s5 + $0x88] sm:$0xff]  ;;  %v10744_v33 = vsel %vm271_vm0, %v251_v23, 0.0  ;;  %v10747_v34 = vsel %vm271_vm0, %v252_v24, 0.0  ;;  %v10750_v35 = vsel %vm271_vm0, %v253_v25, 0.0  ;;  %v346_v50 = vmul.f32 %v241_v2, %v241_v2 }
  0x72   : > { %v257_v37 = vld [vmem:[%s10675_s5 + $0x90] sm:$0xff]  ;;  %v258_v38 = vld [vmem:[%s10675_s5 + $0x98] sm:$0xff]  ;;  %v259_v39 = vld [vmem:[%s10675_s5 + $0xa0] sm:$0xff]  ;;  %v278_v40 = vadd.f32 %v277_v13, %v276_v26  ;;  %v10758_v41 = vsel %vm271_vm0, %v254_v30, 0.0  ;;  %v10761_v42 = vsel %vm271_vm0, %v255_v31, 0.0  ;;  %v10764_v43 = vsel %vm271_vm0, %v256_v32, 0.0 }
  0x73   : > { %v260_v44 = vld [vmem:[%s10675_s5 + $0xa8] sm:$0xff]  ;;  %v261_v45 = vld [vmem:[%s10675_s5 + $0xb0] sm:$0xff]  ;;  %v262_v46 = vld [vmem:[%s10675_s5 + $0xb8] sm:$0xff]  ;;  %v10770_v47 = vsel %vm271_vm0, %v257_v37, 0.0  ;;  %v10773_v48 = vsel %vm271_vm0, %v258_v38, 0.0  ;;  %v10776_v49 = vsel %vm271_vm0, %v259_v39, 0.0  ;;  %v347_v0 = vmul.f32 %v242_v3, %v242_v3 }
  0x74   : > { %11377 = vst [vmem:[#allocation14_spill] sm:$0xff] %v10776_v49  ;;  %v263_v51 = vld [vmem:[%s10675_s5 + $0xc0] sm:$0xff]  ;;  %v264_v52 = vld [vmem:[%s10675_s5 + $0xc8] sm:$0xff]  ;;  %v265_v53 = vld [vmem:[%s10675_s5 + $0xd0] sm:$0xff]  ;;  %v280_v54 = vadd.f32 %v279_v14, %v278_v40  ;;  %v10782_v55 = vsel %vm271_vm0, %v260_v44, 0.0  ;;  %v10785_v56 = vsel %vm271_vm0, %v261_v45, 0.0  ;;  %v348_v3 = vmul.f32 %v10682_v4, %v10682_v4 }
  0x75   : > { %11378 = vst [vmem:[#allocation15_spill] sm:$0xff] %v10782_v55  ;;  %11379 = vst [vmem:[#allocation16_spill] sm:$0xff] %v10785_v56  ;;  %v10788_v57 = vsel %vm271_vm0, %v262_v46, 0.0  ;;  %v266_v58 = vld [vmem:[%s10675_s5 + $0xd8] sm:$0xff]  ;;  %v267_v59 = vld [vmem:[%s10675_s5 + $0xe0] sm:$0xff]  ;;  %v10794_v61 = vsel %vm271_vm0, %v263_v51, 0.0  ;;  %v350_v40 = vmul.f32 %v10691_v9, %v10691_v9  ;;  %v355_v4 = vmul.f32 %v10711_v18, %v10711_v18 }
  0x76   : > { %11380 = vst [vmem:[#allocation17_spill] sm:$0xff] %v10788_v57  ;;  %v268_v60 = vld [vmem:[%s10675_s5 + $0xe8] sm:$0xff]  ;;  %11381 = vst [vmem:[#allocation18_spill] sm:$0xff] %v10794_v61  ;;  %v10797_v62 = vsel %vm271_vm0, %v264_v52, 0.0  ;;  %v10800_v63 = vsel %vm271_vm0, %v265_v53, 0.0  ;;  %v269_v1 = vld [vmem:[%s10675_s5 + $0xf0] sm:$0xff]  ;;  %v282_v6 = vadd.f32 %v281_v15, %v280_v54  ;;  %v349_v15 = vmul.f32 %v10685_v5, %v10685_v5 }
  0x77   : > { %11382 = vst [vmem:[#allocation19_spill] sm:$0xff] %v10797_v62  ;;  %11383 = vst [vmem:[#allocation20_spill] sm:$0xff] %v10800_v63  ;;  %v270_v2 = vld [vmem:[%s10675_s5 + $0xf8] sm:$0xff]  ;;  %v10805_v7 = vsel %vm271_vm0, %v266_v58, 0.0  ;;  %v10808_v8 = vsel %vm271_vm0, %v267_v59, 0.0  ;;  %v10811_v12 = vsel %vm271_vm0, %v268_v60, 0.0  ;;  %v351_v54 = vmul.f32 %v10694_v10, %v10694_v10 }
  0x78   : > { %11384 = vst [vmem:[#allocation21_spill] sm:$0xff] %v10805_v7  ;;  %11385 = vst [vmem:[#allocation22_spill] sm:$0xff] %v10808_v8  ;;  %v10814_v13 = vsel %vm271_vm0, %v269_v1, 0.0  ;;  %v10817_v14 = vsel %vm271_vm0, %v270_v2, 0.0  ;;  %v284_v26 = vadd.f32 %v283_v19, %v282_v6  ;;  %v356_v5 = vmul.f32 %v251_v23, %v251_v23 }
  0x79   : > { %11386 = vst [vmem:[#allocation23_spill] sm:$0xff] %v10811_v12  ;;  %11387 = vst [vmem:[#allocation24_spill] sm:$0xff] %v10814_v13  ;;  %v352_v12 = vmul.f32 %v10697_v11, %v10697_v11  ;;  %v353_v13 = vmul.f32 %v10705_v16, %v10705_v16  ;;  %v357_v6 = vmul.f32 %v252_v24, %v252_v24 }
  0x7a   : > { %11388 = vst [vmem:[#allocation25_spill] sm:$0xff] %v10817_v14  ;;  %v354_v14 = vmul.f32 %v10708_v17, %v10708_v17  ;;  %v286_v19 = vadd.f32 %v10717_v20, %v284_v26  ;;  %v358_v9 = vmul.f32 %v253_v25, %v253_v25  ;;  %v359_v8 = vmul.f32 %v254_v30, %v254_v30 }
  0x7b   : > { %v360_v7 = vmul.f32 %v255_v31, %v255_v31  ;;  %v361_v10 = vmul.f32 %v256_v32, %v256_v32  ;;  %v362_v63 = vmul.f32 %v257_v37, %v257_v37  ;;  %v363_v62 = vmul.f32 %v258_v38, %v258_v38 }
  0x7c   : > { %v288_v11 = vadd.f32 %v10721_v21, %v286_v19  ;;  %v364_v61 = vmul.f32 %v259_v39, %v259_v39  ;;  %v365_v16 = vmul.f32 %v260_v44, %v260_v44  ;;  %v366_v57 = vmul.f32 %v261_v45, %v261_v45 }
  0x7d   : > { %v367_v56 = vmul.f32 %v262_v46, %v262_v46  ;;  %v368_v17 = vmul.f32 %v263_v51, %v263_v51  ;;  %v369_v55 = vmul.f32 %v264_v52, %v264_v52  ;;  %v370_v49 = vmul.f32 %v265_v53, %v265_v53 }
  0x7e   : > { %v290_v18 = vadd.f32 %v10730_v27, %v288_v11  ;;  %v371_v23 = vmul.f32 %v266_v58, %v266_v58  ;;  %v372_v20 = vmul.f32 %v267_v59, %v267_v59  ;;  %v373_v24 = vmul.f32 %v268_v60, %v268_v60 }
  0x7f   : > { %v374_v25 = vmul.f32 %v269_v1, %v269_v1  ;;  %v376_v30 = vsel %vm271_vm0, %v10723_v22, 0.0  ;;  %v377_v31 = vsel %vm271_vm0, %v10752_v36, 0.0  ;;  %v379_v21 = vsel %vm271_vm0, %v346_v50, 0.0 }
  0x80   : > { %v292_v32 = vadd.f32 %v10734_v28, %v290_v18  ;;  %v375_v37 = vmul.f32 %v270_v2, %v270_v2  ;;  %v378_v38 = vadd.f32 %v377_v31, %v376_v30  ;;  %v381_v39 = vsel %vm271_vm0, %v347_v0, 0.0 }
  0x81   : > { %v383_v27 = vsel %vm271_vm0, %v348_v3, 0.0  ;;  %v385_v44 = vsel %vm271_vm0, %v349_v15, 0.0  ;;  %v387_v45 = vsel %vm271_vm0, %v350_v40, 0.0  ;;  %v389_v46 = vsel %vm271_vm0, %v351_v54, 0.0 }
  0x82   : > { %v294_v22 = vadd.f32 %v10738_v29, %v292_v32  ;;  %v380_v51 = vadd.f32 %v379_v21, %v378_v38  ;;  %v391_v36 = vsel %vm271_vm0, %v352_v12, 0.0  ;;  %v393_v50 = vsel %vm271_vm0, %v353_v13, 0.0 }
  0x83   : > { %v395_v28 = vsel %vm271_vm0, %v354_v14, 0.0  ;;  %v397_v52 = vsel %vm271_vm0, %v355_v4, 0.0  ;;  %v399_v53 = vsel %vm271_vm0, %v356_v5, 0.0  ;;  %v401_v58 = vsel %vm271_vm0, %v357_v6, 0.0 }
  0x84   : > { %v296_v59 = vadd.f32 %v10744_v33, %v294_v22  ;;  %v382_v60 = vadd.f32 %v381_v39, %v380_v51  ;;  %v403_v0 = vsel %vm271_vm0, %v358_v9, 0.0  ;;  %v405_v29 = vsel %vm271_vm0, %v359_v8, 0.0 }
  0x85   : > { %v407_v1 = vsel %vm271_vm0, %v360_v7, 0.0  ;;  %v409_v2 = vsel %vm271_vm0, %v361_v10, 0.0  ;;  %v411_v12 = vsel %vm271_vm0, %v362_v63, 0.0  ;;  %v413_v13 = vsel %vm271_vm0, %v363_v62, 0.0 }
  0x86   : > { %v298_v14 = vadd.f32 %v10747_v34, %v296_v59  ;;  %v384_v3 = vadd.f32 %v383_v27, %v382_v60  ;;  %v415_v15 = vsel %vm271_vm0, %v364_v61, 0.0  ;;  %v417_v33 = vsel %vm271_vm0, %v365_v16, 0.0  ;;  %v11399_v59 = vld [vmem:[#allocation24_spill] sm:$0xff] }
  0x87   : > { %v419_v26 = vsel %vm271_vm0, %v366_v57, 0.0  ;;  %v421_v40 = vsel %vm271_vm0, %v367_v56, 0.0  ;;  %v423_v8 = vsel %vm271_vm0, %v368_v17, 0.0  ;;  %v425_v7 = vsel %vm271_vm0, %v369_v55, 0.0  ;;  %v11389_v17 = vld [vmem:[#allocation14_spill] sm:$0xff] }
  0x88   : > { %v300_v54 = vadd.f32 %v10750_v35, %v298_v14  ;;  %v386_v63 = vadd.f32 %v385_v44, %v384_v3  ;;  %v427_v62 = vsel %vm271_vm0, %v370_v49, 0.0  ;;  %v429_v34 = vsel %vm271_vm0, %v371_v23, 0.0  ;;  %v11400_v14 = vld [vmem:[#allocation25_spill] sm:$0xff] }
  0x89   : > { %v431_v4 = vsel %vm271_vm0, %v372_v20, 0.0  ;;  %v433_v61 = vsel %vm271_vm0, %v373_v24, 0.0  ;;  %v435_v5 = vsel %vm271_vm0, %v374_v25, 0.0  ;;  %v437_v57 = vsel %vm271_vm0, %v375_v37, 0.0  ;;  %v11390_v20 = vld [vmem:[#allocation15_spill] sm:$0xff] }
  0x8a   : > { %v302_v56 = vadd.f32 %v10758_v41, %v300_v54  ;;  %v388_v19 = vadd.f32 %v387_v45, %v386_v63  ;;  %v11391_v41 = vld [vmem:[#allocation16_spill] sm:$0xff] }
  0x8c   : > { %v304_v55 = vadd.f32 %v10761_v42, %v302_v56  ;;  %v390_v6 = vadd.f32 %v389_v46, %v388_v19  ;;  %v11392_v42 = vld [vmem:[#allocation17_spill] sm:$0xff] }
  0x8d   : > { %v11396_v46 = vld [vmem:[#allocation21_spill] sm:$0xff] }
  0x8e   : > { %v306_v35 = vadd.f32 %v10764_v43, %v304_v55  ;;  %v392_v9 = vadd.f32 %v391_v36, %v390_v6  ;;  %v11393_v43 = vld [vmem:[#allocation18_spill] sm:$0xff] }
  0x8f   : > { %v11397_v36 = vld [vmem:[#allocation22_spill] sm:$0xff] }
  0x90   : > { %v308_v49 = vadd.f32 %v10770_v47, %v306_v35  ;;  %v394_v10 = vadd.f32 %v393_v50, %v392_v9  ;;  %v11394_v47 = vld [vmem:[#allocation19_spill] sm:$0xff] }
  0x92   : > { %v310_v11 = vadd.f32 %v10773_v48, %v308_v49  ;;  %v396_v16 = vadd.f32 %v395_v28, %v394_v10  ;;  %v11395_v48 = vld [vmem:[#allocation20_spill] sm:$0xff] }
  0x94   : > { %v312_v18 = vadd.f32 %v11389_v17, %v310_v11  ;;  %v398_v23 = vadd.f32 %v397_v52, %v396_v16  ;;  %v11398_v52 = vld [vmem:[#allocation23_spill] sm:$0xff] }
  0x96   : > { %v314_v24 = vadd.f32 %v11390_v20, %v312_v18  ;;  %v400_v25 = vadd.f32 %v399_v53, %v398_v23  ;;  %v9988_v18 = vld [vmem:[#allocation7 + $0x40] sm:$0xff]   ;;  %v9989_v23 = vld [vmem:[#allocation7 + $0x48] sm:$0xff]  }
  0x97   : > { %8550 = vmatprep.subr.bf16.mxu1 %v9988_v18 }
  0x98   : > { %v316_v30 = vadd.f32 %v11391_v41, %v314_v24  ;;  %v402_v31 = vadd.f32 %v401_v58, %v400_v25  ;;  %8551 = vmatpush3.bf16.msra.mxu1 %v9988_v18  ;;  %v9990_v25 = vld [vmem:[#allocation7 + $0x50] sm:$0xff]   ;;  %v9991_v41 = vld [vmem:[#allocation7 + $0x58] sm:$0xff]  }
  0x99   : > { %8552 = vmatprep.subr.bf16.mxu1 %v9989_v23 }
  0x9a   : > { %v318_v21 = vadd.f32 %v11392_v42, %v316_v30  ;;  %v404_v32 = vadd.f32 %v403_v0, %v402_v31  ;;  %v10296_v42 = vld [vmem:[%s10675_s5 + $0xf8] sm:$0xff] }
  0x9c   : > { %v320_v37 = vadd.f32 %v11393_v43, %v318_v21  ;;  %v406_v38 = vadd.f32 %v405_v29, %v404_v32  ;;  %8553 = vmatpush3.bf16.msra.mxu1 %v9989_v23  ;;  %v10297_v32 = vld [vmem:[%s10675_s5] sm:$0xff]  ;;  %v10312_v23 = vld [vmem:[%s10675_s5 + $0x70] sm:$0xff] }
  0x9d   : > { %8554 = vmatprep.subr.bf16.mxu1 %v9990_v25 }
  0x9e   : > { %v322_v39 = vadd.f32 %v11394_v47, %v320_v37  ;;  %v408_v27 = vadd.f32 %v407_v1, %v406_v38  ;;  %v10298_v37 = vld [vmem:[%s10675_s5 + $0x8] sm:$0xff]  ;;  %v10299_v47 = vld [vmem:[%s10675_s5 + $0x10] sm:$0xff] }
  0xa0   : > { %v324_v44 = vadd.f32 %v11395_v48, %v322_v39  ;;  %v410_v45 = vadd.f32 %v409_v2, %v408_v27  ;;  %8555 = vmatpush3.bf16.msra.mxu1 %v9990_v25  ;;  %v10300_v48 = vld [vmem:[%s10675_s5 + $0x18] sm:$0xff] }
  0xa1   : > { %8556 = vmatprep.subr.bf16.mxu1 %v9991_v41 }
  0xa2   : > { %v326_v22 = vadd.f32 %v11396_v46, %v324_v44  ;;  %v412_v51 = vadd.f32 %v411_v12, %v410_v45  ;;  %v10301_v45 = vld [vmem:[%s10675_s5 + $0x20] sm:$0xff] }
  0xa4   : > { %v328_v50 = vadd.f32 %v11397_v36, %v326_v22  ;;  %v414_v28 = vadd.f32 %v413_v13, %v412_v51  ;;  %8557 = vmatpush3.bf16.msra.mxu1 %v9991_v41  ;;  %v10302_v22 = vld [vmem:[%s10675_s5 + $0x28] sm:$0xff]  ;;  %v10314_v41 = vld [vmem:[%s10675_s5 + $0x80] sm:$0xff] }
  0xa6   : > { %v330_v53 = vadd.f32 %v11398_v52, %v328_v50  ;;  %v416_v58 = vadd.f32 %v415_v15, %v414_v28 }
  0xa8   : > { %v332_v60 = vadd.f32 %v11399_v59, %v330_v53  ;;  %v418_v0 = vadd.f32 %v417_v33, %v416_v58 }
  0xaa   : > { %v334_v29 = vadd.f32 %v11400_v14, %v332_v60  ;;  %v420_v3 = vadd.f32 %v419_v26, %v418_v0 }
  0xac   : > { %335 = vadd.xlane.f32.xlu0 %v334_v29  ;;  %v422_v1 = vadd.f32 %v421_v40, %v420_v3  ;;  %v10303_v29 = vld [vmem:[%s10675_s5 + $0x30] sm:$0xff] }
  0xae   : > { %v424_v54 = vadd.f32 %v423_v8, %v422_v1  ;;  %v10304_v1 = vld [vmem:[%s10675_s5 + $0x38] sm:$0xff] }
  0xb0   : > { %v426_v63 = vadd.f32 %v425_v7, %v424_v54 }
  0xb2   : > { %v428_v2 = vadd.f32 %v427_v62, %v426_v63  ;;  %v10305_v63 = vld [vmem:[%s10675_s5 + $0x40] sm:$0xff] }
  0xb4   : > { %v430_v56 = vadd.f32 %v429_v34, %v428_v2 }
  0xb6   : > { %v432_v19 = vadd.f32 %v431_v4, %v430_v56  ;;  %v550_v4 = vld [vmem:[#allocation4] sm:$0x3]  ;;  %v10306_v56 = vld [vmem:[%s10675_s5 + $0x48] sm:$0xff] }
  0xb7   : > { %9902 = vmatprep.subr.msk.bf16.mxu0 %vm604_vm1, %v550_v4 }
  0xb8   : > { %v434_v12 = vadd.f32 %v433_v61, %v432_v19  ;;  %v606_v61 = vsel %vm604_vm1, %v550_v4, 0 }
  0xb9   : > { %8517 = vmatpush3.bf16.msra.mxu0 %v606_v61 }
  0xba   : > { %v436_v55 = vadd.f32 %v435_v5, %v434_v12 }
  0xbc   : > { %v438_v6 = vadd.f32 %v437_v57, %v436_v55 }
  0xbe   : > { %439 = vadd.xlane.f32.xlu0 %v438_v6  ;;  %v10307_v6 = vld [vmem:[%s10675_s5 + $0xf0] sm:$0xff] }
 0x139   : > { %v336_v13 = vpop.xlane.xlu0 %335 }
 0x13a   : > { %v337_v35 = vrot.slane %v336_v13, 4 }
 0x13c   : > { %v338_v15 = vadd.f32 %v337_v35, %v336_v13 }
 0x13e   : > { %v339_v9 = vrot.slane %v338_v15, 2 }
 0x140   : > { %v340_v49 = vadd.f32 %v339_v9, %v338_v15 }
 0x142   : > { %v341_v33 = vrot.slane %v340_v49, 1 }
 0x144   : > { %v342_v10 = vadd.f32 %v341_v33, %v340_v49 }
 0x146   : > { %9903 = vpush %v342_v10 }
 0x14b   : > { %v440_v26 = vpop.xlane.xlu0 %439 }
 0x14c   : > { %v441_v11 = vrot.slane %v440_v26, 4 }
 0x14e   : > { %v442_v40 = vadd.f32 %v441_v11, %v440_v26  ;;  %v10308_v26 = vld [vmem:[%s10675_s5 + $0x50] sm:$0xff] }
 0x150   : > { %v443_v8 = vrot.slane %v442_v40, 2 }
 0x152   : > { %v444_v7 = vadd.f32 %v443_v8, %v442_v40  ;;  %v10309_v40 = vld [vmem:[%s10675_s5 + $0x58] sm:$0xff] }
 0x154   : > { %v445_v62 = vrot.slane %v444_v7, 1 }
 0x156   : > { %v446_v34 = vadd.f32 %v445_v62, %v444_v7  ;;  %v10310_v7 = vld [vmem:[%s10675_s5 + $0x60] sm:$0xff] }
 0x158   : > { %9905 = vpush %v446_v34  ;;  %v10311_v34 = vld [vmem:[%s10675_s5 + $0x68] sm:$0xff] }
 0x177   : > { %s10894_s7 = spop %9903 }
 0x178   : > { %s450_s9 = smul.f32 0.0009765625, %s10894_s7 }
 0x17a   : > { %s451_s10 = smul.f32 %s10894_s7, %s450_s9  ;;  %v10902_v31 = vstv %s450_s9  ;;  %s11316_s7 = scalar_lea.hbm %s11363_s4, %s7978_s14 }
 0x17b   : > { %v489_v21 = vsub.f32 %v10296_v42, %v10902_v31  ;;  %v458_v43 = vsub.f32 %v10297_v32, %v10902_v31  ;;  %v459_v38 = vsub.f32 %v10298_v37, %v10902_v31  ;;  %v460_v39 = vsub.f32 %v10299_v47, %v10902_v31  ;;  %v10315_v42 = vld [vmem:[%s10675_s5 + $0x88] sm:$0xff]  ;;  %s11318_s9 = scalar_lea.sflag [#allocation6], %s230_s29 }
 0x17c   : > { %v461_v44 = vsub.f32 %v10300_v48, %v10902_v31  ;;  %v462_v46 = vsub.f32 %v10301_v45, %v10902_v31  ;;  %v463_v51 = vsub.f32 %v10302_v22, %v10902_v31  ;;  %v464_v3 = vsub.f32 %v10303_v29, %v10902_v31  ;;  %v10316_v48 = vld [vmem:[%s10675_s5 + $0x90] sm:$0xff]  ;;  %v10317_v45 = vld [vmem:[%s10675_s5 + $0x98] sm:$0xff]  ;;  %v10318_v22 = vld [vmem:[%s10675_s5 + $0xa0] sm:$0xff] }
 0x17d   : > { %v465_v54 = vsub.f32 %v10304_v1, %v10902_v31  ;;  %v466_v2 = vsub.f32 %v10305_v63, %v10902_v31  ;;  %v467_v19 = vsub.f32 %v10306_v56, %v10902_v31  ;;  %v488_v13 = vsub.f32 %v10307_v6, %v10902_v31 }
 0x17e   : > { %v468_v11 = vsub.f32 %v10308_v26, %v10902_v31  ;;  %v469_v8 = vsub.f32 %v10309_v40, %v10902_v31  ;;  %v470_v62 = vsub.f32 %v10310_v7, %v10902_v31  ;;  %v471_v4 = vsub.f32 %v10311_v34, %v10902_v31 }
 0x189   : > { %s9906_s11 = spop %9905 }
 0x18a   : > { %s452_s12 = ssub.f32 %s9906_s11, %s451_s10  ;;  %s10412_s10 = scalar_lea.vmem %s11311_s8, 256 }
 0x18b   : > { %p10413_p12 = scmp.ne.s32.totalorder %s11311_s8, %s10412_s10  ;;  %s10416_s11 = sshll.u32 %s10494_s19, 4  ;;  %s10417_s11 = int_to_ptr.vmem [resolvable:$false] %s10416_s11 }
 0x18c   : > { %s455_s13 = smul.f32 0.0009775171, %s452_s12  ;;  %s10418_s12 = scalar_lea.vmem %s10417_s11, 512 }
 0x18d   : > { %p10414_p8 = pnand %p10413_p12, %p11401_p7  ;;  %p10419_p13 = scmp.lt.s32.totalorder %s11311_s8, %s10417_s11 }
 0x18e   : > { %s456_s22 = smax.f32 %s10491_s20, %s455_s13  ;;  %p10420_p1 = scmp.lt.s32.totalorder %s10418_s12, %s10412_s10 }
 0x18f   : > { %v490_v5 = vstv %s456_s22  ;;  %p10415_p11 = pneg %p10414_p8 }
 0x190   : > { %10292 = vrsqrt.f32 %v490_v5  ;;  %vm493_vm2 = vcmp.eq.f32.partialorder %v490_v5, inf  ;;  %v496_v17 = vand.u32 2147483648, %v490_v5  ;;  %vm495_vm3 = vcmp.eq.f32.partialorder %v490_v5, 0.0  ;;  %p10421_p6 = por %p10420_p1, %p10419_p13 }
 0x192   : > { %p10422_p9 = pnand %p10421_p6, %p10415_p11 }
 0x19a   : > { %v10293_v57 = vpop.eup %10292 }
 0x19b   : > { %v492_v16 = vmul.f32 %v10293_v57, %v490_v5 }
 0x19d   : > { %v494_v20 = vsel %vm493_vm2, %v490_v5, %v492_v16 }
 0x19e   : > { %v497_v24 = vsel %vm495_vm3, %v496_v17, %v494_v20  ;;  %v472_v20 = vsub.f32 %v10312_v23, %v10902_v31 }
 0x19f   : > { %9907 = vpush %v497_v24  ;;  %v10313_v24 = vld [vmem:[%s10675_s5 + $0x78] sm:$0xff] }
 0x1a0   : > { %v473_v25 = vsub.f32 %v10313_v24, %v10902_v31 }
 0x1d0   : > { %s9908_s6 = spop %9907 }
 0x1d1   : > { %s499_s23 = sadd.f32 1e-09, %s9908_s6 }
 0x1d3   : > { %v500_v30 = vstv %s499_s23 }
 0x1d4   : > { %10294 = vrcp.f32 %v500_v30  ;;  %v474_v30 = vsub.f32 %v10314_v41, %v10902_v31 }
 0x1de   : > { %v10912_v27 = vpop.eup %10294 }
 0x1df   : > { %v10921_v36 = vmul.f32 %v10912_v27, %v489_v21  ;;  %v502_v50 = vmul.f32 %v10912_v27, %v458_v43  ;;  %v503_v28 = vmul.f32 %v10912_v27, %v459_v38  ;;  %v504_v52 = vmul.f32 %v10912_v27, %v460_v39 }
 0x1e0   : > { %v505_v53 = vmul.f32 %v10912_v27, %v461_v44  ;;  %v506_v58 = vmul.f32 %v10912_v27, %v462_v46  ;;  %v507_v59 = vmul.f32 %v10912_v27, %v463_v51  ;;  %v508_v12 = vmul.f32 %v10912_v27, %v464_v3  ;;  %v10321_v3 = vld [vmem:[%s10675_s5 + $0xb8] sm:$0xff] }
 0x1e1   : > { %v534_v60 = vpack.c.bf16 %v503_v28, %v502_v50  ;;  %v509_v55 = vmul.f32 %v10912_v27, %v465_v54  ;;  %v510_v35 = vmul.f32 %v10912_v27, %v466_v2  ;;  %v511_v15 = vmul.f32 %v10912_v27, %v467_v19  ;;  %v10319_v50 = vld [vmem:[%s10675_s5 + $0xa8] sm:$0xff]  ;;  %v10322_v54 = vld [vmem:[%s10675_s5 + $0xc0] sm:$0xff] }
 0x1e2   : > { %v535_v0 = vpack.c.bf16 %v505_v53, %v504_v52  ;;  %v536_v14 = vpack.c.bf16 %v507_v59, %v506_v58  ;;  %v10947_v9 = vmul.f32 %v10912_v27, %v488_v13  ;;  %v512_v61 = vmul.f32 %v10912_v27, %v468_v11  ;;  %v10323_v2 = vld [vmem:[%s10675_s5 + $0xc8] sm:$0xff] }
 0x1e3   : > { %8518 = vmatprep.mubr.msk.bf16.mxu0 %vm271_vm0, %v534_v60  ;;  %v537_v49 = vpack.c.bf16 %v509_v55, %v508_v12  ;;  %v538_v33 = vpack.c.bf16 %v511_v15, %v510_v35  ;;  %v513_v5 = vmul.f32 %v10912_v27, %v469_v8  ;;  %v514_v57 = vmul.f32 %v10912_v27, %v470_v62  ;;  %v10324_v15 = vld [vmem:[%s10675_s5 + $0xd0] sm:$0xff]  ;;  %v10326_v11 = vld [vmem:[%s10675_s5 + $0xe8] sm:$0xff]  ;;  %v10327_v8 = vld [vmem:[%s10675_s5 + $0xe0] sm:$0xff] }
 0x1e4   : > { %8519 = vmatmul.mubr.msk.bf16.vlgmr.msra.gmra.mrb[0].mxu0 %vm271_vm0, %v535_v0  ;;  %v549_v10 = vpack.c.bf16 %v10921_v36, %v10947_v9  ;;  %v515_v16 = vmul.f32 %v10912_v27, %v471_v4  ;;  %v475_v21 = vsub.f32 %v10315_v42, %v10902_v31  ;;  %v516_v32 = vmul.f32 %v10912_v27, %v472_v20  ;;  %v9994_v36 = vld [vmem:[#allocation7 + $0x70] sm:$0xff]   ;;  %v9995_v9 = vld [vmem:[#allocation7 + $0x78] sm:$0xff]  }
 0x1e5   : > { %8522 = vmatprep.mubr.msk.bf16.mxu0 %vm271_vm0, %v536_v14  ;;  %v539_v17 = vpack.c.bf16 %v513_v5, %v512_v61  ;;  %v517_v43 = vmul.f32 %v10912_v27, %v473_v25  ;;  %v518_v37 = vmul.f32 %v10912_v27, %v474_v30  ;;  %v476_v44 = vsub.f32 %v10316_v48, %v10902_v31  ;;  %v10320_v14 = vld [vmem:[%s10675_s5 + $0xb0] sm:$0xff] }
 0x1e6   : > { %v540_v18 = vpack.c.bf16 %v515_v16, %v514_v57  ;;  %v519_v38 = vmul.f32 %v10912_v27, %v475_v21  ;;  %v477_v46 = vsub.f32 %v10317_v45, %v10902_v31  ;;  %v478_v51 = vsub.f32 %v10318_v22, %v10902_v31  ;;  %v9997_v45 = vld [vmem:[#allocation7 + $0x8] sm:$0xff]  }
 0x1e7   : > { %v541_v47 = vpack.c.bf16 %v517_v43, %v516_v32  ;;  %v479_v28 = vsub.f32 %v10319_v50, %v10902_v31  ;;  %v520_v52 = vmul.f32 %v10912_v27, %v476_v44  ;;  %v480_v29 = vsub.f32 %v10320_v14, %v10902_v31 }
 0x1e8   : > { %v542_v39 = vpack.c.bf16 %v519_v38, %v518_v37  ;;  %v521_v53 = vmul.f32 %v10912_v27, %v477_v46  ;;  %v522_v58 = vmul.f32 %v10912_v27, %v478_v51  ;;  %v481_v1 = vsub.f32 %v10321_v3, %v10902_v31 }
 0x1e9   : > { %v523_v59 = vmul.f32 %v10912_v27, %v479_v28  ;;  %v482_v63 = vsub.f32 %v10322_v54, %v10902_v31  ;;  %v483_v56 = vsub.f32 %v10323_v2, %v10902_v31  ;;  %v524_v19 = vmul.f32 %v10912_v27, %v480_v29 }
 0x1ea   : > { %v543_v60 = vpack.c.bf16 %v521_v53, %v520_v52  ;;  %v525_v12 = vmul.f32 %v10912_v27, %v481_v1  ;;  %v487_v40 = vsub.f32 %v10326_v11, %v10902_v31  ;;  %v486_v7 = vsub.f32 %v10327_v8, %v10902_v31 }
 0x1eb   : > { %v544_v0 = vpack.c.bf16 %v523_v59, %v522_v58  ;;  %v526_v55 = vmul.f32 %v10912_v27, %v482_v63  ;;  %v527_v6 = vmul.f32 %v10912_v27, %v483_v56  ;;  %v10492_v16 = vmov 0.0   ;;  %v9999_v63 = vld [vmem:[#allocation7 + $0x18] sm:$0xff]  }
 0x1ec   : > { %8523 = vmatmul.mubr.msk.bf16.gmra.mrb[4].mxu0 %vm271_vm0, %v537_v49  ;;  %v545_v13 = vpack.c.bf16 %v525_v12, %v524_v19  ;;  %v484_v49 = vsub.f32 %v10324_v15, %v10902_v31  ;;  %v530_v4 = vmul.f32 %v10912_v27, %v486_v7  ;;  %v531_v61 = vmul.f32 %v10912_v27, %v487_v40  ;;  %v10000_v15 = vld [vmem:[#allocation7 + $0x20] sm:$0xff]   ;;  %v10001_v7 = vld [vmem:[#allocation7 + $0x28] sm:$0xff]  }
 0x1ed   : > { %8526 = vmatprep.mubr.msk.bf16.mxu0 %vm271_vm0, %v538_v33  ;;  %v546_v35 = vpack.c.bf16 %v527_v6, %v526_v55  ;;  %v10325_v33 = vld [vmem:[%s10675_s5 + $0xd8] sm:$0xff]  ;;  %801 = vst [vmem:[#allocation2] sm:$0x1] %v10492_v16  ;;  %802 = vst [vmem:[#allocation2 + $0x101] sm:$0x1] %v10492_v16 }
 0x1ee   : > { %v485_v26 = vsub.f32 %v10325_v33, %v10902_v31  ;;  %v528_v62 = vmul.f32 %v10912_v27, %v484_v49  ;;  %v548_v57 = vpack.c.bf16 %v531_v61, %v530_v4  ;;  %v9992_v31 = vld [vmem:[#allocation7 + $0x60] sm:$0xff]   ;;  %1725 = vst [vmem:[#allocation3] sm:$0x1] %v10492_v16  ;;  %1726 = vst [vmem:[#allocation3 + $0x101] sm:$0x1] %v10492_v16 }
 0x1ef   : > { %8558 = vmatprep.subr.bf16.mxu1 %v9992_v31  ;;  %2651 = vst [vmem:[#allocation2 + $0x102] sm:$0x3] %v10492_v16 }
 0x1f0   : > { %v529_v34 = vmul.f32 %v10912_v27, %v485_v26  ;;  %8559 = vmatpush3.bf16.msra.mxu1 %v9992_v31  ;;  %v9993_v27 = vld [vmem:[#allocation7 + $0x68] sm:$0xff]  }
 0x1f1   : > { %8560 = vmatprep.subr.bf16.mxu1 %v9993_v27 }
 0x1f2   : > { %v547_v5 = vpack.c.bf16 %v529_v34, %v528_v62 }
 0x1f4   : > { %8527 = vmatmul.mubr.msk.bf16.gmra.mrb[8].mxu0 %vm271_vm0, %v539_v17  ;;  %8561 = vmatpush3.bf16.msra.mxu1 %v9993_v27  ;;  %v11032_v17 = vld [vmem:[#allocation9] ss:$0 sm:$0xff] }
 0x1f5   : > { %8530 = vmatprep.mubr.msk.bf16.mxu0 %vm271_vm0, %v540_v18  ;;  %8562 = vmatprep.subr.bf16.mxu1 %v9994_v36 }
 0x1f8   : > { %8563 = vmatpush3.bf16.msra.mxu1 %v9994_v36  ;;  %v10002_v36 = vld [vmem:[#allocation7 + $0x30] sm:$0xff]  }
 0x1f9   : > { %8564 = vmatprep.subr.bf16.mxu1 %v9995_v9 }
 0x1fc   : > { %8531 = vmatmul.mubr.msk.bf16.gmra.mrb[12].mxu0 %vm271_vm0, %v541_v47  ;;  %8565 = vmatpush3.bf16.msra.mxu1 %v9995_v9 }
 0x1fd   : > { %8534 = vmatprep.mubr.msk.bf16.mxu0 %vm271_vm0, %v542_v39 }
 0x204   : > { %8535 = vmatmul.mubr.msk.bf16.gmra.mrb[16].mxu0 %vm271_vm0, %v543_v60  ;;  %v9998_v60 = vld [vmem:[#allocation7 + $0x10] sm:$0xff]  }
 0x205   : > { %8538 = vmatprep.mubr.msk.bf16.mxu0 %vm271_vm0, %v544_v0 }
 0x20c   : > { %8539 = vmatmul.mubr.msk.bf16.gmra.mrb[20].mxu0 %vm271_vm0, %v545_v13 }
 0x20d   : > { %8542 = vmatprep.mubr.msk.bf16.mxu0 %vm271_vm0, %v546_v35 }
 0x214   : > { %8543 = vmatmul.mubr.msk.bf16.gmra.mrb[24].mxu0 %vm271_vm0, %v547_v5 }
 0x215   : > { %8546 = vmatprep.mubr.msk.bf16.mxu0 %vm271_vm0, %v548_v57 }
 0x21c   : > { %8547 = vmatmul.mubr.msk.bf16.gmra.mrb[28].mxu0 %vm271_vm0, %v549_v10  ;;  %v9996_v10 = vld [vmem:[#allocation7] sm:$0xff]  }
 0x21d   : > { %8598 = vmatprep.subr.bf16.mxu1 %v9996_v10 }
 0x2b7   : > { %v8520_v18 = vpop.f32.mrb[0].mxu0 }
 0x2b8   : > { %v651_v23 = vadd.f32 %v8520_v18, %v11032_v17  ;;  %v642_v20 = vpop.f32.mrb[1].mxu0 }
 0x2b9   : > { %v643_v24 = vadd.f32 %v11032_v17, %v642_v20  ;;  %v8521_v25 = vpop.f32.mrb[2].mxu0 }
 0x2ba   : > { %v771_v41 = vmax.f32 %v651_v23, 0.0  ;;  %v654_v30 = vadd.f32 %v8521_v25, %v11032_v17  ;;  %v645_v42 = vpop.f32.mrb[3].mxu0  ;;  %v10003_v25 = vld [vmem:[#allocation7 + $0x38] sm:$0xff]  }
 0x2bb   : > { %v769_v21 = vmax.f32 %v643_v24, 0.0  ;;  %v646_v32 = vadd.f32 %v11032_v17, %v645_v42 }
 0x2bc   : > { %805 = vst [vmem:[#allocation2 + $0x11] sm:$0xff] %v771_v41  ;;  %v772_v43 = vmax.f32 %v654_v30, 0.0 }
 0x2bd   : > { %803 = vst [vmem:[#allocation2 + $0x1] sm:$0xff] %v769_v21  ;;  %v770_v37 = vmax.f32 %v646_v32, 0.0 }
 0x2be   : > { %806 = vst [vmem:[#allocation2 + $0x19] sm:$0xff] %v772_v43  ;;  %v932_v38 = vpack.c.bf16 %v772_v43, %v771_v41 }
 0x2bf   : > { %804 = vst [vmem:[#allocation2 + $0x9] sm:$0xff] %v770_v37  ;;  %v8524_v47 = vpop.f32.mrb[4].mxu0  ;;  %v931_v39 = vpack.c.bf16 %v770_v37, %v769_v21 }
 0x2c0   : > { %v667_v48 = vadd.f32 %v8524_v47, %v11032_v17  ;;  %v658_v44 = vpop.f32.mrb[5].mxu0  ;;  %v11057_v47 = vld [vmem:[#allocation7 + $0x80] sm:$0xff]  }
 0x2c1   : > { %v659_v46 = vadd.f32 %v11032_v17, %v658_v44  ;;  %v8525_v22 = vpop.f32.mrb[6].mxu0  ;;  %8566 = vmatprep.mubr.bf16.mxu1 %v931_v39 }
 0x2c2   : > { %v775_v51 = vmax.f32 %v667_v48, 0.0  ;;  %v670_v50 = vadd.f32 %v8525_v22, %v11032_v17  ;;  %v661_v28 = vpop.f32.mrb[7].mxu0  ;;  %8567 = vmatmul.mubr.bf16.vlgmr.msra.gmra.mrb[0].mxu1 %v932_v38 }
 0x2c3   : > { %v773_v52 = vmax.f32 %v659_v46, 0.0  ;;  %v662_v53 = vadd.f32 %v11032_v17, %v661_v28  ;;  %8599 = vmatpush3.bf16.msra.mxu1 %v9996_v10 }
 0x2c4   : > { %v11042_v58 = vld [vmem:[#allocation2] sm:$0xff]  ;;  %809 = vst [vmem:[#allocation2 + $0x31] sm:$0xff] %v775_v51  ;;  %v776_v59 = vmax.f32 %v670_v50, 0.0  ;;  %8600 = vmatprep.subr.bf16.mxu1 %v9997_v45 }
 0x2c5   : > { %2650 = vst [vmem:[#allocation2] sm:$0x3] %v10492_v16  ;;  %807 = vst [vmem:[#allocation2 + $0x21] sm:$0xff] %v773_v52  ;;  %v774_v0 = vmax.f32 %v662_v53, 0.0 }
 0x2c6   : > { %810 = vst [vmem:[#allocation2 + $0x39] sm:$0xff] %v776_v59  ;;  %v934_v14 = vpack.c.bf16 %v776_v59, %v775_v51 }
 0x2c7   : > { %808 = vst [vmem:[#allocation2 + $0x29] sm:$0xff] %v774_v0  ;;  %v8528_v29 = vpop.f32.mrb[8].mxu0  ;;  %v933_v3 = vpack.c.bf16 %v774_v0, %v773_v52  ;;  %8601 = vmatpush3.bf16.msra.mxu1 %v9997_v45 }
 0x2c8   : > { %v683_v1 = vadd.f32 %v8528_v29, %v11032_v17  ;;  %v674_v54 = vpop.f32.mrb[9].mxu0  ;;  %8602 = vmatprep.subr.bf16.mxu1 %v9998_v60 }
 0x2c9   : > { %v675_v2 = vadd.f32 %v11032_v17, %v674_v54  ;;  %v8529_v56 = vpop.f32.mrb[10].mxu0  ;;  %8570 = vmatprep.mubr.bf16.mxu1 %v933_v3 }
 0x2ca   : > { %v779_v19 = vmax.f32 %v683_v1, 0.0  ;;  %v686_v12 = vadd.f32 %v8529_v56, %v11032_v17  ;;  %v677_v55 = vpop.f32.mrb[11].mxu0  ;;  %8571 = vmatmul.mubr.bf16.gmra.mrb[4].mxu1 %v934_v14 }
 0x2cb   : > { %v777_v6 = vmax.f32 %v675_v2, 0.0  ;;  %v678_v13 = vadd.f32 %v11032_v17, %v677_v55  ;;  %8603 = vmatpush3.bf16.msra.mxu1 %v9998_v60 }
 0x2cc   : > { %813 = vst [vmem:[#allocation2 + $0x51] sm:$0xff] %v779_v19  ;;  %v780_v35 = vmax.f32 %v686_v12, 0.0  ;;  %8604 = vmatprep.subr.bf16.mxu1 %v9999_v63 }
 0x2cd   : > { %811 = vst [vmem:[#allocation2 + $0x41] sm:$0xff] %v777_v6  ;;  %v778_v49 = vmax.f32 %v678_v13, 0.0 }
 0x2ce   : > { %814 = vst [vmem:[#allocation2 + $0x59] sm:$0xff] %v780_v35  ;;  %v936_v33 = vpack.c.bf16 %v780_v35, %v779_v19 }
 0x2cf   : > { %812 = vst [vmem:[#allocation2 + $0x49] sm:$0xff] %v778_v49  ;;  %v8532_v26 = vpop.f32.mrb[12].mxu0  ;;  %v935_v11 = vpack.c.bf16 %v778_v49, %v777_v6  ;;  %8605 = vmatpush3.bf16.msra.mxu1 %v9999_v63 }
 0x2d0   : > { %v699_v40 = vadd.f32 %v8532_v26, %v11032_v17  ;;  %v690_v8 = vpop.f32.mrb[13].mxu0  ;;  %8606 = vmatprep.subr.bf16.mxu1 %v10000_v15 }
 0x2d1   : > { %v691_v62 = vadd.f32 %v11032_v17, %v690_v8  ;;  %v8533_v34 = vpop.f32.mrb[14].mxu0  ;;  %8574 = vmatprep.mubr.bf16.mxu1 %v935_v11 }
 0x2d2   : > { %v783_v4 = vmax.f32 %v699_v40, 0.0  ;;  %v702_v61 = vadd.f32 %v8533_v34, %v11032_v17  ;;  %v693_v5 = vpop.f32.mrb[15].mxu0  ;;  %8575 = vmatmul.mubr.bf16.gmra.mrb[8].mxu1 %v936_v33 }
 0x2d3   : > { %v781_v57 = vmax.f32 %v691_v62, 0.0  ;;  %v694_v31 = vadd.f32 %v11032_v17, %v693_v5  ;;  %8607 = vmatpush3.bf16.msra.mxu1 %v10000_v15 }
 0x2d4   : > { %817 = vst [vmem:[#allocation2 + $0x71] sm:$0xff] %v783_v4  ;;  %v784_v27 = vmax.f32 %v702_v61, 0.0  ;;  %8608 = vmatprep.subr.bf16.mxu1 %v10001_v7 }
 0x2d5   : > { %815 = vst [vmem:[#allocation2 + $0x61] sm:$0xff] %v781_v57  ;;  %v782_v9 = vmax.f32 %v694_v31, 0.0 }
 0x2d6   : > { %818 = vst [vmem:[#allocation2 + $0x79] sm:$0xff] %v784_v27  ;;  %v938_v10 = vpack.c.bf16 %v784_v27, %v783_v4 }
 0x2d7   : > { %816 = vst [vmem:[#allocation2 + $0x69] sm:$0xff] %v782_v9  ;;  %v8536_v18 = vpop.f32.mrb[16].mxu0  ;;  %v937_v23 = vpack.c.bf16 %v782_v9, %v781_v57  ;;  %8609 = vmatpush3.bf16.msra.mxu1 %v10001_v7 }
 0x2d8   : > { %v715_v20 = vadd.f32 %v8536_v18, %v11032_v17  ;;  %v706_v24 = vpop.f32.mrb[17].mxu0  ;;  %8610 = vmatprep.subr.bf16.mxu1 %v10002_v36  ;;  %v10012_v18 = vld [vmem:[#allocation7 + $0x100] sm:$0xff]  }
 0x2d9   : > { %v707_v41 = vadd.f32 %v11032_v17, %v706_v24  ;;  %v8537_v30 = vpop.f32.mrb[18].mxu0  ;;  %8578 = vmatprep.mubr.bf16.mxu1 %v937_v23  ;;  %v10013_v23 = vld [vmem:[#allocation7 + $0x108] sm:$0xff]   ;;  %8694 = vmatprep.subr.bf16.mxu0 %v10012_v18 }
 0x2da   : > { %v787_v42 = vmax.f32 %v715_v20, 0.0  ;;  %v718_v21 = vadd.f32 %v8537_v30, %v11032_v17  ;;  %v709_v32 = vpop.f32.mrb[19].mxu0  ;;  %8579 = vmatmul.mubr.bf16.gmra.mrb[12].mxu1 %v938_v10  ;;  %v837_v20 = vld [vmem:[#allocation2 + $0x10] sm:$0xff]  ;;  %v838_v24 = vld [vmem:[#allocation2 + $0x18] sm:$0xff]  ;;  %8695 = vmatpush3.bf16.msra.mxu0 %v10012_v18  ;;  %v839_v30 = vld [vmem:[#allocation2 + $0x20] sm:$0xff] }
 0x2db   : > { %v785_v43 = vmax.f32 %v707_v41, 0.0  ;;  %v710_v37 = vadd.f32 %v11032_v17, %v709_v32  ;;  %8611 = vmatpush3.bf16.msra.mxu1 %v10002_v36  ;;  %v836_v36 = vld [vmem:[#allocation2 + $0x8] sm:$0xff]  ;;  %8696 = vmatprep.subr.bf16.mxu0 %v10013_v23  ;;  %v868_v41 = vpack.c.bf16 %v838_v24, %v837_v20 }
 0x2dc   : > { %821 = vst [vmem:[#allocation2 + $0x91] sm:$0xff] %v787_v42  ;;  %v788_v38 = vmax.f32 %v718_v21, 0.0  ;;  %8612 = vmatprep.subr.bf16.mxu1 %v10003_v25  ;;  %v867_v10 = vpack.c.bf16 %v836_v36, %v11042_v58  ;;  %v10015_v32 = vld [vmem:[#allocation7 + $0x118] sm:$0xff]   ;;  %v10006_v58 = vld [vmem:[#allocation7 + $0x90] sm:$0xff]  }
 0x2dd   : > { %819 = vst [vmem:[#allocation2 + $0x81] sm:$0xff] %v785_v43  ;;  %v786_v39 = vmax.f32 %v710_v37, 0.0  ;;  %v842_v37 = vld [vmem:[#allocation2 + $0x38] sm:$0xff]  ;;  %v1387_v18 = vld [vmem:[#allocation2 + $0x2a] sm:$0xff] }
 0x2de   : > { %822 = vst [vmem:[#allocation2 + $0x99] sm:$0xff] %v788_v38  ;;  %v940_v48 = vpack.c.bf16 %v788_v38, %v787_v42  ;;  %v10005_v42 = vld [vmem:[#allocation7 + $0x88] sm:$0xff]   ;;  %8697 = vmatpush3.bf16.msra.mxu0 %v10013_v23  ;;  %v844_v38 = vld [vmem:[#allocation2 + $0x48] sm:$0xff]  ;;  %v1384_v23 = vld [vmem:[#allocation2 + $0x12] sm:$0xff] }
 0x2df   : > { %820 = vst [vmem:[#allocation2 + $0x89] sm:$0xff] %v786_v39  ;;  %v8540_v44 = vpop.f32.mrb[20].mxu0  ;;  %v939_v45 = vpack.c.bf16 %v786_v39, %v785_v43  ;;  %8613 = vmatpush3.bf16.msra.mxu1 %v10003_v25  ;;  %v10014_v25 = vld [vmem:[#allocation7 + $0x110] sm:$0xff]   ;;  %v841_v43 = vld [vmem:[#allocation2 + $0x30] sm:$0xff] }
 0x2e0   : > { %v731_v46 = vadd.f32 %v8540_v44, %v11032_v17  ;;  %v722_v22 = vpop.f32.mrb[21].mxu0  ;;  %8646 = vmatprep.subr.bf16.mxu1 %v11057_v47  ;;  %8698 = vmatprep.subr.bf16.mxu0 %v10014_v25  ;;  %v10016_v39 = vld [vmem:[#allocation7 + $0x120] sm:$0xff]   ;;  %v843_v44 = vld [vmem:[#allocation2 + $0x40] sm:$0xff] }
 0x2e1   : > { %v723_v51 = vadd.f32 %v11032_v17, %v722_v22  ;;  %v8541_v50 = vpop.f32.mrb[22].mxu0  ;;  %8582 = vmatprep.mubr.bf16.mxu1 %v939_v45  ;;  %v10007_v45 = vld [vmem:[#allocation7 + $0x98] sm:$0xff]   ;;  %v10017_v22 = vld [vmem:[#allocation7 + $0x128] sm:$0xff]  }
 0x2e2   : > { %v791_v28 = vmax.f32 %v731_v46, 0.0  ;;  %v734_v52 = vadd.f32 %v8541_v50, %v11032_v17  ;;  %v725_v53 = vpop.f32.mrb[23].mxu0  ;;  %8583 = vmatmul.mubr.bf16.gmra.mrb[16].mxu1 %v940_v48  ;;  %8699 = vmatpush3.bf16.msra.mxu0 %v10014_v25  ;;  %v870_v48 = vpack.c.bf16 %v842_v37, %v841_v43  ;;  %v871_v46 = vpack.c.bf16 %v844_v38, %v843_v44  ;;  %v846_v50 = vld [vmem:[#allocation2 + $0x58] sm:$0xff]  ;;  %v1390_v25 = vld [vmem:[#allocation2 + $0x42] sm:$0xff]  ;;  %v1395_v43 = vld [vmem:[#allocation2 + $0x6a] sm:$0xff] }
 0x2e3   : > { %v789_v59 = vmax.f32 %v723_v51, 0.0  ;;  %v726_v60 = vadd.f32 %v11032_v17, %v725_v53  ;;  %8700 = vmatprep.subr.bf16.mxu0 %v10015_v32  ;;  %v845_v51 = vld [vmem:[#allocation2 + $0x50] sm:$0xff]  ;;  %v847_v53 = vld [vmem:[#allocation2 + $0x60] sm:$0xff] }
 0x2e4   : > { %825 = vst [vmem:[#allocation2 + $0xb1] sm:$0xff] %v791_v28  ;;  %v792_v0 = vmax.f32 %v734_v52, 0.0  ;;  %v872_v52 = vpack.c.bf16 %v846_v50, %v845_v51  ;;  %v1392_v37 = vld [vmem:[#allocation2 + $0x52] sm:$0xff] }
 0x2e5   : > { %823 = vst [vmem:[#allocation2 + $0xa1] sm:$0xff] %v789_v59  ;;  %v790_v14 = vmax.f32 %v726_v60, 0.0 }
 0x2e6   : > { %826 = vst [vmem:[#allocation2 + $0xb9] sm:$0xff] %v792_v0  ;;  %v942_v29 = vpack.c.bf16 %v792_v0, %v791_v28  ;;  %8701 = vmatpush3.bf16.msra.mxu0 %v10015_v32  ;;  %v848_v28 = vld [vmem:[#allocation2 + $0x68] sm:$0xff]  ;;  %v1393_v32 = vld [vmem:[#allocation2 + $0x5a] sm:$0xff] }
 0x2e7   : > { %824 = vst [vmem:[#allocation2 + $0xa9] sm:$0xff] %v790_v14  ;;  %v8544_v3 = vpop.f32.mrb[24].mxu0  ;;  %v941_v1 = vpack.c.bf16 %v790_v14, %v789_v59  ;;  %8702 = vmatprep.subr.bf16.mxu0 %v10016_v39  ;;  %v10009_v59 = vld [vmem:[#allocation7 + $0xa8] sm:$0xff]   ;;  %v873_v60 = vpack.c.bf16 %v848_v28, %v847_v53  ;;  %v10010_v0 = vld [vmem:[#allocation7 + $0xb0] sm:$0xff]   ;;  %v849_v14 = vld [vmem:[#allocation2 + $0x70] sm:$0xff]  ;;  %v1419_v38 = vpack.c.bf16 %v1393_v32, %v1392_v37 }
 0x2e8   : > { %v747_v54 = vadd.f32 %v8544_v3, %v11032_v17  ;;  %v738_v63 = vpop.f32.mrb[25].mxu0  ;;  %v852_v3 = vld [vmem:[#allocation2 + $0x88] sm:$0xff] }
 0x2e9   : > { %v739_v2 = vadd.f32 %v11032_v17, %v738_v63  ;;  %v8545_v56 = vpop.f32.mrb[26].mxu0  ;;  %8586 = vmatprep.mubr.bf16.mxu1 %v941_v1  ;;  %v10011_v63 = vld [vmem:[#allocation7 + $0xb8] sm:$0xff]   ;;  %v1398_v44 = vld [vmem:[#allocation2 + $0x82] sm:$0xff] }
 0x2ea   : > { %v795_v19 = vmax.f32 %v747_v54, 0.0  ;;  %v750_v12 = vadd.f32 %v8545_v56, %v11032_v17  ;;  %v741_v55 = vpop.f32.mrb[27].mxu0  ;;  %8587 = vmatmul.mubr.bf16.gmra.mrb[20].mxu1 %v942_v29  ;;  %8703 = vmatpush3.bf16.msra.mxu0 %v10016_v39  ;;  %v850_v29 = vld [vmem:[#allocation2 + $0x78] sm:$0xff]  ;;  %v851_v54 = vld [vmem:[#allocation2 + $0x80] sm:$0xff]  ;;  %v853_v56 = vld [vmem:[#allocation2 + $0x90] sm:$0xff] }
 0x2eb   : > { %v793_v6 = vmax.f32 %v739_v2, 0.0  ;;  %v742_v13 = vadd.f32 %v11032_v17, %v741_v55  ;;  %8704 = vmatprep.subr.bf16.mxu0 %v10017_v22  ;;  %v874_v1 = vpack.c.bf16 %v850_v29, %v849_v14  ;;  %v875_v2 = vpack.c.bf16 %v852_v3, %v851_v54 }
 0x2ec   : > { %829 = vst [vmem:[#allocation2 + $0xd1] sm:$0xff] %v795_v19  ;;  %v796_v35 = vmax.f32 %v750_v12, 0.0  ;;  %v1401_v51 = vld [vmem:[#allocation2 + $0x9a] sm:$0xff] }
 0x2ed   : > { %827 = vst [vmem:[#allocation2 + $0xc1] sm:$0xff] %v793_v6  ;;  %v794_v15 = vmax.f32 %v742_v13, 0.0  ;;  %v1404_v29 = vld [vmem:[#allocation2 + $0xb2] sm:$0xff] }
 0x2ee   : > { %830 = vst [vmem:[#allocation2 + $0xd9] sm:$0xff] %v796_v35  ;;  %v944_v49 = vpack.c.bf16 %v796_v35, %v795_v19  ;;  %8705 = vmatpush3.bf16.msra.mxu0 %v10017_v22  ;;  %v854_v19 = vld [vmem:[#allocation2 + $0x98] sm:$0xff]  ;;  %v856_v12 = vld [vmem:[#allocation2 + $0xa8] sm:$0xff]  ;;  %v857_v35 = vld [vmem:[#allocation2 + $0xb0] sm:$0xff] }
 0x2ef   : > { %828 = vst [vmem:[#allocation2 + $0xc9] sm:$0xff] %v794_v15  ;;  %v8548_v33 = vpop.f32.mrb[28].mxu0  ;;  %v943_v26 = vpack.c.bf16 %v794_v15, %v793_v6  ;;  %v876_v55 = vpack.c.bf16 %v854_v19, %v853_v56  ;;  %v855_v6 = vld [vmem:[#allocation2 + $0xa0] sm:$0xff]  ;;  %v858_v15 = vld [vmem:[#allocation2 + $0xb8] sm:$0xff]  ;;  %v1403_v28 = vld [vmem:[#allocation2 + $0xaa] sm:$0xff] }
 0x2f0   : > { %v763_v11 = vadd.f32 %v8548_v33, %v11032_v17  ;;  %v754_v40 = vpop.f32.mrb[29].mxu0  ;;  %v877_v13 = vpack.c.bf16 %v856_v12, %v855_v6  ;;  %v878_v33 = vpack.c.bf16 %v858_v15, %v857_v35  ;;  %v1402_v50 = vld [vmem:[#allocation2 + $0xa2] sm:$0xff]  ;;  %v10019_v15 = vld [vmem:[#allocation7 + $0x138] sm:$0xff]  }
 0x2f1   : > { %v755_v8 = vadd.f32 %v11032_v17, %v754_v40  ;;  %v8549_v7 = vpop.f32.mrb[30].mxu0  ;;  %8590 = vmatprep.mubr.bf16.mxu1 %v943_v26  ;;  %v10018_v35 = vld [vmem:[#allocation7 + $0x130] sm:$0xff]  }
 0x2f2   : > { %v799_v62 = vmax.f32 %v763_v11, 0.0  ;;  %v766_v34 = vadd.f32 %v8549_v7, %v11032_v17  ;;  %v757_v4 = vpop.f32.mrb[31].mxu0  ;;  %8591 = vmatmul.mubr.bf16.gmra.mrb[24].mxu1 %v944_v49  ;;  %8706 = vmatprep.subr.bf16.mxu0 %v10018_v35 }
 0x2f3   : > { %v797_v61 = vmax.f32 %v755_v8, 0.0  ;;  %v758_v5 = vadd.f32 %v11032_v17, %v757_v4  ;;  %v840_v17 = vld [vmem:[#allocation2 + $0x28] sm:$0xff]  ;;  %8707 = vmatpush3.bf16.msra.mxu0 %v10018_v35 }
 0x2f4   : > { %833 = vst [vmem:[#allocation2 + $0xf1] sm:$0xff] %v799_v62  ;;  %v800_v57 = vmax.f32 %v766_v34, 0.0  ;;  %v869_v21 = vpack.c.bf16 %v840_v17, %v839_v30  ;;  %v859_v26 = vld [vmem:[#allocation2 + $0xc0] sm:$0xff]  ;;  %v1388_v30 = vld [vmem:[#allocation2 + $0x32] sm:$0xff]  ;;  %8708 = vmatprep.subr.bf16.mxu0 %v10019_v15 }
 0x2f5   : > { %831 = vst [vmem:[#allocation2 + $0xe1] sm:$0xff] %v797_v61  ;;  %v798_v31 = vmax.f32 %v758_v5, 0.0  ;;  %v862_v8 = vld [vmem:[#allocation2 + $0xd8] sm:$0xff] }
 0x2f6   : > { %834 = vst [vmem:[#allocation2 + $0xf9] sm:$0xff] %v800_v57  ;;  %v946_v27 = vpack.c.bf16 %v800_v57, %v799_v62  ;;  %v860_v49 = vld [vmem:[#allocation2 + $0xc8] sm:$0xff]  ;;  %v861_v40 = vld [vmem:[#allocation2 + $0xd0] sm:$0xff]  ;;  %v1389_v17 = vld [vmem:[#allocation2 + $0x3a] sm:$0xff] }
 0x2f7   : > { %832 = vst [vmem:[#allocation2 + $0xe9] sm:$0xff] %v798_v31  ;;  %v945_v9 = vpack.c.bf16 %v798_v31, %v797_v61  ;;  %v879_v11 = vpack.c.bf16 %v860_v49, %v859_v26  ;;  %v880_v62 = vpack.c.bf16 %v862_v8, %v861_v40  ;;  %v1382_v57 = vld [vmem:[#allocation2 + $0x2] sm:$0xff]  ;;  %v1383_v31 = vld [vmem:[#allocation2 + $0xa] sm:$0xff]  ;;  %v1408_v56 = vld [vmem:[#allocation2 + $0xd2] sm:$0xff]  ;;  %8709 = vmatpush3.bf16.msra.mxu0 %v10019_v15 }
 0x2f8   : > { %v1414_v36 = vpack.c.bf16 %v1383_v31, %v1382_v57  ;;  %v1407_v14 = vld [vmem:[#allocation2 + $0xca] sm:$0xff]  ;;  %v10020_v49 = vld [vmem:[#allocation7 + $0xc0] sm:$0xff]   ;;  %v10021_v57 = vld [vmem:[#allocation7 + $0xc8] sm:$0xff]  }
 0x2f9   : > { %8594 = vmatprep.mubr.bf16.mxu1 %v945_v9  ;;  %v1385_v9 = vld [vmem:[#allocation2 + $0x1a] sm:$0xff]  ;;  %8742 = vmatprep.subr.bf16.mxu0 %v10020_v49 }
 0x2fa   : > { %8595 = vmatmul.mubr.bf16.gmra.mrb[28].mxu1 %v946_v27  ;;  %v1415_v20 = vpack.c.bf16 %v1385_v9, %v1384_v23 }
 0x2fb   : > { %8614 = vmatprep.mubr.bf16.mxu1 %v867_v10  ;;  %v1386_v10 = vld [vmem:[#allocation2 + $0x22] sm:$0xff] }
 0x2fc   : > { %v863_v34 = vld [vmem:[#allocation2 + $0xe0] sm:$0xff]  ;;  %v1416_v24 = vpack.c.bf16 %v1387_v18, %v1386_v10 }
 0x2fd   : > { %v866_v5 = vld [vmem:[#allocation2 + $0xf8] sm:$0xff] }
 0x2fe   : > { %v864_v7 = vld [vmem:[#allocation2 + $0xe8] sm:$0xff]  ;;  %v865_v61 = vld [vmem:[#allocation2 + $0xf0] sm:$0xff]  ;;  %v1409_v54 = vld [vmem:[#allocation2 + $0xda] sm:$0xff] }
 0x2ff   : > { %v881_v4 = vpack.c.bf16 %v864_v7, %v863_v34  ;;  %v882_v27 = vpack.c.bf16 %v866_v5, %v865_v61  ;;  %v1427_v19 = vpack.c.bf16 %v1409_v54, %v1408_v56  ;;  %v1413_v6 = vld [vmem:[#allocation2 + $0xfa] sm:$0xff] }
 0x302   : > { %8615 = vmatmul.mubr.bf16.vlgmr.msra.gmra.mrb[0].mxu1 %v868_v41  ;;  %v1391_v41 = vld [vmem:[#allocation2 + $0x4a] sm:$0xff] }
 0x303   : > { %8647 = vmatpush3.bf16.msra.mxu1 %v11057_v47  ;;  %8618 = vmatprep.mubr.bf16.mxu1 %v869_v21  ;;  %v10008_v47 = vld [vmem:[#allocation7 + $0xa0] sm:$0xff]   ;;  %v1418_v21 = vpack.c.bf16 %v1391_v41, %v1390_v25 }
 0x304   : > { %8648 = vmatprep.subr.bf16.mxu1 %v10005_v42 }
 0x307   : > { %8649 = vmatpush3.bf16.msra.mxu1 %v10005_v42  ;;  %v1417_v42 = vpack.c.bf16 %v1389_v17, %v1388_v30  ;;  %v10023_v30 = vld [vmem:[#allocation7 + $0xd8] sm:$0xff]  }
 0x308   : > { %8650 = vmatprep.subr.bf16.mxu1 %v10006_v58 }
 0x30a   : > { %8619 = vmatmul.mubr.bf16.gmra.mrb[4].mxu1 %v870_v48  ;;  %v1397_v48 = vld [vmem:[#allocation2 + $0x7a] sm:$0xff] }
 0x30b   : > { %8622 = vmatprep.mubr.bf16.mxu1 %v871_v46  ;;  %8651 = vmatpush3.bf16.msra.mxu1 %v10006_v58  ;;  %v1394_v58 = vld [vmem:[#allocation2 + $0x62] sm:$0xff]  ;;  %v1396_v46 = vld [vmem:[#allocation2 + $0x72] sm:$0xff] }
 0x30c   : > { %8652 = vmatprep.subr.bf16.mxu1 %v10007_v45  ;;  %v1420_v39 = vpack.c.bf16 %v1395_v43, %v1394_v58  ;;  %v1421_v22 = vpack.c.bf16 %v1397_v48, %v1396_v46  ;;  %v10025_v46 = vld [vmem:[#allocation7 + $0xe8] sm:$0xff]  }
 0x30f   : > { %8653 = vmatpush3.bf16.msra.mxu1 %v10007_v45  ;;  %v1399_v45 = vld [vmem:[#allocation2 + $0x8a] sm:$0xff] }
 0x310   : > { %8654 = vmatprep.subr.bf16.mxu1 %v10008_v47 }
 0x312   : > { %8623 = vmatmul.mubr.bf16.gmra.mrb[8].mxu1 %v872_v52  ;;  %v1400_v52 = vld [vmem:[#allocation2 + $0x92] sm:$0xff] }
 0x313   : > { %8626 = vmatprep.mubr.bf16.mxu1 %v873_v60  ;;  %8655 = vmatpush3.bf16.msra.mxu1 %v10008_v47  ;;  %v1422_v47 = vpack.c.bf16 %v1399_v45, %v1398_v44  ;;  %v1423_v53 = vpack.c.bf16 %v1401_v51, %v1400_v52  ;;  %v1405_v60 = vld [vmem:[#allocation2 + $0xba] sm:$0xff] }
 0x314   : > { %8656 = vmatprep.subr.bf16.mxu1 %v10009_v59  ;;  %v1425_v3 = vpack.c.bf16 %v1405_v60, %v1404_v29  ;;  %v10027_v29 = vld [vmem:[#allocation7 + $0xf8] sm:$0xff]  }
 0x317   : > { %8657 = vmatpush3.bf16.msra.mxu1 %v10009_v59  ;;  %v1424_v59 = vpack.c.bf16 %v1403_v28, %v1402_v50 }
 0x318   : > { %8658 = vmatprep.subr.bf16.mxu1 %v10010_v0 }
 0x31a   : > { %8627 = vmatmul.mubr.bf16.gmra.mrb[12].mxu1 %v874_v1 }
 0x31b   : > { %8630 = vmatprep.mubr.bf16.mxu1 %v875_v2  ;;  %8659 = vmatpush3.bf16.msra.mxu1 %v10010_v0  ;;  %v1406_v0 = vld [vmem:[#allocation2 + $0xc2] sm:$0xff]  ;;  %v1411_v2 = vld [vmem:[#allocation2 + $0xea] sm:$0xff] }
 0x31c   : > { %8660 = vmatprep.subr.bf16.mxu1 %v10011_v63  ;;  %v1426_v1 = vpack.c.bf16 %v1407_v14, %v1406_v0 }
 0x31f   : > { %8661 = vmatpush3.bf16.msra.mxu1 %v10011_v63  ;;  %v1410_v63 = vld [vmem:[#allocation2 + $0xe2] sm:$0xff] }
 0x320   : > { %v1428_v12 = vpack.c.bf16 %v1411_v2, %v1410_v63 }
 0x322   : > { %8631 = vmatmul.mubr.bf16.gmra.mrb[16].mxu1 %v876_v55  ;;  %v1412_v55 = vld [vmem:[#allocation2 + $0xf2] sm:$0xff] }
 0x323   : > { %8634 = vmatprep.mubr.bf16.mxu1 %v877_v13  ;;  %v1429_v13 = vpack.c.bf16 %v1413_v6, %v1412_v55 }
 0x32a   : > { %8635 = vmatmul.mubr.bf16.gmra.mrb[20].mxu1 %v878_v33  ;;  %v11074_v33 = vld [vmem:[#allocation9 + $0x1] ss:$0 sm:$0xff] }
 0x32b   : > { %8638 = vmatprep.mubr.bf16.mxu1 %v879_v11 }
 0x332   : > { %8639 = vmatmul.mubr.bf16.gmra.mrb[24].mxu1 %v880_v62 }
 0x333   : > { %8642 = vmatprep.mubr.bf16.mxu1 %v881_v4 }
 0x33a   : > { %8643 = vmatmul.mubr.bf16.gmra.mrb[28].mxu1 %v882_v27 }
 0x33b   : > { %8662 = vmatprep.mubr.bf16.mxu1 %v1414_v36 }
 0x342   : > { %8663 = vmatmul.mubr.bf16.vlgmr.msra.gmra.mrb[0].mxu1 %v1415_v20  ;;  %v10022_v20 = vld [vmem:[#allocation7 + $0xd0] sm:$0xff]  }
 0x343   : > { %8666 = vmatprep.mubr.bf16.mxu1 %v1416_v24 }
 0x34a   : > { %8667 = vmatmul.mubr.bf16.gmra.mrb[4].mxu1 %v1417_v42 }
 0x34b   : > { %8670 = vmatprep.mubr.bf16.mxu1 %v1418_v21 }
 0x352   : > { %8671 = vmatmul.mubr.bf16.gmra.mrb[8].mxu1 %v1419_v38 }
 0x353   : > { %8674 = vmatprep.mubr.bf16.mxu1 %v1420_v39  ;;  %v10024_v39 = vld [vmem:[#allocation7 + $0xe0] sm:$0xff]  }
 0x35a   : > { %8675 = vmatmul.mubr.bf16.gmra.mrb[12].mxu1 %v1421_v22 }
 0x35b   : > { %8678 = vmatprep.mubr.bf16.mxu1 %v1422_v47 }
 0x362   : > { %8679 = vmatmul.mubr.bf16.gmra.mrb[16].mxu1 %v1423_v53 }
 0x363   : > { %8682 = vmatprep.mubr.bf16.mxu1 %v1424_v59  ;;  %v10026_v59 = vld [vmem:[#allocation7 + $0xf0] sm:$0xff]  }
 0x36a   : > { %8683 = vmatmul.mubr.bf16.gmra.mrb[20].mxu1 %v1425_v3 }
 0x36b   : > { %8686 = vmatprep.mubr.bf16.mxu1 %v1426_v1 }
 0x372   : > { %8687 = vmatmul.mubr.bf16.gmra.mrb[24].mxu1 %v1427_v19 }
 0x373   : > { %8690 = vmatprep.mubr.bf16.mxu1 %v1428_v12  ;;  %v11098_v12 = vld [vmem:[#allocation7 + $0x140] sm:$0xff]  }
 0x37a   : > { %8691 = vmatmul.mubr.bf16.gmra.mrb[28].mxu1 %v1429_v13 }
 0x415   : > { %v8664_v26 = vpop.f32.mrb[0].mxu1 }
 0x416   : > { %v1695_v11 = vadd.f32 %v8664_v26, %v11074_v33  ;;  %v1529_v40 = vpop.f32.mrb[1].mxu1 }
 0x417   : > { %v1693_v8 = vadd.f32 %v11074_v33, %v1529_v40  ;;  %v8665_v7 = vpop.f32.mrb[2].mxu1 }
 0x418   : > { %1729 = vst [vmem:[#allocation3 + $0x11] sm:$0xff] %v1695_v11  ;;  %v1696_v62 = vadd.f32 %v8665_v7, %v11074_v33  ;;  %v1532_v34 = vpop.f32.mrb[3].mxu1 }
 0x419   : > { %1727 = vst [vmem:[#allocation3 + $0x1] sm:$0xff] %v1693_v8  ;;  %v1694_v4 = vadd.f32 %v11074_v33, %v1532_v34 }
 0x41a   : > { %1730 = vst [vmem:[#allocation3 + $0x19] sm:$0xff] %v1696_v62  ;;  %v1857_v61 = vpack.c.bf16 %v1696_v62, %v1695_v11 }
 0x41b   : > { %1728 = vst [vmem:[#allocation3 + $0x9] sm:$0xff] %v1694_v4  ;;  %v1856_v5 = vpack.c.bf16 %v1694_v4, %v1693_v8 }
 0x41d   : > { %v8668_v31 = vpop.f32.mrb[4].mxu1  ;;  %8710 = vmatprep.mubr.bf16.mxu0 %v1856_v5 }
 0x41e   : > { %v1699_v27 = vadd.f32 %v8668_v31, %v11074_v33  ;;  %v1545_v36 = vpop.f32.mrb[5].mxu1  ;;  %8711 = vmatmul.mubr.bf16.vlgmr.msra.gmra.mrb[32].mxu0 %v1857_v61 }
 0x41f   : > { %v1697_v9 = vadd.f32 %v11074_v33, %v1545_v36  ;;  %v8669_v10 = vpop.f32.mrb[6].mxu1  ;;  %8743 = vmatpush3.bf16.msra.mxu0 %v10020_v49 }
 0x420   : > { %1733 = vst [vmem:[#allocation3 + $0x31] sm:$0xff] %v1699_v27  ;;  %v1700_v18 = vadd.f32 %v8669_v10, %v11074_v33  ;;  %v1548_v23 = vpop.f32.mrb[7].mxu1  ;;  %8744 = vmatprep.subr.bf16.mxu0 %v10021_v57  ;;  %v11083_v24 = vld [vmem:[#allocation3] sm:$0xff] }
 0x421   : > { %1731 = vst [vmem:[#allocation3 + $0x21] sm:$0xff] %v1697_v9  ;;  %v1698_v17 = vadd.f32 %v11074_v33, %v1548_v23  ;;  %3762 = vst [vmem:[#allocation3] sm:$0x1] %v10492_v16 }
 0x422   : > { %1734 = vst [vmem:[#allocation3 + $0x39] sm:$0xff] %v1700_v18  ;;  %v1859_v25 = vpack.c.bf16 %v1700_v18, %v1699_v27 }
 0x423   : > { %1732 = vst [vmem:[#allocation3 + $0x29] sm:$0xff] %v1698_v17  ;;  %v1858_v41 = vpack.c.bf16 %v1698_v17, %v1697_v9  ;;  %8745 = vmatpush3.bf16.msra.mxu0 %v10021_v57 }
 0x424   : > { %8746 = vmatprep.subr.bf16.mxu0 %v10022_v20 }
 0x425   : > { %v8672_v42 = vpop.f32.mrb[8].mxu1  ;;  %8714 = vmatprep.mubr.bf16.mxu0 %v1858_v41 }
 0x426   : > { %v1703_v21 = vadd.f32 %v8672_v42, %v11074_v33  ;;  %v1561_v32 = vpop.f32.mrb[9].mxu1  ;;  %8715 = vmatmul.mubr.bf16.gmra.mrb[36].mxu0 %v1859_v25 }
 0x427   : > { %v1701_v58 = vadd.f32 %v11074_v33, %v1561_v32  ;;  %v8673_v43 = vpop.f32.mrb[10].mxu1  ;;  %8747 = vmatpush3.bf16.msra.mxu0 %v10022_v20 }
 0x428   : > { %1737 = vst [vmem:[#allocation3 + $0x51] sm:$0xff] %v1703_v21  ;;  %v1704_v37 = vadd.f32 %v8673_v43, %v11074_v33  ;;  %v1564_v38 = vpop.f32.mrb[11].mxu1  ;;  %8748 = vmatprep.subr.bf16.mxu0 %v10023_v30 }
 0x429   : > { %1735 = vst [vmem:[#allocation3 + $0x41] sm:$0xff] %v1701_v58  ;;  %v1702_v48 = vadd.f32 %v11074_v33, %v1564_v38 }
 0x42a   : > { %1738 = vst [vmem:[#allocation3 + $0x59] sm:$0xff] %v1704_v37  ;;  %v1861_v44 = vpack.c.bf16 %v1704_v37, %v1703_v21  ;;  %v1760_v37 = vld [vmem:[#allocation3 + $0x8] sm:$0xff] }
 0x42b   : > { %1736 = vst [vmem:[#allocation3 + $0x49] sm:$0xff] %v1702_v48  ;;  %v1860_v45 = vpack.c.bf16 %v1702_v48, %v1701_v58  ;;  %8749 = vmatpush3.bf16.msra.mxu0 %v10023_v30  ;;  %v10036_v48 = vld [vmem:[#allocation7 + $0x1c0] sm:$0xff]  }
 0x42c   : > { %8750 = vmatprep.subr.bf16.mxu0 %v10024_v39  ;;  %8838 = vmatprep.subr.bf16.mxu1 %v10036_v48 }
 0x42d   : > { %v8676_v22 = vpop.f32.mrb[12].mxu1  ;;  %8718 = vmatprep.mubr.bf16.mxu0 %v1860_v45  ;;  %v1761_v45 = vld [vmem:[#allocation3 + $0x10] sm:$0xff]  ;;  %8839 = vmatpush3.bf16.msra.mxu1 %v10036_v48 }
 0x42e   : > { %v1707_v47 = vadd.f32 %v8676_v22, %v11074_v33  ;;  %v1577_v51 = vpop.f32.mrb[13].mxu1  ;;  %8719 = vmatmul.mubr.bf16.gmra.mrb[40].mxu0 %v1861_v44  ;;  %v10037_v44 = vld [vmem:[#allocation7 + $0x1c8] sm:$0xff]   ;;  %v1764_v22 = vld [vmem:[#allocation3 + $0x28] sm:$0xff] }
 0x42f   : > { %v1705_v50 = vadd.f32 %v11074_v33, %v1577_v51  ;;  %v8677_v28 = vpop.f32.mrb[14].mxu1  ;;  %8751 = vmatpush3.bf16.msra.mxu0 %v10024_v39  ;;  %v1791_v39 = vpack.c.bf16 %v1760_v37, %v11083_v24  ;;  %8840 = vmatprep.subr.bf16.mxu1 %v10037_v44  ;;  %v1763_v51 = vld [vmem:[#allocation3 + $0x20] sm:$0xff]  ;;  %v2312_v37 = vld [vmem:[#allocation3 + $0x2a] sm:$0xff] }
 0x430   : > { %1741 = vst [vmem:[#allocation3 + $0x71] sm:$0xff] %v1707_v47  ;;  %v1708_v52 = vadd.f32 %v8677_v28, %v11074_v33  ;;  %v1580_v53 = vpop.f32.mrb[15].mxu1  ;;  %8752 = vmatprep.subr.bf16.mxu0 %v10025_v46  ;;  %v1793_v28 = vpack.c.bf16 %v1764_v22, %v1763_v51  ;;  %v10030_v24 = vld [vmem:[#allocation7 + $0x150] sm:$0xff]   ;;  %v2313_v22 = vld [vmem:[#allocation3 + $0x32] sm:$0xff] }
 0x431   : > { %1739 = vst [vmem:[#allocation3 + $0x61] sm:$0xff] %v1705_v50  ;;  %v1706_v60 = vadd.f32 %v11074_v33, %v1580_v53  ;;  %8841 = vmatpush3.bf16.msra.mxu1 %v10037_v44  ;;  %v1766_v53 = vld [vmem:[#allocation3 + $0x38] sm:$0xff] }
 0x432   : > { %1742 = vst [vmem:[#allocation3 + $0x79] sm:$0xff] %v1708_v52  ;;  %v1863_v0 = vpack.c.bf16 %v1708_v52, %v1707_v47  ;;  %v10038_v47 = vld [vmem:[#allocation7 + $0x1d0] sm:$0xff]   ;;  %v1765_v52 = vld [vmem:[#allocation3 + $0x30] sm:$0xff] }
 0x433   : > { %1740 = vst [vmem:[#allocation3 + $0x69] sm:$0xff] %v1706_v60  ;;  %v1862_v14 = vpack.c.bf16 %v1706_v60, %v1705_v50  ;;  %8753 = vmatpush3.bf16.msra.mxu0 %v10025_v46  ;;  %v1762_v46 = vld [vmem:[#allocation3 + $0x18] sm:$0xff]  ;;  %8842 = vmatprep.subr.bf16.mxu1 %v10038_v47  ;;  %v1794_v60 = vpack.c.bf16 %v1766_v53, %v1765_v52 }
 0x434   : > { %8754 = vmatprep.subr.bf16.mxu0 %v10026_v59  ;;  %v10029_v50 = vld [vmem:[#allocation7 + $0x148] sm:$0xff]   ;;  %v2314_v44 = vld [vmem:[#allocation3 + $0x3a] sm:$0xff] }
 0x435   : > { %v8680_v3 = vpop.f32.mrb[16].mxu1  ;;  %8722 = vmatprep.mubr.bf16.mxu0 %v1862_v14  ;;  %8843 = vmatpush3.bf16.msra.mxu1 %v10038_v47  ;;  %v10031_v14 = vld [vmem:[#allocation7 + $0x158] sm:$0xff]   ;;  %v2342_v47 = vpack.c.bf16 %v2314_v44, %v2313_v22 }
 0x436   : > { %v1711_v1 = vadd.f32 %v8680_v3, %v11074_v33  ;;  %v1593_v54 = vpop.f32.mrb[17].mxu1  ;;  %8723 = vmatmul.mubr.bf16.gmra.mrb[44].mxu0 %v1863_v0  ;;  %v1767_v0 = vld [vmem:[#allocation3 + $0x40] sm:$0xff]  ;;  %v10032_v3 = vld [vmem:[#allocation7 + $0x160] sm:$0xff]  }
 0x437   : > { %v1709_v63 = vadd.f32 %v11074_v33, %v1593_v54  ;;  %v8681_v2 = vpop.f32.mrb[18].mxu1  ;;  %8755 = vmatpush3.bf16.msra.mxu0 %v10026_v59  ;;  %v1768_v59 = vld [vmem:[#allocation3 + $0x48] sm:$0xff]  ;;  %v1770_v54 = vld [vmem:[#allocation3 + $0x58] sm:$0xff] }
 0x438   : > { %1745 = vst [vmem:[#allocation3 + $0x91] sm:$0xff] %v1711_v1  ;;  %v1712_v56 = vadd.f32 %v8681_v2, %v11074_v33  ;;  %v1596_v19 = vpop.f32.mrb[19].mxu1  ;;  %8756 = vmatprep.subr.bf16.mxu0 %v10027_v29  ;;  %v2318_v51 = vld [vmem:[#allocation3 + $0x5a] sm:$0xff] }
 0x439   : > { %1743 = vst [vmem:[#allocation3 + $0x81] sm:$0xff] %v1709_v63  ;;  %v1710_v55 = vadd.f32 %v11074_v33, %v1596_v19  ;;  %v10033_v19 = vld [vmem:[#allocation7 + $0x168] sm:$0xff]  }
 0x43a   : > { %1746 = vst [vmem:[#allocation3 + $0x99] sm:$0xff] %v1712_v56  ;;  %v1865_v6 = vpack.c.bf16 %v1712_v56, %v1711_v1  ;;  %v1769_v1 = vld [vmem:[#allocation3 + $0x50] sm:$0xff]  ;;  %v1771_v56 = vld [vmem:[#allocation3 + $0x60] sm:$0xff] }
 0x43b   : > { %1744 = vst [vmem:[#allocation3 + $0x89] sm:$0xff] %v1710_v55  ;;  %v1864_v13 = vpack.c.bf16 %v1710_v55, %v1709_v63  ;;  %8757 = vmatpush3.bf16.msra.mxu0 %v10027_v29  ;;  %v1795_v29 = vpack.c.bf16 %v1768_v59, %v1767_v0  ;;  %v1772_v63 = vld [vmem:[#allocation3 + $0x68] sm:$0xff]  ;;  %v1796_v2 = vpack.c.bf16 %v1770_v54, %v1769_v1  ;;  %v10034_v55 = vld [vmem:[#allocation7 + $0x170] sm:$0xff]   ;;  %v2321_v0 = vld [vmem:[#allocation3 + $0x72] sm:$0xff] }
 0x43c   : > { %8790 = vmatprep.subr.bf16.mxu0 %v11098_v12 }
 0x43d   : > { %v8684_v35 = vpop.f32.mrb[20].mxu1  ;;  %8726 = vmatprep.mubr.bf16.mxu0 %v1864_v13  ;;  %v1774_v13 = vld [vmem:[#allocation3 + $0x78] sm:$0xff] }
 0x43e   : > { %v1715_v15 = vadd.f32 %v8684_v35, %v11074_v33  ;;  %v1609_v49 = vpop.f32.mrb[21].mxu1  ;;  %8727 = vmatmul.mubr.bf16.gmra.mrb[48].mxu0 %v1865_v6  ;;  %v1773_v6 = vld [vmem:[#allocation3 + $0x70] sm:$0xff] }
 0x43f   : > { %v1713_v26 = vadd.f32 %v11074_v33, %v1609_v49  ;;  %v8685_v11 = vpop.f32.mrb[22].mxu1  ;;  %v10035_v49 = vld [vmem:[#allocation7 + $0x178] sm:$0xff]  }
 0x440   : > { %1749 = vst [vmem:[#allocation3 + $0xb1] sm:$0xff] %v1715_v15  ;;  %v1716_v40 = vadd.f32 %v8685_v11, %v11074_v33  ;;  %v1612_v8 = vpop.f32.mrb[23].mxu1  ;;  %v11105_v7 = vld [vmem:[#allocation3 + $0x80] sm:$0xff] }
 0x441   : > { %v11107_v62 = vld [vmem:[#allocation3 + $0x7a] sm:$0xff]  ;;  %1747 = vst [vmem:[#allocation3 + $0xa1] sm:$0xff] %v1713_v26  ;;  %v1714_v34 = vadd.f32 %v11074_v33, %v1612_v8 }
 0x442   : > { %3763 = vst [vmem:[#allocation3 + $0x81] sm:$0x1] %v10492_v16  ;;  %1750 = vst [vmem:[#allocation3 + $0xb9] sm:$0xff] %v1716_v40  ;;  %v1867_v4 = vpack.c.bf16 %v1716_v40, %v1715_v15  ;;  %v1776_v35 = vld [vmem:[#allocation3 + $0x88] sm:$0xff]  ;;  %v1798_v15 = vpack.c.bf16 %v1774_v13, %v1773_v6  ;;  %v1777_v11 = vld [vmem:[#allocation3 + $0x90] sm:$0xff] }
 0x443   : > { %1748 = vst [vmem:[#allocation3 + $0xa9] sm:$0xff] %v1714_v34  ;;  %v1866_v61 = vpack.c.bf16 %v1714_v34, %v1713_v26  ;;  %v1799_v26 = vpack.c.bf16 %v1776_v35, %v11105_v7  ;;  %v1778_v40 = vld [vmem:[#allocation3 + $0x98] sm:$0xff]  ;;  %v2323_v59 = vld [vmem:[#allocation3 + $0x82] sm:$0xff] }
 0x444   : > { %v1800_v34 = vpack.c.bf16 %v1778_v40, %v1777_v11 }
 0x445   : > { %v8688_v5 = vpop.f32.mrb[24].mxu1  ;;  %8730 = vmatprep.mubr.bf16.mxu0 %v1866_v61 }
 0x446   : > { %v1719_v57 = vadd.f32 %v8688_v5, %v11074_v33  ;;  %v1625_v31 = vpop.f32.mrb[25].mxu1  ;;  %8731 = vmatmul.mubr.bf16.gmra.mrb[52].mxu0 %v1867_v4 }
 0x447   : > { %v1717_v27 = vadd.f32 %v11074_v33, %v1625_v31  ;;  %v8689_v36 = vpop.f32.mrb[26].mxu1 }
 0x448   : > { %1753 = vst [vmem:[#allocation3 + $0xd1] sm:$0xff] %v1719_v57  ;;  %v1720_v9 = vadd.f32 %v8689_v36, %v11074_v33  ;;  %v1628_v10 = vpop.f32.mrb[27].mxu1  ;;  %v1779_v4 = vld [vmem:[#allocation3 + $0xa0] sm:$0xff] }
 0x449   : > { %1751 = vst [vmem:[#allocation3 + $0xc1] sm:$0xff] %v1717_v27  ;;  %v1718_v18 = vadd.f32 %v11074_v33, %v1628_v10  ;;  %v2329_v6 = vld [vmem:[#allocation3 + $0xb2] sm:$0xff] }
 0x44a   : > { %1754 = vst [vmem:[#allocation3 + $0xd9] sm:$0xff] %v1720_v9  ;;  %v1869_v23 = vpack.c.bf16 %v1720_v9, %v1719_v57  ;;  %v1780_v8 = vld [vmem:[#allocation3 + $0xa8] sm:$0xff]  ;;  %v1781_v5 = vld [vmem:[#allocation3 + $0xb0] sm:$0xff]  ;;  %v1782_v57 = vld [vmem:[#allocation3 + $0xb8] sm:$0xff] }
 0x44b   : > { %1752 = vst [vmem:[#allocation3 + $0xc9] sm:$0xff] %v1718_v18  ;;  %v1868_v20 = vpack.c.bf16 %v1718_v18, %v1717_v27  ;;  %v1801_v61 = vpack.c.bf16 %v1780_v8, %v1779_v4  ;;  %v1802_v27 = vpack.c.bf16 %v1782_v57, %v1781_v5  ;;  %v2327_v1 = vld [vmem:[#allocation3 + $0xa2] sm:$0xff]  ;;  %v2328_v54 = vld [vmem:[#allocation3 + $0xaa] sm:$0xff]  ;;  %v10041_v57 = vld [vmem:[#allocation7 + $0x1e8] sm:$0xff]  }
 0x44c   : > { %v10040_v5 = vld [vmem:[#allocation7 + $0x1e0] sm:$0xff]  }
 0x44d   : > { %v8692_v17 = vpop.f32.mrb[28].mxu1  ;;  %8734 = vmatprep.mubr.bf16.mxu0 %v1868_v20 }
 0x44e   : > { %v1723_v25 = vadd.f32 %v8692_v17, %v11074_v33  ;;  %v1641_v41 = vpop.f32.mrb[29].mxu1  ;;  %8735 = vmatmul.mubr.bf16.gmra.mrb[56].mxu0 %v1869_v23 }
 0x44f   : > { %v1721_v30 = vadd.f32 %v11074_v33, %v1641_v41  ;;  %v8693_v42 = vpop.f32.mrb[30].mxu1 }
 0x450   : > { %1757 = vst [vmem:[#allocation3 + $0xf1] sm:$0xff] %v1723_v25  ;;  %v1724_v21 = vadd.f32 %v8693_v42, %v11074_v33  ;;  %v1644_v32 = vpop.f32.mrb[31].mxu1  ;;  %v1783_v36 = vld [vmem:[#allocation3 + $0xc0] sm:$0xff]  ;;  %v2308_v42 = vld [vmem:[#allocation3 + $0xa] sm:$0xff] }
 0x451   : > { %1755 = vst [vmem:[#allocation3 + $0xe1] sm:$0xff] %v1721_v30  ;;  %v1722_v58 = vadd.f32 %v11074_v33, %v1644_v32  ;;  %v1792_v33 = vpack.c.bf16 %v1762_v46, %v1761_v45  ;;  %v1786_v10 = vld [vmem:[#allocation3 + $0xd8] sm:$0xff]  ;;  %v2315_v45 = vld [vmem:[#allocation3 + $0x42] sm:$0xff]  ;;  %v2316_v46 = vld [vmem:[#allocation3 + $0x4a] sm:$0xff] }
 0x452   : > { %1758 = vst [vmem:[#allocation3 + $0xf9] sm:$0xff] %v1724_v21  ;;  %v1871_v43 = vpack.c.bf16 %v1724_v21, %v1723_v25  ;;  %v1784_v31 = vld [vmem:[#allocation3 + $0xc8] sm:$0xff]  ;;  %v1785_v7 = vld [vmem:[#allocation3 + $0xd0] sm:$0xff] }
 0x453   : > { %1756 = vst [vmem:[#allocation3 + $0xe9] sm:$0xff] %v1722_v58  ;;  %v1870_v38 = vpack.c.bf16 %v1722_v58, %v1721_v30  ;;  %v1803_v9 = vpack.c.bf16 %v1784_v31, %v1783_v36  ;;  %v1804_v23 = vpack.c.bf16 %v1786_v10, %v1785_v7  ;;  %v2307_v30 = vld [vmem:[#allocation3 + $0x2] sm:$0xff]  ;;  %v2310_v58 = vld [vmem:[#allocation3 + $0x1a] sm:$0xff]  ;;  %v10044_v36 = vld [vmem:[#allocation7 + $0x180] sm:$0xff]  }
 0x454   : > { %v2339_v32 = vpack.c.bf16 %v2308_v42, %v2307_v30  ;;  %v10042_v31 = vld [vmem:[#allocation7 + $0x1f0] sm:$0xff]  }
 0x455   : > { %8738 = vmatprep.mubr.bf16.mxu0 %v1870_v38  ;;  %v2309_v38 = vld [vmem:[#allocation3 + $0x12] sm:$0xff] }
 0x456   : > { %8739 = vmatmul.mubr.bf16.gmra.mrb[60].mxu0 %v1871_v43  ;;  %v2311_v43 = vld [vmem:[#allocation3 + $0x22] sm:$0xff] }
 0x457   : > { %8758 = vmatprep.mubr.bf16.mxu0 %v1791_v39  ;;  %v2340_v39 = vpack.c.bf16 %v2310_v58, %v2309_v38  ;;  %v2341_v48 = vpack.c.bf16 %v2312_v37, %v2311_v43 }
 0x458   : > { %v1787_v20 = vld [vmem:[#allocation3 + $0xe0] sm:$0xff] }
 0x459   : > { %v1790_v41 = vld [vmem:[#allocation3 + $0xf8] sm:$0xff] }
 0x45a   : > { %v1788_v18 = vld [vmem:[#allocation3 + $0xe8] sm:$0xff]  ;;  %v1789_v25 = vld [vmem:[#allocation3 + $0xf0] sm:$0xff] }
 0x45b   : > { %v1805_v17 = vpack.c.bf16 %v1788_v18, %v1787_v20  ;;  %v1806_v21 = vpack.c.bf16 %v1790_v41, %v1789_v25  ;;  %v2337_v8 = vld [vmem:[#allocation3 + $0xf2] sm:$0xff] }
 0x45e   : > { %8759 = vmatmul.mubr.bf16.vlgmr.msra.gmra.mrb[32].mxu0 %v1792_v33  ;;  %v2343_v33 = vpack.c.bf16 %v2316_v46, %v2315_v45 }
 0x45f   : > { %8791 = vmatpush3.bf16.msra.mxu0 %v11098_v12  ;;  %8762 = vmatprep.mubr.bf16.mxu0 %v1793_v28  ;;  %v1797_v12 = vpack.c.bf16 %v1772_v63, %v1771_v56  ;;  %v2320_v28 = vld [vmem:[#allocation3 + $0x6a] sm:$0xff]  ;;  %v2325_v63 = vld [vmem:[#allocation3 + $0x92] sm:$0xff]  ;;  %v2349_v56 = vpack.c.bf16 %v2328_v54, %v2327_v1  ;;  %v10046_v54 = vld [vmem:[#allocation7 + $0x190] sm:$0xff]  }
 0x460   : > { %8792 = vmatprep.subr.bf16.mxu0 %v10029_v50 }
 0x463   : > { %8793 = vmatpush3.bf16.msra.mxu0 %v10029_v50  ;;  %v2319_v50 = vld [vmem:[#allocation3 + $0x62] sm:$0xff] }
 0x464   : > { %8794 = vmatprep.subr.bf16.mxu0 %v10030_v24  ;;  %v2345_v53 = vpack.c.bf16 %v2320_v28, %v2319_v50 }
 0x466   : > { %8763 = vmatmul.mubr.bf16.gmra.mrb[36].mxu0 %v1794_v60  ;;  %v2324_v60 = vld [vmem:[#allocation3 + $0x8a] sm:$0xff] }
 0x467   : > { %8766 = vmatprep.mubr.bf16.mxu0 %v1795_v29  ;;  %8795 = vmatpush3.bf16.msra.mxu0 %v10030_v24  ;;  %v2317_v24 = vld [vmem:[#allocation3 + $0x52] sm:$0xff]  ;;  %v2347_v29 = vpack.c.bf16 %v2324_v60, %v2323_v59 }
 0x468   : > { %8796 = vmatprep.subr.bf16.mxu0 %v10031_v14  ;;  %v2344_v52 = vpack.c.bf16 %v2318_v51, %v2317_v24  ;;  %v10045_v60 = vld [vmem:[#allocation7 + $0x188] sm:$0xff]  }
 0x46b   : > { %8797 = vmatpush3.bf16.msra.mxu0 %v10031_v14  ;;  %v2346_v14 = vpack.c.bf16 %v11107_v62, %v2321_v0  ;;  %v2334_v62 = vld [vmem:[#allocation3 + $0xda] sm:$0xff] }
 0x46c   : > { %8798 = vmatprep.subr.bf16.mxu0 %v10032_v3 }
 0x46e   : > { %8767 = vmatmul.mubr.bf16.gmra.mrb[40].mxu0 %v1796_v2 }
 0x46f   : > { %8770 = vmatprep.mubr.bf16.mxu0 %v1797_v12  ;;  %8799 = vmatpush3.bf16.msra.mxu0 %v10032_v3  ;;  %v2326_v3 = vld [vmem:[#allocation3 + $0x9a] sm:$0xff]  ;;  %v2331_v12 = vld [vmem:[#allocation3 + $0xc2] sm:$0xff] }
 0x470   : > { %8800 = vmatprep.subr.bf16.mxu0 %v10033_v19  ;;  %v2348_v2 = vpack.c.bf16 %v2326_v3, %v2325_v63 }
 0x473   : > { %8801 = vmatpush3.bf16.msra.mxu0 %v10033_v19  ;;  %v2330_v19 = vld [vmem:[#allocation3 + $0xba] sm:$0xff] }
 0x474   : > { %8802 = vmatprep.subr.bf16.mxu0 %v10034_v55  ;;  %v2350_v13 = vpack.c.bf16 %v2330_v19, %v2329_v6  ;;  %v10047_v6 = vld [vmem:[#allocation7 + $0x198] sm:$0xff]  }
 0x476   : > { %8771 = vmatmul.mubr.bf16.gmra.mrb[44].mxu0 %v1798_v15  ;;  %v2335_v15 = vld [vmem:[#allocation3 + $0xe2] sm:$0xff] }
 0x477   : > { %8774 = vmatprep.mubr.bf16.mxu0 %v1799_v26  ;;  %8803 = vmatpush3.bf16.msra.mxu0 %v10034_v55  ;;  %v2332_v55 = vld [vmem:[#allocation3 + $0xca] sm:$0xff]  ;;  %v2333_v26 = vld [vmem:[#allocation3 + $0xd2] sm:$0xff] }
 0x478   : > { %8804 = vmatprep.subr.bf16.mxu0 %v10035_v49  ;;  %v2351_v35 = vpack.c.bf16 %v2332_v55, %v2331_v12  ;;  %v2352_v11 = vpack.c.bf16 %v2334_v62, %v2333_v26  ;;  %v10048_v26 = vld [vmem:[#allocation7 + $0x1a0] sm:$0xff]  }
 0x47b   : > { %8805 = vmatpush3.bf16.msra.mxu0 %v10035_v49  ;;  %v2336_v49 = vld [vmem:[#allocation3 + $0xea] sm:$0xff] }
 0x47c   : > { %v2353_v40 = vpack.c.bf16 %v2336_v49, %v2335_v15 }
 0x47e   : > { %8775 = vmatmul.mubr.bf16.gmra.mrb[48].mxu0 %v1800_v34  ;;  %v2338_v34 = vld [vmem:[#allocation3 + $0xfa] sm:$0xff] }
 0x47f   : > { %8778 = vmatprep.mubr.bf16.mxu0 %v1801_v61  ;;  %v2354_v4 = vpack.c.bf16 %v2338_v34, %v2337_v8  ;;  %v10039_v61 = vld [vmem:[#allocation7 + $0x1d8] sm:$0xff]  }
 0x480   : > { %8844 = vmatprep.subr.bf16.mxu1 %v10039_v61 }
 0x481   : > { %8845 = vmatpush3.bf16.msra.mxu1 %v10039_v61 }
 0x482   : > { %8846 = vmatprep.subr.bf16.mxu1 %v10040_v5 }
 0x485   : > { %8847 = vmatpush3.bf16.msra.mxu1 %v10040_v5  ;;  %v10049_v5 = vld [vmem:[#allocation7 + $0x1a8] sm:$0xff]  }
 0x486   : > { %8779 = vmatmul.mubr.bf16.gmra.mrb[52].mxu0 %v1802_v27  ;;  %8848 = vmatprep.subr.bf16.mxu1 %v10041_v57  ;;  %v10043_v27 = vld [vmem:[#allocation7 + $0x1f8] sm:$0xff]  }
 0x487   : > { %8782 = vmatprep.mubr.bf16.mxu0 %v1803_v9  ;;  %v11123_v9 = vld [vmem:[#allocation9 + $0x2] ss:$0 sm:$0xff] }
 0x489   : > { %8849 = vmatpush3.bf16.msra.mxu1 %v10041_v57 }
 0x48a   : > { %8850 = vmatprep.subr.bf16.mxu1 %v10042_v31 }
 0x48d   : > { %8851 = vmatpush3.bf16.msra.mxu1 %v10042_v31 }
 0x48e   : > { %8783 = vmatmul.mubr.bf16.gmra.mrb[56].mxu0 %v1804_v23  ;;  %8852 = vmatprep.subr.bf16.mxu1 %v10043_v27 }
 0x48f   : > { %8786 = vmatprep.mubr.bf16.mxu0 %v1805_v17 }
 0x491   : > { %8853 = vmatpush3.bf16.msra.mxu1 %v10043_v27 }
 0x492   : > { %8870 = vmatprep.subr.bf16.mxu1 %v10044_v36 }
 0x496   : > { %8787 = vmatmul.mubr.bf16.gmra.mrb[60].mxu0 %v1806_v21 }
 0x497   : > { %8806 = vmatprep.mubr.bf16.mxu0 %v2339_v32 }
 0x49e   : > { %8807 = vmatmul.mubr.bf16.vlgmr.msra.gmra.mrb[32].mxu0 %v2340_v39 }
 0x49f   : > { %8810 = vmatprep.mubr.bf16.mxu0 %v2341_v48 }
 0x4a6   : > { %8811 = vmatmul.mubr.bf16.gmra.mrb[36].mxu0 %v2342_v47 }
 0x4a7   : > { %8814 = vmatprep.mubr.bf16.mxu0 %v2343_v33 }
 0x4ae   : > { %8815 = vmatmul.mubr.bf16.gmra.mrb[40].mxu0 %v2344_v52 }
 0x4af   : > { %8818 = vmatprep.mubr.bf16.mxu0 %v2345_v53 }
 0x4b6   : > { %8819 = vmatmul.mubr.bf16.gmra.mrb[44].mxu0 %v2346_v14 }
 0x4b7   : > { %8822 = vmatprep.mubr.bf16.mxu0 %v2347_v29 }
 0x4be   : > { %8823 = vmatmul.mubr.bf16.gmra.mrb[48].mxu0 %v2348_v2 }
 0x4bf   : > { %8826 = vmatprep.mubr.bf16.mxu0 %v2349_v56 }
 0x4c6   : > { %8827 = vmatmul.mubr.bf16.gmra.mrb[52].mxu0 %v2350_v13 }
 0x4c7   : > { %8830 = vmatprep.mubr.bf16.mxu0 %v2351_v35 }
 0x4ce   : > { %8831 = vmatmul.mubr.bf16.gmra.mrb[56].mxu0 %v2352_v11 }
 0x4cf   : > { %8834 = vmatprep.mubr.bf16.mxu0 %v2353_v40 }
 0x4d6   : > { %8835 = vmatmul.mubr.bf16.gmra.mrb[60].mxu0 %v2354_v4 }
 0x571   : > { %v8808_v7 = vpop.f32.mrb[32].mxu0 }
 0x572   : > { %v2620_v10 = vadd.f32 %v8808_v7, %v11123_v9  ;;  %v2454_v18 = vpop.f32.mrb[33].mxu0 }
 0x573   : > { %v2618_v23 = vadd.f32 %v11123_v9, %v2454_v18  ;;  %v8809_v20 = vpop.f32.mrb[34].mxu0 }
 0x574   : > { %2654 = vst [vmem:[#allocation2 + $0x12] sm:$0xff] %v2620_v10  ;;  %v2621_v17 = vadd.f32 %v8809_v20, %v11123_v9  ;;  %v2457_v25 = vpop.f32.mrb[35].mxu0  ;;  %v10050_v10 = vld [vmem:[#allocation7 + $0x1b0] sm:$0xff]  }
 0x575   : > { %2652 = vst [vmem:[#allocation2 + $0x2] sm:$0xff] %v2618_v23  ;;  %v2619_v41 = vadd.f32 %v11123_v9, %v2457_v25 }
 0x576   : > { %2655 = vst [vmem:[#allocation2 + $0x1a] sm:$0xff] %v2621_v17  ;;  %v10051_v17 = vld [vmem:[#allocation7 + $0x1b8] sm:$0xff]  }
 0x577   : > { %2653 = vst [vmem:[#allocation2 + $0xa] sm:$0xff] %v2619_v41 }
 0x579   : > { %v8812_v30 = vpop.f32.mrb[36].mxu0 }
 0x57a   : > { %v2624_v42 = vadd.f32 %v8812_v30, %v11123_v9  ;;  %v2470_v21 = vpop.f32.mrb[37].mxu0 }
 0x57b   : > { %v2622_v32 = vadd.f32 %v11123_v9, %v2470_v21  ;;  %v8813_v58 = vpop.f32.mrb[38].mxu0 }
 0x57c   : > { %2658 = vst [vmem:[#allocation2 + $0x32] sm:$0xff] %v2624_v42  ;;  %v2625_v43 = vadd.f32 %v8813_v58, %v11123_v9  ;;  %v2473_v37 = vpop.f32.mrb[39].mxu0 }
 0x57d   : > { %2656 = vst [vmem:[#allocation2 + $0x22] sm:$0xff] %v2622_v32  ;;  %v2623_v38 = vadd.f32 %v11123_v9, %v2473_v37 }
 0x57e   : > { %2659 = vst [vmem:[#allocation2 + $0x3a] sm:$0xff] %v2625_v43  ;;  %v2741_v39 = vld [vmem:[#allocation2 + $0x1] ss:$2 sm:$0xff]  ;;  %v2743_v48 = vld [vmem:[#allocation2 + $0x11] ss:$2 sm:$0xff] }
 0x57f   : > { %v11133_v44 = vld [vmem:[#allocation2] ss:$2 sm:$0xff]  ;;  %2657 = vst [vmem:[#allocation2 + $0x2a] sm:$0xff] %v2623_v38  ;;  %v2772_v45 = vpack.c.bf16 %v2743_v48, %v2741_v39 }
 0x580   : > { %4375 = vst [vmem:[#allocation2] sm:$0x3] %v10492_v16 }
 0x581   : > { %v8816_v46 = vpop.f32.mrb[40].mxu0  ;;  %8854 = vmatprep.mubr.bf16.mxu1 %v2772_v45  ;;  %v10052_v45 = vld [vmem:[#allocation7 + $0x200] sm:$0xff]  }
 0x582   : > { %v2628_v22 = vadd.f32 %v8816_v46, %v11123_v9  ;;  %v2486_v47 = vpop.f32.mrb[41].mxu0 }
 0x583   : > { %v2626_v33 = vadd.f32 %v11123_v9, %v2486_v47  ;;  %v8817_v51 = vpop.f32.mrb[42].mxu0 }
 0x584   : > { %2662 = vst [vmem:[#allocation2 + $0x52] sm:$0xff] %v2628_v22  ;;  %v2629_v50 = vadd.f32 %v8817_v51, %v11123_v9  ;;  %v2489_v28 = vpop.f32.mrb[43].mxu0 }
 0x585   : > { %2660 = vst [vmem:[#allocation2 + $0x42] sm:$0xff] %v2626_v33  ;;  %v2627_v24 = vadd.f32 %v11123_v9, %v2489_v28 }
 0x586   : > { %2663 = vst [vmem:[#allocation2 + $0x5a] sm:$0xff] %v2629_v50  ;;  %v2745_v52 = vld [vmem:[#allocation2 + $0x21] ss:$2 sm:$0xff]  ;;  %v2747_v53 = vld [vmem:[#allocation2 + $0x31] ss:$2 sm:$0xff] }
 0x587   : > { %2661 = vst [vmem:[#allocation2 + $0x4a] sm:$0xff] %v2627_v24  ;;  %v2773_v59 = vpack.c.bf16 %v2747_v53, %v2745_v52 }
 0x589   : > { %v8820_v0 = vpop.f32.mrb[44].mxu0  ;;  %8855 = vmatmul.mubr.bf16.vlgmr.msra.gmra.mrb[32].mxu1 %v2773_v59 }
 0x58a   : > { %v2632_v14 = vadd.f32 %v8820_v0, %v11123_v9  ;;  %v2502_v29 = vpop.f32.mrb[45].mxu0  ;;  %8871 = vmatpush3.bf16.msra.mxu1 %v10044_v36 }
 0x58b   : > { %v2630_v3 = vadd.f32 %v11123_v9, %v2502_v29  ;;  %v8821_v1 = vpop.f32.mrb[46].mxu0  ;;  %8872 = vmatprep.subr.bf16.mxu1 %v10045_v60 }
 0x58c   : > { %2666 = vst [vmem:[#allocation2 + $0x72] sm:$0xff] %v2632_v14  ;;  %v2633_v63 = vadd.f32 %v8821_v1, %v11123_v9  ;;  %v2505_v2 = vpop.f32.mrb[47].mxu0 }
 0x58d   : > { %2664 = vst [vmem:[#allocation2 + $0x62] sm:$0xff] %v2630_v3  ;;  %v2631_v56 = vadd.f32 %v11123_v9, %v2505_v2 }
 0x58e   : > { %2667 = vst [vmem:[#allocation2 + $0x7a] sm:$0xff] %v2633_v63  ;;  %v2749_v19 = vld [vmem:[#allocation2 + $0x41] ss:$2 sm:$0xff]  ;;  %v2751_v12 = vld [vmem:[#allocation2 + $0x51] ss:$2 sm:$0xff]  ;;  %8873 = vmatpush3.bf16.msra.mxu1 %v10045_v60 }
 0x58f   : > { %2665 = vst [vmem:[#allocation2 + $0x6a] sm:$0xff] %v2631_v56  ;;  %v2774_v55 = vpack.c.bf16 %v2751_v12, %v2749_v19  ;;  %8874 = vmatprep.subr.bf16.mxu1 %v10046_v54  ;;  %v10076_v12 = vld [vmem:[#allocation7 + $0x300] sm:$0xff]  }
 0x590   : > { %8998 = vmatprep.subr.bf16.mxu0 %v10076_v12 }
 0x591   : > { %v8824_v13 = vpop.f32.mrb[48].mxu0  ;;  %8858 = vmatprep.mubr.bf16.mxu1 %v2774_v55  ;;  %v10077_v55 = vld [vmem:[#allocation7 + $0x308] sm:$0xff]   ;;  %8999 = vmatpush3.bf16.msra.mxu0 %v10076_v12 }
 0x592   : > { %v2636_v35 = vadd.f32 %v8824_v13, %v11123_v9  ;;  %v2518_v62 = vpop.f32.mrb[49].mxu0  ;;  %8875 = vmatpush3.bf16.msra.mxu1 %v10046_v54  ;;  %v2686_v54 = vld [vmem:[#allocation2 + $0x10] ss:$2 sm:$0xff]  ;;  %9000 = vmatprep.subr.bf16.mxu0 %v10077_v55 }
 0x593   : > { %v2634_v15 = vadd.f32 %v11123_v9, %v2518_v62  ;;  %v8825_v49 = vpop.f32.mrb[50].mxu0  ;;  %8876 = vmatprep.subr.bf16.mxu1 %v10047_v6  ;;  %v2715_v19 = vpack.c.bf16 %v2686_v54, %v11133_v44  ;;  %v2690_v13 = vld [vmem:[#allocation2 + $0x30] ss:$2 sm:$0xff]  ;;  %v10078_v62 = vld [vmem:[#allocation7 + $0x310] sm:$0xff]  }
 0x594   : > { %2670 = vst [vmem:[#allocation2 + $0x92] sm:$0xff] %v2636_v35  ;;  %v2637_v11 = vadd.f32 %v8825_v49, %v11123_v9  ;;  %v2521_v40 = vpop.f32.mrb[51].mxu0  ;;  %v2694_v35 = vld [vmem:[#allocation2 + $0x50] ss:$2 sm:$0xff]  ;;  %v10054_v44 = vld [vmem:[#allocation7 + $0x210] sm:$0xff]  }
 0x595   : > { %2668 = vst [vmem:[#allocation2 + $0x82] sm:$0xff] %v2634_v15  ;;  %v2635_v8 = vadd.f32 %v11123_v9, %v2521_v40  ;;  %v10053_v49 = vld [vmem:[#allocation7 + $0x208] sm:$0xff]   ;;  %9001 = vmatpush3.bf16.msra.mxu0 %v10077_v55  ;;  %v3306_v55 = vld [vmem:[#allocation2 + $0x3] ss:$2 sm:$0xff] }
 0x596   : > { %2671 = vst [vmem:[#allocation2 + $0x9a] sm:$0xff] %v2637_v11  ;;  %v2753_v34 = vld [vmem:[#allocation2 + $0x61] ss:$2 sm:$0xff]  ;;  %v2755_v4 = vld [vmem:[#allocation2 + $0x71] ss:$2 sm:$0xff]  ;;  %8877 = vmatpush3.bf16.msra.mxu1 %v10047_v6  ;;  %9002 = vmatprep.subr.bf16.mxu0 %v10078_v62 }
 0x597   : > { %2669 = vst [vmem:[#allocation2 + $0x8a] sm:$0xff] %v2635_v8  ;;  %v2775_v61 = vpack.c.bf16 %v2755_v4, %v2753_v34  ;;  %8878 = vmatprep.subr.bf16.mxu1 %v10048_v26  ;;  %v2688_v6 = vld [vmem:[#allocation2 + $0x20] ss:$2 sm:$0xff]  ;;  %v2698_v8 = vld [vmem:[#allocation2 + $0x70] ss:$2 sm:$0xff] }
 0x598   : > { %v2716_v15 = vpack.c.bf16 %v2690_v13, %v2688_v6  ;;  %v10079_v11 = vld [vmem:[#allocation7 + $0x318] sm:$0xff]   ;;  %v10080_v4 = vld [vmem:[#allocation7 + $0x320] sm:$0xff]  }
 0x599   : > { %v8828_v57 = vpop.f32.mrb[52].mxu0  ;;  %8859 = vmatmul.mubr.bf16.gmra.mrb[36].mxu1 %v2775_v61  ;;  %v2696_v40 = vld [vmem:[#allocation2 + $0x60] ss:$2 sm:$0xff]  ;;  %9003 = vmatpush3.bf16.msra.mxu0 %v10078_v62  ;;  %v3308_v6 = vld [vmem:[#allocation2 + $0x13] ss:$2 sm:$0xff] }
 0x59a   : > { %v2640_v31 = vadd.f32 %v8828_v57, %v11123_v9  ;;  %v2534_v27 = vpop.f32.mrb[53].mxu0  ;;  %8879 = vmatpush3.bf16.msra.mxu1 %v10048_v26  ;;  %9004 = vmatprep.subr.bf16.mxu0 %v10079_v11  ;;  %v2718_v61 = vpack.c.bf16 %v2698_v8, %v2696_v40  ;;  %v10068_v62 = vld [vmem:[#allocation7 + $0x280] sm:$0xff]   ;;  %v10069_v40 = vld [vmem:[#allocation7 + $0x288] sm:$0xff]  }
 0x59b   : > { %v2638_v36 = vadd.f32 %v11123_v9, %v2534_v27  ;;  %v8829_v7 = vpop.f32.mrb[54].mxu0  ;;  %8880 = vmatprep.subr.bf16.mxu1 %v10049_v5  ;;  %v10056_v27 = vld [vmem:[#allocation7 + $0x220] sm:$0xff]  }
 0x59c   : > { %2674 = vst [vmem:[#allocation2 + $0xb2] sm:$0xff] %v2640_v31  ;;  %v2641_v18 = vadd.f32 %v8829_v7, %v11123_v9  ;;  %v2537_v23 = vpop.f32.mrb[55].mxu0  ;;  %v11152_v30 = vld [vmem:[#allocation2 + $0x74] ss:$2 sm:$0xff] }
 0x59d   : > { %2672 = vst [vmem:[#allocation2 + $0xa2] sm:$0xff] %v2638_v36  ;;  %v2639_v20 = vadd.f32 %v11123_v9, %v2537_v23  ;;  %9005 = vmatpush3.bf16.msra.mxu0 %v10079_v11  ;;  %v10081_v31 = vld [vmem:[#allocation7 + $0x328] sm:$0xff]  }
 0x59e   : > { %2675 = vst [vmem:[#allocation2 + $0xba] sm:$0xff] %v2641_v18  ;;  %v2757_v25 = vld [vmem:[#allocation2 + $0x81] ss:$2 sm:$0xff]  ;;  %v2759_v41 = vld [vmem:[#allocation2 + $0x91] ss:$2 sm:$0xff]  ;;  %8881 = vmatpush3.bf16.msra.mxu1 %v10049_v5  ;;  %9006 = vmatprep.subr.bf16.mxu0 %v10080_v4 }
 0x59f   : > { %2673 = vst [vmem:[#allocation2 + $0xaa] sm:$0xff] %v2639_v20  ;;  %v2776_v42 = vpack.c.bf16 %v2759_v41, %v2757_v25  ;;  %8882 = vmatprep.subr.bf16.mxu1 %v10050_v10  ;;  %v11154_v21 = vld [vmem:[#allocation2 + $0x80] ss:$2 sm:$0xff]  ;;  %v11158_v58 = vld [vmem:[#allocation2 + $0x83] ss:$2 sm:$0xff] }
 0x5a0   : > { %v11156_v32 = vld [vmem:[#allocation2 + $0x82] ss:$2 sm:$0xff]  ;;  %v10057_v20 = vld [vmem:[#allocation7 + $0x228] sm:$0xff]  }
 0x5a1   : > { %4376 = vst [vmem:[#allocation2 + $0x82] sm:$0x3] %v10492_v16  ;;  %v8832_v43 = vpop.f32.mrb[56].mxu0  ;;  %8862 = vmatprep.mubr.bf16.mxu1 %v2776_v42  ;;  %v2702_v34 = vld [vmem:[#allocation2 + $0x90] ss:$2 sm:$0xff]  ;;  %9007 = vmatpush3.bf16.msra.mxu0 %v10080_v4  ;;  %v10058_v25 = vld [vmem:[#allocation7 + $0x230] sm:$0xff]  }
 0x5a2   : > { %v2644_v37 = vadd.f32 %v8832_v43, %v11123_v9  ;;  %v2550_v38 = vpop.f32.mrb[57].mxu0  ;;  %8883 = vmatpush3.bf16.msra.mxu1 %v10050_v10  ;;  %v10055_v5 = vld [vmem:[#allocation7 + $0x218] sm:$0xff]   ;;  %v2719_v57 = vpack.c.bf16 %v2702_v34, %v11154_v21  ;;  %9008 = vmatprep.subr.bf16.mxu0 %v10081_v31  ;;  %v3090_v43 = vld [vmem:[#allocation2 + $0x12] ss:$2 sm:$0xff]  ;;  %v3316_v11 = vld [vmem:[#allocation2 + $0x53] ss:$2 sm:$0xff] }
 0x5a3   : > { %v2642_v39 = vadd.f32 %v11123_v9, %v2550_v38  ;;  %v8833_v48 = vpop.f32.mrb[58].mxu0  ;;  %8884 = vmatprep.subr.bf16.mxu1 %v10051_v17  ;;  %v3088_v21 = vld [vmem:[#allocation2 + $0x2] ss:$2 sm:$0xff]  ;;  %v3318_v4 = vld [vmem:[#allocation2 + $0x63] ss:$2 sm:$0xff] }
 0x5a4   : > { %2678 = vst [vmem:[#allocation2 + $0xd2] sm:$0xff] %v2644_v37  ;;  %v2645_v46 = vadd.f32 %v8833_v48, %v11123_v9  ;;  %v2553_v22 = vpop.f32.mrb[59].mxu0  ;;  %v10059_v38 = vld [vmem:[#allocation7 + $0x238] sm:$0xff]   ;;  %v10060_v48 = vld [vmem:[#allocation7 + $0x240] sm:$0xff]   ;;  %v10070_v34 = vld [vmem:[#allocation7 + $0x290] sm:$0xff]  }
 0x5a5   : > { %2676 = vst [vmem:[#allocation2 + $0xc2] sm:$0xff] %v2642_v39  ;;  %v2643_v47 = vadd.f32 %v11123_v9, %v2553_v22  ;;  %9009 = vmatpush3.bf16.msra.mxu0 %v10081_v31  ;;  %v3119_v39 = vpack.c.bf16 %v3090_v43, %v3088_v21  ;;  %v3096_v22 = vld [vmem:[#allocation2 + $0x42] ss:$2 sm:$0xff] }
 0x5a6   : > { %2679 = vst [vmem:[#allocation2 + $0xda] sm:$0xff] %v2645_v46  ;;  %v2761_v33 = vld [vmem:[#allocation2 + $0xa1] ss:$2 sm:$0xff]  ;;  %v2763_v51 = vld [vmem:[#allocation2 + $0xb1] ss:$2 sm:$0xff]  ;;  %8885 = vmatpush3.bf16.msra.mxu1 %v10051_v17 }
 0x5a7   : > { %2677 = vst [vmem:[#allocation2 + $0xca] sm:$0xff] %v2643_v47  ;;  %v2777_v50 = vpack.c.bf16 %v2763_v51, %v2761_v33  ;;  %8902 = vmatprep.subr.bf16.mxu1 %v10052_v45  ;;  %v2704_v36 = vld [vmem:[#allocation2 + $0xa0] ss:$2 sm:$0xff]  ;;  %v2706_v7 = vld [vmem:[#allocation2 + $0xb0] ss:$2 sm:$0xff] }
 0x5a8   : > { %v2720_v23 = vpack.c.bf16 %v2706_v7, %v2704_v36  ;;  %v3094_v46 = vld [vmem:[#allocation2 + $0x32] ss:$2 sm:$0xff]  ;;  %v10071_v31 = vld [vmem:[#allocation7 + $0x298] sm:$0xff]  }
 0x5a9   : > { %v8836_v28 = vpop.f32.mrb[60].mxu0  ;;  %8863 = vmatmul.mubr.bf16.gmra.mrb[40].mxu1 %v2777_v50  ;;  %v3098_v47 = vld [vmem:[#allocation2 + $0x52] ss:$2 sm:$0xff]  ;;  %v3326_v7 = vld [vmem:[#allocation2 + $0xa3] ss:$2 sm:$0xff] }
 0x5aa   : > { %v2648_v24 = vadd.f32 %v8836_v28, %v11123_v9  ;;  %v2566_v52 = vpop.f32.mrb[61].mxu0  ;;  %v10061_v51 = vld [vmem:[#allocation7 + $0x248] sm:$0xff]   ;;  %v3121_v50 = vpack.c.bf16 %v3098_v47, %v3096_v22  ;;  %v10062_v28 = vld [vmem:[#allocation7 + $0x250] sm:$0xff]   ;;  %v10072_v36 = vld [vmem:[#allocation7 + $0x2a0] sm:$0xff]  }
 0x5ab   : > { %v2646_v53 = vadd.f32 %v11123_v9, %v2566_v52  ;;  %v8837_v59 = vpop.f32.mrb[62].mxu0  ;;  %v3102_v52 = vld [vmem:[#allocation2 + $0x72] ss:$2 sm:$0xff] }
 0x5ac   : > { %2682 = vst [vmem:[#allocation2 + $0xf2] sm:$0xff] %v2648_v24  ;;  %v2649_v60 = vadd.f32 %v8837_v59, %v11123_v9  ;;  %v2569_v0 = vpop.f32.mrb[63].mxu0  ;;  %v3100_v24 = vld [vmem:[#allocation2 + $0x62] ss:$2 sm:$0xff] }
 0x5ad   : > { %2680 = vst [vmem:[#allocation2 + $0xe2] sm:$0xff] %v2646_v53  ;;  %v2647_v14 = vadd.f32 %v11123_v9, %v2569_v0  ;;  %v2692_v9 = vld [vmem:[#allocation2 + $0x40] ss:$2 sm:$0xff]  ;;  %v3122_v59 = vpack.c.bf16 %v3102_v52, %v3100_v24 }
 0x5ae   : > { %2683 = vst [vmem:[#allocation2 + $0xfa] sm:$0xff] %v2649_v60  ;;  %v2765_v29 = vld [vmem:[#allocation2 + $0xc1] ss:$2 sm:$0xff]  ;;  %v2767_v3 = vld [vmem:[#allocation2 + $0xd1] ss:$2 sm:$0xff]  ;;  %v2717_v26 = vpack.c.bf16 %v2694_v35, %v2692_v9  ;;  %v3337_v35 = vpack.c.bf16 %v3308_v6, %v3306_v55 }
 0x5af   : > { %2681 = vst [vmem:[#allocation2 + $0xea] sm:$0xff] %v2647_v14  ;;  %v2778_v1 = vpack.c.bf16 %v2767_v3, %v2765_v29  ;;  %v2708_v10 = vld [vmem:[#allocation2 + $0xc0] ss:$2 sm:$0xff]  ;;  %v2710_v18 = vld [vmem:[#allocation2 + $0xd0] ss:$2 sm:$0xff] }
 0x5b0   : > { %v2721_v17 = vpack.c.bf16 %v2710_v18, %v2708_v10  ;;  %v3106_v53 = vld [vmem:[#allocation2 + $0x92] ss:$2 sm:$0xff]  ;;  %v10063_v60 = vld [vmem:[#allocation7 + $0x258] sm:$0xff]   ;;  %v3328_v10 = vld [vmem:[#allocation2 + $0xb3] ss:$2 sm:$0xff] }
 0x5b1   : > { %8866 = vmatprep.mubr.bf16.mxu1 %v2778_v1  ;;  %v3123_v0 = vpack.c.bf16 %v3106_v53, %v11156_v32  ;;  %v10064_v14 = vld [vmem:[#allocation7 + $0x260] sm:$0xff]   ;;  %v3108_v29 = vld [vmem:[#allocation2 + $0xa2] ss:$2 sm:$0xff]  ;;  %v3330_v18 = vld [vmem:[#allocation2 + $0xc3] ss:$2 sm:$0xff] }
 0x5b2   : > { %v3110_v3 = vld [vmem:[#allocation2 + $0xb2] ss:$2 sm:$0xff]  ;;  %v3112_v1 = vld [vmem:[#allocation2 + $0xc2] ss:$2 sm:$0xff] }
 0x5b3   : > { %v3114_v54 = vld [vmem:[#allocation2 + $0xd2] ss:$2 sm:$0xff]  ;;  %v10067_v9 = vld [vmem:[#allocation7 + $0x278] sm:$0xff]  }
 0x5b4   : > { %v3526_v21 = vld [vmem:[#allocation2 + $0x14] ss:$2 sm:$0xff]  ;;  %v3532_v47 = vld [vmem:[#allocation2 + $0x44] ss:$2 sm:$0xff] }
 0x5b5   : > { %v3118_v12 = vld [vmem:[#allocation2 + $0xf2] ss:$2 sm:$0xff] }
 0x5b6   : > { %v2769_v63 = vld [vmem:[#allocation2 + $0xe1] ss:$2 sm:$0xff]  ;;  %v2771_v2 = vld [vmem:[#allocation2 + $0xf1] ss:$2 sm:$0xff]  ;;  %v2712_v41 = vld [vmem:[#allocation2 + $0xe0] ss:$2 sm:$0xff] }
 0x5b7   : > { %v2779_v56 = vpack.c.bf16 %v2771_v2, %v2769_v63  ;;  %v2714_v42 = vld [vmem:[#allocation2 + $0xf0] ss:$2 sm:$0xff]  ;;  %v3124_v63 = vpack.c.bf16 %v3110_v3, %v3108_v29 }
 0x5b8   : > { %v2722_v37 = vpack.c.bf16 %v2714_v42, %v2712_v41  ;;  %v10065_v2 = vld [vmem:[#allocation7 + $0x268] sm:$0xff]   ;;  %v3116_v32 = vld [vmem:[#allocation2 + $0xe2] ss:$2 sm:$0xff] }
 0x5b9   : > { %8867 = vmatmul.mubr.bf16.gmra.mrb[44].mxu1 %v2779_v56  ;;  %v3125_v56 = vpack.c.bf16 %v3114_v54, %v3112_v1  ;;  %v3126_v13 = vpack.c.bf16 %v3118_v12, %v3116_v32  ;;  %v10074_v41 = vld [vmem:[#allocation7 + $0x2b0] sm:$0xff]   ;;  %v3336_v42 = vld [vmem:[#allocation2 + $0xf3] ss:$2 sm:$0xff] }
 0x5ba   : > { %8886 = vmatprep.mubr.bf16.mxu1 %v2715_v19  ;;  %v10066_v19 = vld [vmem:[#allocation7 + $0x270] sm:$0xff]  }
 0x5bb   : > { %v3540_v24 = vld [vmem:[#allocation2 + $0x84] ss:$2 sm:$0xff]  ;;  %v3546_v53 = vld [vmem:[#allocation2 + $0xb4] ss:$2 sm:$0xff] }
 0x5bc   : > { %v3552_v3 = vld [vmem:[#allocation2 + $0xe4] ss:$2 sm:$0xff]  ;;  %v3554_v1 = vld [vmem:[#allocation2 + $0xf4] ss:$2 sm:$0xff] }
 0x5bd   : > { %v3562_v54 = vpack.c.bf16 %v3554_v1, %v3552_v3 }
 0x5c1   : > { %8887 = vmatmul.mubr.bf16.vlgmr.msra.gmra.mrb[32].mxu1 %v2716_v15  ;;  %v3310_v15 = vld [vmem:[#allocation2 + $0x23] ss:$2 sm:$0xff] }
 0x5c2   : > { %8903 = vmatpush3.bf16.msra.mxu1 %v10052_v45  ;;  %8890 = vmatprep.mubr.bf16.mxu1 %v2717_v26  ;;  %v3092_v45 = vld [vmem:[#allocation2 + $0x22] ss:$2 sm:$0xff]  ;;  %v3314_v26 = vld [vmem:[#allocation2 + $0x43] ss:$2 sm:$0xff] }
 0x5c3   : > { %8904 = vmatprep.subr.bf16.mxu1 %v10053_v49  ;;  %v3120_v33 = vpack.c.bf16 %v3094_v46, %v3092_v45  ;;  %v3339_v8 = vpack.c.bf16 %v3316_v11, %v3314_v26  ;;  %v3534_v45 = vld [vmem:[#allocation2 + $0x54] ss:$2 sm:$0xff]  ;;  %v3528_v46 = vld [vmem:[#allocation2 + $0x24] ss:$2 sm:$0xff] }
 0x5c6   : > { %8905 = vmatpush3.bf16.msra.mxu1 %v10053_v49  ;;  %v3312_v49 = vld [vmem:[#allocation2 + $0x33] ss:$2 sm:$0xff] }
 0x5c7   : > { %8906 = vmatprep.subr.bf16.mxu1 %v10054_v44 }
 0x5c9   : > { %8891 = vmatmul.mubr.bf16.gmra.mrb[36].mxu1 %v2718_v61  ;;  %v3320_v61 = vld [vmem:[#allocation2 + $0x73] ss:$2 sm:$0xff] }
 0x5ca   : > { %8907 = vmatpush3.bf16.msra.mxu1 %v10054_v44  ;;  %8894 = vmatprep.mubr.bf16.mxu1 %v2719_v57  ;;  %v3338_v44 = vpack.c.bf16 %v3312_v49, %v3310_v15  ;;  %v3340_v57 = vpack.c.bf16 %v3320_v61, %v3318_v4  ;;  %v10085_v49 = vld [vmem:[#allocation7 + $0x2c8] sm:$0xff]   ;;  %v10086_v61 = vld [vmem:[#allocation7 + $0x2d0] sm:$0xff]  }
 0x5cb   : > { %8908 = vmatprep.subr.bf16.mxu1 %v10055_v5 }
 0x5ce   : > { %8909 = vmatpush3.bf16.msra.mxu1 %v10055_v5  ;;  %v3324_v5 = vld [vmem:[#allocation2 + $0x93] ss:$2 sm:$0xff] }
 0x5cf   : > { %8910 = vmatprep.subr.bf16.mxu1 %v10056_v27 }
 0x5d1   : > { %8895 = vmatmul.mubr.bf16.gmra.mrb[40].mxu1 %v2720_v23  ;;  %v3332_v23 = vld [vmem:[#allocation2 + $0xd3] ss:$2 sm:$0xff] }
 0x5d2   : > { %8911 = vmatpush3.bf16.msra.mxu1 %v10056_v27  ;;  %8898 = vmatprep.mubr.bf16.mxu1 %v2721_v17  ;;  %v3341_v27 = vpack.c.bf16 %v3324_v5, %v11158_v58  ;;  %v10073_v17 = vld [vmem:[#allocation7 + $0x2a8] sm:$0xff]   ;;  %v3334_v58 = vld [vmem:[#allocation2 + $0xe3] ss:$2 sm:$0xff] }
 0x5d3   : > { %8912 = vmatprep.subr.bf16.mxu1 %v10057_v20  ;;  %v3344_v43 = vpack.c.bf16 %v3336_v42, %v3334_v58 }
 0x5d6   : > { %8913 = vmatpush3.bf16.msra.mxu1 %v10057_v20  ;;  %v3342_v20 = vpack.c.bf16 %v3328_v10, %v3326_v7 }
 0x5d7   : > { %8914 = vmatprep.subr.bf16.mxu1 %v10058_v25 }
 0x5d9   : > { %8899 = vmatmul.mubr.bf16.gmra.mrb[44].mxu1 %v2722_v37  ;;  %v3524_v37 = vld [vmem:[#allocation2 + $0x4] ss:$2 sm:$0xff] }
 0x5da   : > { %8915 = vmatpush3.bf16.msra.mxu1 %v10058_v25  ;;  %8918 = vmatprep.mubr.bf16.mxu1 %v3119_v39  ;;  %v3343_v25 = vpack.c.bf16 %v3332_v23, %v3330_v18  ;;  %v3555_v39 = vpack.c.bf16 %v3526_v21, %v3524_v37 }
 0x5db   : > { %8916 = vmatprep.subr.bf16.mxu1 %v10059_v38 }
 0x5de   : > { %8917 = vmatpush3.bf16.msra.mxu1 %v10059_v38  ;;  %v10075_v38 = vld [vmem:[#allocation7 + $0x2b8] sm:$0xff]  }
 0x5df   : > { %8934 = vmatprep.subr.bf16.mxu1 %v10060_v48 }
 0x5e1   : > { %8919 = vmatmul.mubr.bf16.vlgmr.msra.gmra.mrb[32].mxu1 %v3120_v33  ;;  %v3557_v33 = vpack.c.bf16 %v3534_v45, %v3532_v47  ;;  %v10090_v47 = vld [vmem:[#allocation7 + $0x2f0] sm:$0xff]  }
 0x5e2   : > { %8935 = vmatpush3.bf16.msra.mxu1 %v10060_v48  ;;  %8922 = vmatprep.mubr.bf16.mxu1 %v3121_v50  ;;  %v3530_v48 = vld [vmem:[#allocation2 + $0x34] ss:$2 sm:$0xff]  ;;  %v3536_v50 = vld [vmem:[#allocation2 + $0x64] ss:$2 sm:$0xff] }
 0x5e3   : > { %8936 = vmatprep.subr.bf16.mxu1 %v10061_v51  ;;  %v3556_v22 = vpack.c.bf16 %v3530_v48, %v3528_v46 }
 0x5e6   : > { %8937 = vmatpush3.bf16.msra.mxu1 %v10061_v51  ;;  %v3542_v51 = vld [vmem:[#allocation2 + $0x94] ss:$2 sm:$0xff] }
 0x5e7   : > { %8938 = vmatprep.subr.bf16.mxu1 %v10062_v28  ;;  %v3559_v52 = vpack.c.bf16 %v3542_v51, %v3540_v24 }
 0x5e9   : > { %8923 = vmatmul.mubr.bf16.gmra.mrb[36].mxu1 %v3122_v59  ;;  %v3550_v59 = vld [vmem:[#allocation2 + $0xd4] ss:$2 sm:$0xff] }
 0x5ea   : > { %8939 = vmatpush3.bf16.msra.mxu1 %v10062_v28  ;;  %8926 = vmatprep.mubr.bf16.mxu1 %v3123_v0  ;;  %v3558_v28 = vpack.c.bf16 %v11152_v30, %v3536_v50  ;;  %v10083_v30 = vld [vmem:[#allocation7 + $0x338] sm:$0xff]  }
 0x5eb   : > { %8940 = vmatprep.subr.bf16.mxu1 %v10063_v60 }
 0x5ee   : > { %8941 = vmatpush3.bf16.msra.mxu1 %v10063_v60  ;;  %v3544_v60 = vld [vmem:[#allocation2 + $0xa4] ss:$2 sm:$0xff] }
 0x5ef   : > { %8942 = vmatprep.subr.bf16.mxu1 %v10064_v14  ;;  %v3560_v0 = vpack.c.bf16 %v3546_v53, %v3544_v60  ;;  %v10091_v53 = vld [vmem:[#allocation7 + $0x2f8] sm:$0xff]   ;;  %v10092_v60 = vld [vmem:[#allocation7 + $0x340] sm:$0xff]  }
 0x5f1   : > { %8927 = vmatmul.mubr.bf16.gmra.mrb[40].mxu1 %v3124_v63  ;;  %v10082_v63 = vld [vmem:[#allocation7 + $0x330] sm:$0xff]  }
 0x5f2   : > { %8943 = vmatpush3.bf16.msra.mxu1 %v10064_v14  ;;  %8930 = vmatprep.mubr.bf16.mxu1 %v3125_v56  ;;  %v3548_v14 = vld [vmem:[#allocation2 + $0xc4] ss:$2 sm:$0xff]  ;;  %v11174_v56 = vld [vmem:[#allocation9 + $0x3] ss:$0 sm:$0xff] }
 0x5f3   : > { %8944 = vmatprep.subr.bf16.mxu1 %v10065_v2  ;;  %v3561_v29 = vpack.c.bf16 %v3550_v59, %v3548_v14  ;;  %9010 = vmatprep.subr.bf16.mxu0 %v10082_v63 }
 0x5f4   : > { %9011 = vmatpush3.bf16.msra.mxu0 %v10082_v63 }
 0x5f5   : > { %9012 = vmatprep.subr.bf16.mxu0 %v10083_v30 }
 0x5f6   : > { %8945 = vmatpush3.bf16.msra.mxu1 %v10065_v2  ;;  %v10084_v2 = vld [vmem:[#allocation7 + $0x2c0] sm:$0xff]  }
 0x5f7   : > { %8946 = vmatprep.subr.bf16.mxu1 %v10066_v19 }
 0x5f8   : > { %9013 = vmatpush3.bf16.msra.mxu0 %v10083_v30  ;;  %v10094_v30 = vld [vmem:[#allocation7 + $0x350] sm:$0xff]  }
 0x5f9   : > { %8931 = vmatmul.mubr.bf16.gmra.mrb[44].mxu1 %v3126_v13  ;;  %9030 = vmatprep.subr.bf16.mxu0 %v10084_v2 }
 0x5fa   : > { %8947 = vmatpush3.bf16.msra.mxu1 %v10066_v19  ;;  %8950 = vmatprep.mubr.bf16.mxu1 %v3337_v35 }
 0x5fb   : > { %8948 = vmatprep.subr.bf16.mxu1 %v10067_v9 }
 0x5fe   : > { %8949 = vmatpush3.bf16.msra.mxu1 %v10067_v9 }
 0x5ff   : > { %8966 = vmatprep.subr.bf16.mxu1 %v10068_v62 }
 0x601   : > { %8951 = vmatmul.mubr.bf16.vlgmr.msra.gmra.mrb[32].mxu1 %v3338_v44 }
 0x602   : > { %8967 = vmatpush3.bf16.msra.mxu1 %v10068_v62  ;;  %8954 = vmatprep.mubr.bf16.mxu1 %v3339_v8 }
 0x603   : > { %8968 = vmatprep.subr.bf16.mxu1 %v10069_v40 }
 0x606   : > { %8969 = vmatpush3.bf16.msra.mxu1 %v10069_v40 }
 0x607   : > { %8970 = vmatprep.subr.bf16.mxu1 %v10070_v34 }
 0x609   : > { %8955 = vmatmul.mubr.bf16.gmra.mrb[36].mxu1 %v3340_v57 }
 0x60a   : > { %8971 = vmatpush3.bf16.msra.mxu1 %v10070_v34  ;;  %8958 = vmatprep.mubr.bf16.mxu1 %v3341_v27 }
 0x60b   : > { %8972 = vmatprep.subr.bf16.mxu1 %v10071_v31 }
 0x60e   : > { %8973 = vmatpush3.bf16.msra.mxu1 %v10071_v31 }
 0x60f   : > { %8974 = vmatprep.subr.bf16.mxu1 %v10072_v36 }
 0x611   : > { %8959 = vmatmul.mubr.bf16.gmra.mrb[40].mxu1 %v3342_v20 }
 0x612   : > { %8975 = vmatpush3.bf16.msra.mxu1 %v10072_v36  ;;  %8962 = vmatprep.mubr.bf16.mxu1 %v3343_v25  ;;  %v10087_v36 = vld [vmem:[#allocation7 + $0x2d8] sm:$0xff]  }
 0x613   : > { %8976 = vmatprep.subr.bf16.mxu1 %v10073_v17 }
 0x616   : > { %8977 = vmatpush3.bf16.msra.mxu1 %v10073_v17 }
 0x617   : > { %8978 = vmatprep.subr.bf16.mxu1 %v10074_v41 }
 0x619   : > { %8963 = vmatmul.mubr.bf16.gmra.mrb[44].mxu1 %v3344_v43  ;;  %v10089_v43 = vld [vmem:[#allocation7 + $0x2e8] sm:$0xff]  }
 0x61a   : > { %8979 = vmatpush3.bf16.msra.mxu1 %v10074_v41  ;;  %8982 = vmatprep.mubr.bf16.mxu1 %v3555_v39  ;;  %v10088_v41 = vld [vmem:[#allocation7 + $0x2e0] sm:$0xff]  }
 0x61b   : > { %8980 = vmatprep.subr.bf16.mxu1 %v10075_v38 }
 0x61e   : > { %8981 = vmatpush3.bf16.msra.mxu1 %v10075_v38 }
 0x621   : > { %8983 = vmatmul.mubr.bf16.vlgmr.msra.gmra.mrb[32].mxu1 %v3556_v22 }
 0x622   : > { %8986 = vmatprep.mubr.bf16.mxu1 %v3557_v33 }
 0x629   : > { %8987 = vmatmul.mubr.bf16.gmra.mrb[36].mxu1 %v3558_v28 }
 0x62a   : > { %8990 = vmatprep.mubr.bf16.mxu1 %v3559_v52 }
 0x631   : > { %8991 = vmatmul.mubr.bf16.gmra.mrb[40].mxu1 %v3560_v0 }
 0x632   : > { %8994 = vmatprep.mubr.bf16.mxu1 %v3561_v29 }
 0x639   : > { %8995 = vmatmul.mubr.bf16.gmra.mrb[44].mxu1 %v3562_v54  ;;  %v10093_v54 = vld [vmem:[#allocation7 + $0x348] sm:$0xff]  }
 0x6f4   : > { %v8984_v19 = vpop.f32.mrb[32].mxu1 }
 0x6f5   : > { %v3748_v32 = vadd.f32 %v8984_v19, %v11174_v56  ;;  %v3662_v12 = vpop.f32.mrb[33].mxu1 }
 0x6f6   : > { %v3746_v55 = vadd.f32 %v11174_v56, %v3662_v12  ;;  %v8985_v6 = vpop.f32.mrb[34].mxu1  ;;  %v10095_v12 = vld [vmem:[#allocation7 + $0x358] sm:$0xff]  }
 0x6f7   : > { %3766 = vst [vmem:[#allocation3 + $0x11] sm:$0xff] %v3748_v32  ;;  %v3749_v13 = vadd.f32 %v8985_v6, %v11174_v56  ;;  %v3665_v9 = vpop.f32.mrb[35].mxu1  ;;  %v10096_v6 = vld [vmem:[#allocation7 + $0x360] sm:$0xff]  }
 0x6f8   : > { %3764 = vst [vmem:[#allocation3 + $0x1] sm:$0xff] %v3746_v55  ;;  %v3747_v35 = vadd.f32 %v11174_v56, %v3665_v9 }
 0x6f9   : > { %3767 = vst [vmem:[#allocation3 + $0x19] sm:$0xff] %v3749_v13  ;;  %v3838_v62 = vpack.c.bf16 %v3749_v13, %v3748_v32 }
 0x6fa   : > { %3765 = vst [vmem:[#allocation3 + $0x9] sm:$0xff] %v3747_v35  ;;  %v3837_v15 = vpack.c.bf16 %v3747_v35, %v3746_v55 }
 0x6fc   : > { %v8988_v26 = vpop.f32.mrb[36].mxu1  ;;  %9014 = vmatprep.mubr.bf16.mxu0 %v3837_v15 }
 0x6fd   : > { %v3752_v11 = vadd.f32 %v8988_v26, %v11174_v56  ;;  %v3678_v44 = vpop.f32.mrb[37].mxu1  ;;  %9015 = vmatmul.mubr.bf16.vlgmr.msra.gmra.mrb[64].mxu0 %v3838_v62 }
 0x6fe   : > { %v3750_v40 = vadd.f32 %v11174_v56, %v3678_v44  ;;  %v8989_v8 = vpop.f32.mrb[38].mxu1  ;;  %9031 = vmatpush3.bf16.msra.mxu0 %v10084_v2 }
 0x6ff   : > { %3770 = vst [vmem:[#allocation3 + $0x31] sm:$0xff] %v3752_v11  ;;  %v3753_v34 = vadd.f32 %v8989_v8, %v11174_v56  ;;  %v3681_v4 = vpop.f32.mrb[39].mxu1  ;;  %9032 = vmatprep.subr.bf16.mxu0 %v10085_v49  ;;  %v11183_v5 = vld [vmem:[#allocation3] sm:$0xff] }
 0x700   : > { %3768 = vst [vmem:[#allocation3 + $0x21] sm:$0xff] %v3750_v40  ;;  %v3751_v57 = vadd.f32 %v11174_v56, %v3681_v4  ;;  %5148 = vst [vmem:[#allocation3] sm:$0x1] %v10492_v16  ;;  %v3783_v14 = vld [vmem:[#allocation3 + $0x18] sm:$0xff] }
 0x701   : > { %3771 = vst [vmem:[#allocation3 + $0x39] sm:$0xff] %v3753_v34  ;;  %v3840_v31 = vpack.c.bf16 %v3753_v34, %v3752_v11  ;;  %v3781_v24 = vld [vmem:[#allocation3 + $0x8] sm:$0xff]  ;;  %v3782_v0 = vld [vmem:[#allocation3 + $0x10] sm:$0xff]  ;;  %v10098_v11 = vld [vmem:[#allocation7 + $0x370] sm:$0xff]  }
 0x702   : > { %3769 = vst [vmem:[#allocation3 + $0x29] sm:$0xff] %v3751_v57  ;;  %9033 = vmatpush3.bf16.msra.mxu0 %v10085_v49  ;;  %v3839_v27 = vpack.c.bf16 %v3751_v57, %v3750_v40  ;;  %v3796_v59 = vpack.c.bf16 %v3781_v24, %v11183_v5  ;;  %v3797_v3 = vpack.c.bf16 %v3783_v14, %v3782_v0  ;;  %v10097_v49 = vld [vmem:[#allocation7 + $0x368] sm:$0xff]   ;;  %v4152_v8 = vld [vmem:[#allocation3 + $0x2] sm:$0xff]  ;;  %v4153_v34 = vld [vmem:[#allocation3 + $0xa] sm:$0xff] }
 0x703   : > { %9034 = vmatprep.subr.bf16.mxu0 %v10086_v61  ;;  %v4168_v5 = vpack.c.bf16 %v4153_v34, %v4152_v8  ;;  %v10100_v57 = vld [vmem:[#allocation7 + $0x3c0] sm:$0xff]  }
 0x704   : > { %v8992_v7 = vpop.f32.mrb[40].mxu1  ;;  %9018 = vmatprep.mubr.bf16.mxu0 %v3839_v27  ;;  %v10108_v24 = vld [vmem:[#allocation7 + $0x380] sm:$0xff]  }
 0x705   : > { %v3756_v10 = vadd.f32 %v8992_v7, %v11174_v56  ;;  %v3694_v18 = vpop.f32.mrb[41].mxu1  ;;  %9019 = vmatmul.mubr.bf16.gmra.mrb[68].mxu0 %v3840_v31  ;;  %v4154_v7 = vld [vmem:[#allocation3 + $0x12] sm:$0xff] }
 0x706   : > { %v3754_v23 = vadd.f32 %v11174_v56, %v3694_v18  ;;  %v8993_v20 = vpop.f32.mrb[42].mxu1  ;;  %9035 = vmatpush3.bf16.msra.mxu0 %v10086_v61  ;;  %v10099_v61 = vld [vmem:[#allocation7 + $0x378] sm:$0xff]   ;;  %v10101_v18 = vld [vmem:[#allocation7 + $0x3c8] sm:$0xff]  }
 0x707   : > { %3774 = vst [vmem:[#allocation3 + $0x51] sm:$0xff] %v3756_v10  ;;  %v3757_v17 = vadd.f32 %v8993_v20, %v11174_v56  ;;  %v3697_v25 = vpop.f32.mrb[43].mxu1  ;;  %9036 = vmatprep.subr.bf16.mxu0 %v10087_v36  ;;  %v3784_v1 = vld [vmem:[#allocation3 + $0x20] sm:$0xff] }
 0x708   : > { %3772 = vst [vmem:[#allocation3 + $0x41] sm:$0xff] %v3754_v23  ;;  %v3755_v58 = vadd.f32 %v11174_v56, %v3697_v25  ;;  %v4155_v31 = vld [vmem:[#allocation3 + $0x1a] sm:$0xff] }
 0x709   : > { %3775 = vst [vmem:[#allocation3 + $0x59] sm:$0xff] %v3757_v17  ;;  %v3842_v42 = vpack.c.bf16 %v3757_v17, %v3756_v10  ;;  %v3785_v29 = vld [vmem:[#allocation3 + $0x28] sm:$0xff]  ;;  %v3786_v2 = vld [vmem:[#allocation3 + $0x30] sm:$0xff]  ;;  %v4169_v10 = vpack.c.bf16 %v4155_v31, %v4154_v7  ;;  %v10102_v20 = vld [vmem:[#allocation7 + $0x3d0] sm:$0xff]  }
 0x70a   : > { %3773 = vst [vmem:[#allocation3 + $0x49] sm:$0xff] %v3755_v58  ;;  %9037 = vmatpush3.bf16.msra.mxu0 %v10087_v36  ;;  %v3841_v21 = vpack.c.bf16 %v3755_v58, %v3754_v23  ;;  %v3798_v63 = vpack.c.bf16 %v3785_v29, %v3784_v1  ;;  %v4156_v27 = vld [vmem:[#allocation3 + $0x22] sm:$0xff]  ;;  %v4157_v36 = vld [vmem:[#allocation3 + $0x2a] sm:$0xff]  ;;  %v10110_v7 = vld [vmem:[#allocation7 + $0x390] sm:$0xff]  }
 0x70b   : > { %9038 = vmatprep.subr.bf16.mxu0 %v10088_v41  ;;  %v4170_v23 = vpack.c.bf16 %v4157_v36, %v4156_v27 }
 0x70c   : > { %v8996_v37 = vpop.f32.mrb[44].mxu1  ;;  %9022 = vmatprep.mubr.bf16.mxu0 %v3841_v21 }
 0x70d   : > { %v3760_v38 = vadd.f32 %v8996_v37, %v11174_v56  ;;  %v3710_v39 = vpop.f32.mrb[45].mxu1  ;;  %9023 = vmatmul.mubr.bf16.gmra.mrb[72].mxu0 %v3842_v42 }
 0x70e   : > { %v3758_v48 = vadd.f32 %v11174_v56, %v3710_v39  ;;  %v8997_v45 = vpop.f32.mrb[46].mxu1  ;;  %9039 = vmatpush3.bf16.msra.mxu0 %v10088_v41  ;;  %v4158_v41 = vld [vmem:[#allocation3 + $0x32] sm:$0xff] }
 0x70f   : > { %3778 = vst [vmem:[#allocation3 + $0x71] sm:$0xff] %v3760_v38  ;;  %v3761_v46 = vadd.f32 %v8997_v45, %v11174_v56  ;;  %v3713_v22 = vpop.f32.mrb[47].mxu1  ;;  %9040 = vmatprep.subr.bf16.mxu0 %v10089_v43  ;;  %v3788_v33 = vld [vmem:[#allocation3 + $0x40] sm:$0xff] }
 0x710   : > { %v11194_v51 = vld [vmem:[#allocation3 + $0x3a] sm:$0xff]  ;;  %3776 = vst [vmem:[#allocation3 + $0x61] sm:$0xff] %v3758_v48  ;;  %v3759_v50 = vadd.f32 %v11174_v56, %v3713_v22 }
 0x711   : > { %5149 = vst [vmem:[#allocation3 + $0x41] sm:$0x1] %v10492_v16  ;;  %3779 = vst [vmem:[#allocation3 + $0x79] sm:$0xff] %v3761_v46  ;;  %v3844_v28 = vpack.c.bf16 %v3761_v46, %v3760_v38  ;;  %v3787_v56 = vld [vmem:[#allocation3 + $0x38] sm:$0xff]  ;;  %v3789_v19 = vld [vmem:[#allocation3 + $0x48] sm:$0xff]  ;;  %v4171_v58 = vpack.c.bf16 %v11194_v51, %v4158_v41 }
 0x712   : > { %3777 = vst [vmem:[#allocation3 + $0x69] sm:$0xff] %v3759_v50  ;;  %9041 = vmatpush3.bf16.msra.mxu0 %v10089_v43  ;;  %v3843_v52 = vpack.c.bf16 %v3759_v50, %v3758_v48  ;;  %v3799_v32 = vpack.c.bf16 %v3787_v56, %v3786_v2  ;;  %v3800_v55 = vpack.c.bf16 %v3789_v19, %v3788_v33  ;;  %v3790_v13 = vld [vmem:[#allocation3 + $0x50] sm:$0xff]  ;;  %v3791_v9 = vld [vmem:[#allocation3 + $0x58] sm:$0xff]  ;;  %v4160_v17 = vld [vmem:[#allocation3 + $0x42] sm:$0xff] }
 0x713   : > { %9042 = vmatprep.subr.bf16.mxu0 %v10090_v47  ;;  %v3801_v62 = vpack.c.bf16 %v3791_v9, %v3790_v13  ;;  %v4161_v25 = vld [vmem:[#allocation3 + $0x4a] sm:$0xff]  ;;  %v4162_v38 = vld [vmem:[#allocation3 + $0x52] sm:$0xff]  ;;  %v10106_v50 = vld [vmem:[#allocation7 + $0x3f0] sm:$0xff]  }
 0x714   : > { %9026 = vmatprep.mubr.bf16.mxu0 %v3843_v52  ;;  %v4172_v42 = vpack.c.bf16 %v4161_v25, %v4160_v17  ;;  %v10104_v33 = vld [vmem:[#allocation7 + $0x3e0] sm:$0xff]   ;;  %v10105_v51 = vld [vmem:[#allocation7 + $0x3e8] sm:$0xff]  }
 0x715   : > { %9027 = vmatmul.mubr.bf16.gmra.mrb[76].mxu0 %v3844_v28  ;;  %v10107_v28 = vld [vmem:[#allocation7 + $0x3f8] sm:$0xff]   ;;  %v7773_v52 = vld [vmem:[#allocation9 + $0x4] ss:$0 sm:$0xff] }
 0x716   : > { %9043 = vmatpush3.bf16.msra.mxu0 %v10090_v47  ;;  %9046 = vmatprep.mubr.bf16.mxu0 %v3796_v59  ;;  %v10103_v47 = vld [vmem:[#allocation7 + $0x3d8] sm:$0xff]  }
 0x717   : > { %9044 = vmatprep.subr.bf16.mxu0 %v10091_v53  ;;  %v3792_v15 = vld [vmem:[#allocation3 + $0x60] sm:$0xff] }
 0x718   : > { %v3795_v40 = vld [vmem:[#allocation3 + $0x78] sm:$0xff] }
 0x719   : > { %v3793_v35 = vld [vmem:[#allocation3 + $0x68] sm:$0xff]  ;;  %v3794_v44 = vld [vmem:[#allocation3 + $0x70] sm:$0xff]  ;;  %v4163_v21 = vld [vmem:[#allocation3 + $0x5a] sm:$0xff] }
 0x71a   : > { %9045 = vmatpush3.bf16.msra.mxu0 %v10091_v53  ;;  %v3802_v26 = vpack.c.bf16 %v3793_v35, %v3792_v15  ;;  %v3803_v4 = vpack.c.bf16 %v3795_v40, %v3794_v44  ;;  %v4164_v43 = vld [vmem:[#allocation3 + $0x62] sm:$0xff]  ;;  %v4165_v37 = vld [vmem:[#allocation3 + $0x6a] sm:$0xff]  ;;  %v4173_v39 = vpack.c.bf16 %v4163_v21, %v4162_v38  ;;  %v4166_v45 = vld [vmem:[#allocation3 + $0x72] sm:$0xff] }
 0x71b   : > { %9062 = vmatprep.subr.bf16.mxu0 %v10092_v60  ;;  %v4174_v48 = vpack.c.bf16 %v4165_v37, %v4164_v43  ;;  %v4167_v46 = vld [vmem:[#allocation3 + $0x7a] sm:$0xff]  ;;  %v10140_v37 = vld [vmem:[#allocation7 + $0x500] sm:$0xff]   ;;  %v10141_v38 = vld [vmem:[#allocation7 + $0x508] sm:$0xff]  }
 0x71c   : > { %v4175_v22 = vpack.c.bf16 %v4167_v46, %v4166_v45  ;;  %9214 = vmatprep.subr.bf16.mxu1 %v10140_v37  ;;  %v10142_v45 = vld [vmem:[#allocation7 + $0x510] sm:$0xff]  }
 0x71d   : > { %9047 = vmatmul.mubr.bf16.vlgmr.msra.gmra.mrb[64].mxu0 %v3797_v3  ;;  %9215 = vmatpush3.bf16.msra.mxu1 %v10140_v37 }
 0x71e   : > { %9063 = vmatpush3.bf16.msra.mxu0 %v10092_v60  ;;  %9050 = vmatprep.mubr.bf16.mxu0 %v3798_v63 }
 0x71f   : > { %9064 = vmatprep.subr.bf16.mxu0 %v10093_v54  ;;  %9216 = vmatprep.subr.bf16.mxu1 %v10141_v38 }
 0x721   : > { %9217 = vmatpush3.bf16.msra.mxu1 %v10141_v38 }
 0x722   : > { %9065 = vmatpush3.bf16.msra.mxu0 %v10093_v54  ;;  %9218 = vmatprep.subr.bf16.mxu1 %v10142_v45 }
 0x723   : > { %9066 = vmatprep.subr.bf16.mxu0 %v10094_v30 }
 0x725   : > { %9051 = vmatmul.mubr.bf16.gmra.mrb[68].mxu0 %v3799_v32  ;;  %9219 = vmatpush3.bf16.msra.mxu1 %v10142_v45 }
 0x726   : > { %9067 = vmatpush3.bf16.msra.mxu0 %v10094_v30  ;;  %9054 = vmatprep.mubr.bf16.mxu0 %v3800_v55 }
 0x727   : > { %9068 = vmatprep.subr.bf16.mxu0 %v10095_v12 }
 0x72a   : > { %9069 = vmatpush3.bf16.msra.mxu0 %v10095_v12 }
 0x72b   : > { %9070 = vmatprep.subr.bf16.mxu0 %v10096_v6 }
 0x72d   : > { %9055 = vmatmul.mubr.bf16.gmra.mrb[72].mxu0 %v3801_v62 }
 0x72e   : > { %9071 = vmatpush3.bf16.msra.mxu0 %v10096_v6  ;;  %9058 = vmatprep.mubr.bf16.mxu0 %v3802_v26 }
 0x72f   : > { %9072 = vmatprep.subr.bf16.mxu0 %v10097_v49 }
 0x732   : > { %9073 = vmatpush3.bf16.msra.mxu0 %v10097_v49 }
 0x733   : > { %9074 = vmatprep.subr.bf16.mxu0 %v10098_v11 }
 0x735   : > { %9059 = vmatmul.mubr.bf16.gmra.mrb[76].mxu0 %v3803_v4 }
 0x736   : > { %9075 = vmatpush3.bf16.msra.mxu0 %v10098_v11  ;;  %9078 = vmatprep.mubr.bf16.mxu0 %v4168_v5 }
 0x737   : > { %9076 = vmatprep.subr.bf16.mxu0 %v10099_v61 }
 0x73a   : > { %9077 = vmatpush3.bf16.msra.mxu0 %v10099_v61  ;;  %v10109_v61 = vld [vmem:[#allocation7 + $0x388] sm:$0xff]  }
 0x73b   : > { %9094 = vmatprep.subr.bf16.mxu0 %v10100_v57 }
 0x73d   : > { %9079 = vmatmul.mubr.bf16.vlgmr.msra.gmra.mrb[64].mxu0 %v4169_v10 }
 0x73e   : > { %9082 = vmatprep.mubr.bf16.mxu0 %v4170_v23  ;;  %9095 = vmatpush3.bf16.msra.mxu0 %v10100_v57 }
 0x73f   : > { %9096 = vmatprep.subr.bf16.mxu0 %v10101_v18 }
 0x742   : > { %9097 = vmatpush3.bf16.msra.mxu0 %v10101_v18 }
 0x743   : > { %9098 = vmatprep.subr.bf16.mxu0 %v10102_v20 }
 0x745   : > { %9083 = vmatmul.mubr.bf16.gmra.mrb[68].mxu0 %v4171_v58 }
 0x746   : > { %9086 = vmatprep.mubr.bf16.mxu0 %v4172_v42  ;;  %9099 = vmatpush3.bf16.msra.mxu0 %v10102_v20  ;;  %v10111_v20 = vld [vmem:[#allocation7 + $0x398] sm:$0xff]  }
 0x747   : > { %9100 = vmatprep.subr.bf16.mxu0 %v10103_v47 }
 0x74a   : > { %9101 = vmatpush3.bf16.msra.mxu0 %v10103_v47 }
 0x74b   : > { %9102 = vmatprep.subr.bf16.mxu0 %v10104_v33 }
 0x74d   : > { %9087 = vmatmul.mubr.bf16.gmra.mrb[72].mxu0 %v4173_v39  ;;  %v10112_v39 = vld [vmem:[#allocation7 + $0x3a0] sm:$0xff]  }
 0x74e   : > { %9090 = vmatprep.mubr.bf16.mxu0 %v4174_v48  ;;  %9103 = vmatpush3.bf16.msra.mxu0 %v10104_v33  ;;  %v10113_v33 = vld [vmem:[#allocation7 + $0x3a8] sm:$0xff]  }
 0x74f   : > { %9104 = vmatprep.subr.bf16.mxu0 %v10105_v51 }
 0x752   : > { %9105 = vmatpush3.bf16.msra.mxu0 %v10105_v51 }
 0x753   : > { %9106 = vmatprep.subr.bf16.mxu0 %v10106_v50 }
 0x755   : > { %9091 = vmatmul.mubr.bf16.gmra.mrb[76].mxu0 %v4175_v22 }
 0x756   : > { %9107 = vmatpush3.bf16.msra.mxu0 %v10106_v50  ;;  %v10143_v50 = vld [vmem:[#allocation7 + $0x518] sm:$0xff]  }
 0x757   : > { %9108 = vmatprep.subr.bf16.mxu0 %v10107_v28  ;;  %9220 = vmatprep.subr.bf16.mxu1 %v10143_v50 }
 0x758   : > { %9221 = vmatpush3.bf16.msra.mxu1 %v10143_v50 }
 0x75a   : > { %9109 = vmatpush3.bf16.msra.mxu0 %v10107_v28  ;;  %v10114_v28 = vld [vmem:[#allocation7 + $0x3b0] sm:$0xff]  }
 0x75b   : > { %9118 = vmatprep.subr.bf16.mxu0 %v10108_v24 }
 0x810   : > { %v9080_v53 = vpop.f32.mrb[64].mxu0 }
 0x811   : > { %v4361_v59 = vadd.f32 %v9080_v53, %v7773_v52  ;;  %v4275_v60 = vpop.f32.mrb[65].mxu0 }
 0x812   : > { %v4359_v0 = vadd.f32 %v7773_v52, %v4275_v60  ;;  %v9081_v14 = vpop.f32.mrb[66].mxu0 }
 0x813   : > { %4379 = vst [vmem:[#allocation2 + $0x12] sm:$0xff] %v4361_v59  ;;  %v4362_v29 = vadd.f32 %v9081_v14, %v7773_v52  ;;  %v4278_v3 = vpop.f32.mrb[67].mxu0  ;;  %v10117_v14 = vld [vmem:[#allocation7 + $0x408] sm:$0xff]  }
 0x814   : > { %4377 = vst [vmem:[#allocation2 + $0x2] sm:$0xff] %v4359_v0  ;;  %v4360_v1 = vadd.f32 %v7773_v52, %v4278_v3  ;;  %v10118_v3 = vld [vmem:[#allocation7 + $0x410] sm:$0xff]  }
 0x815   : > { %4380 = vst [vmem:[#allocation2 + $0x1a] sm:$0xff] %v4362_v29 }
 0x816   : > { %4378 = vst [vmem:[#allocation2 + $0xa] sm:$0xff] %v4360_v1 }
 0x818   : > { %v9084_v54 = vpop.f32.mrb[68].mxu0 }
 0x819   : > { %v4365_v63 = vadd.f32 %v9084_v54, %v7773_v52  ;;  %v4291_v30 = vpop.f32.mrb[69].mxu0 }
 0x81a   : > { %v4363_v2 = vadd.f32 %v7773_v52, %v4291_v30  ;;  %v9085_v56 = vpop.f32.mrb[70].mxu0 }
 0x81b   : > { %4383 = vst [vmem:[#allocation2 + $0x32] sm:$0xff] %v4365_v63  ;;  %v4366_v19 = vadd.f32 %v9085_v56, %v7773_v52  ;;  %v4294_v32 = vpop.f32.mrb[71].mxu0  ;;  %v10119_v56 = vld [vmem:[#allocation7 + $0x418] sm:$0xff]  }
 0x81c   : > { %4381 = vst [vmem:[#allocation2 + $0x22] sm:$0xff] %v4363_v2  ;;  %v4364_v12 = vadd.f32 %v7773_v52, %v4294_v32  ;;  %v4678_v30 = vld [vmem:[#allocation2 + $0x12] ss:$2 sm:$0xff] }
 0x81d   : > { %4384 = vst [vmem:[#allocation2 + $0x3a] sm:$0xff] %v4366_v19  ;;  %v4422_v55 = vld [vmem:[#allocation2 + $0x1] ss:$2 sm:$0xff]  ;;  %v4423_v6 = vld [vmem:[#allocation2 + $0x11] ss:$2 sm:$0xff] }
 0x81e   : > { %v11200_v13 = vld [vmem:[#allocation2] ss:$2 sm:$0xff]  ;;  %4382 = vst [vmem:[#allocation2 + $0x2a] sm:$0xff] %v4364_v12  ;;  %v4430_v9 = vpack.c.bf16 %v4423_v6, %v4422_v55  ;;  %v4394_v48 = vld [vmem:[#allocation2 + $0x10] ss:$2 sm:$0xff] }
 0x81f   : > { %5605 = vst [vmem:[#allocation2] sm:$0x3] %v10492_v16  ;;  %v4401_v51 = vpack.c.bf16 %v4394_v48, %v11200_v13  ;;  %v4677_v63 = vld [vmem:[#allocation2 + $0x2] ss:$2 sm:$0xff]  ;;  %v10120_v32 = vld [vmem:[#allocation7 + $0x420] sm:$0xff]   ;;  %v10121_v12 = vld [vmem:[#allocation7 + $0x428] sm:$0xff]  }
 0x820   : > { %v9088_v35 = vpop.f32.mrb[72].mxu0  ;;  %9110 = vmatprep.mubr.bf16.mxu0 %v4430_v9  ;;  %v4685_v19 = vpack.c.bf16 %v4678_v30, %v4677_v63  ;;  %v10122_v55 = vld [vmem:[#allocation7 + $0x430] sm:$0xff]   ;;  %v10123_v6 = vld [vmem:[#allocation7 + $0x438] sm:$0xff]   ;;  %v10124_v13 = vld [vmem:[#allocation7 + $0x440] sm:$0xff]  }
 0x821   : > { %v4369_v62 = vadd.f32 %v9088_v35, %v7773_v52  ;;  %v4307_v15 = vpop.f32.mrb[73].mxu0  ;;  %v10135_v48 = vld [vmem:[#allocation7 + $0x498] sm:$0xff]  }
 0x822   : > { %v4367_v49 = vadd.f32 %v7773_v52, %v4307_v15  ;;  %v9089_v26 = vpop.f32.mrb[74].mxu0 }
 0x823   : > { %4387 = vst [vmem:[#allocation2 + $0x52] sm:$0xff] %v4369_v62  ;;  %v4370_v11 = vadd.f32 %v9089_v26, %v7773_v52  ;;  %v4310_v44 = vpop.f32.mrb[75].mxu0  ;;  %v4980_v37 = vld [vmem:[#allocation2 + $0x14] ss:$2 sm:$0xff] }
 0x824   : > { %4385 = vst [vmem:[#allocation2 + $0x42] sm:$0xff] %v4367_v49  ;;  %v4368_v40 = vadd.f32 %v7773_v52, %v4310_v44  ;;  %v4680_v35 = vld [vmem:[#allocation2 + $0x32] ss:$2 sm:$0xff] }
 0x825   : > { %4388 = vst [vmem:[#allocation2 + $0x5a] sm:$0xff] %v4370_v11  ;;  %v4424_v8 = vld [vmem:[#allocation2 + $0x21] ss:$2 sm:$0xff]  ;;  %v4425_v34 = vld [vmem:[#allocation2 + $0x31] ss:$2 sm:$0xff] }
 0x826   : > { %4386 = vst [vmem:[#allocation2 + $0x4a] sm:$0xff] %v4368_v40  ;;  %v4431_v4 = vpack.c.bf16 %v4425_v34, %v4424_v8  ;;  %v4395_v53 = vld [vmem:[#allocation2 + $0x20] ss:$2 sm:$0xff]  ;;  %v4396_v59 = vld [vmem:[#allocation2 + $0x30] ss:$2 sm:$0xff] }
 0x827   : > { %v4402_v0 = vpack.c.bf16 %v4396_v59, %v4395_v53  ;;  %v4679_v9 = vld [vmem:[#allocation2 + $0x22] ss:$2 sm:$0xff]  ;;  %v10125_v49 = vld [vmem:[#allocation7 + $0x448] sm:$0xff]   ;;  %v4827_v8 = vld [vmem:[#allocation2 + $0x3] ss:$2 sm:$0xff] }
 0x828   : > { %v9092_v5 = vpop.f32.mrb[76].mxu0  ;;  %9111 = vmatmul.mubr.bf16.vlgmr.msra.gmra.mrb[80].mxu0 %v4431_v4  ;;  %v4686_v15 = vpack.c.bf16 %v4680_v35, %v4679_v9  ;;  %v10126_v11 = vld [vmem:[#allocation7 + $0x450] sm:$0xff]   ;;  %v4828_v34 = vld [vmem:[#allocation2 + $0x13] ss:$2 sm:$0xff] }
 0x829   : > { %v4373_v57 = vadd.f32 %v9092_v5, %v7773_v52  ;;  %9119 = vmatpush3.bf16.msra.mxu0 %v10108_v24  ;;  %v4323_v31 = vpop.f32.mrb[77].mxu0  ;;  %v10115_v24 = vld [vmem:[#allocation7 + $0x3b8] sm:$0xff]   ;;  %v4835_v5 = vpack.c.bf16 %v4828_v34, %v4827_v8 }
 0x82a   : > { %v4371_v27 = vadd.f32 %v7773_v52, %v4323_v31  ;;  %v9093_v36 = vpop.f32.mrb[78].mxu0  ;;  %9120 = vmatprep.subr.bf16.mxu0 %v10109_v61  ;;  %v10129_v31 = vld [vmem:[#allocation7 + $0x468] sm:$0xff]  }
 0x82b   : > { %4391 = vst [vmem:[#allocation2 + $0x72] sm:$0xff] %v4373_v57  ;;  %v4374_v10 = vadd.f32 %v9093_v36, %v7773_v52  ;;  %v4326_v18 = vpop.f32.mrb[79].mxu0  ;;  %v11203_v41 = vld [vmem:[#allocation2 + $0x34] ss:$2 sm:$0xff]  ;;  %v10131_v36 = vld [vmem:[#allocation7 + $0x478] sm:$0xff]  }
 0x82c   : > { %4389 = vst [vmem:[#allocation2 + $0x62] sm:$0xff] %v4371_v27  ;;  %v4372_v23 = vadd.f32 %v7773_v52, %v4326_v18  ;;  %v10116_v52 = vld [vmem:[#allocation7 + $0x400] sm:$0xff]   ;;  %v10130_v27 = vld [vmem:[#allocation7 + $0x470] sm:$0xff]  }
 0x82d   : > { %4392 = vst [vmem:[#allocation2 + $0x7a] sm:$0xff] %v4374_v10  ;;  %9121 = vmatpush3.bf16.msra.mxu0 %v10109_v61  ;;  %v4426_v17 = vld [vmem:[#allocation2 + $0x41] ss:$2 sm:$0xff]  ;;  %v4427_v25 = vld [vmem:[#allocation2 + $0x51] ss:$2 sm:$0xff] }
 0x82e   : > { %4390 = vst [vmem:[#allocation2 + $0x6a] sm:$0xff] %v4372_v23  ;;  %9122 = vmatprep.subr.bf16.mxu0 %v10110_v7  ;;  %v4432_v58 = vpack.c.bf16 %v4427_v25, %v4426_v17  ;;  %v4397_v42 = vld [vmem:[#allocation2 + $0x40] ss:$2 sm:$0xff]  ;;  %v11207_v43 = vld [vmem:[#allocation2 + $0x43] ss:$2 sm:$0xff]  ;;  %v10128_v57 = vld [vmem:[#allocation7 + $0x460] sm:$0xff]  }
 0x82f   : > { %v11205_v21 = vld [vmem:[#allocation2 + $0x42] ss:$2 sm:$0xff]  ;;  %v4682_v62 = vld [vmem:[#allocation2 + $0x52] ss:$2 sm:$0xff]  ;;  %v4829_v10 = vld [vmem:[#allocation2 + $0x23] ss:$2 sm:$0xff] }
 0x830   : > { %5606 = vst [vmem:[#allocation2 + $0x42] sm:$0x3] %v10492_v16  ;;  %9114 = vmatprep.mubr.bf16.mxu0 %v4432_v58  ;;  %v4398_v60 = vld [vmem:[#allocation2 + $0x50] ss:$2 sm:$0xff]  ;;  %v4687_v26 = vpack.c.bf16 %v4682_v62, %v11205_v21  ;;  %v4830_v18 = vld [vmem:[#allocation2 + $0x33] ss:$2 sm:$0xff] }
 0x831   : > { %9123 = vmatpush3.bf16.msra.mxu0 %v10110_v7  ;;  %v4403_v29 = vpack.c.bf16 %v4398_v60, %v4397_v42  ;;  %v10127_v61 = vld [vmem:[#allocation7 + $0x458] sm:$0xff]   ;;  %v10132_v7 = vld [vmem:[#allocation7 + $0x480] sm:$0xff]   ;;  %v10133_v17 = vld [vmem:[#allocation7 + $0x488] sm:$0xff]  }
 0x832   : > { %9124 = vmatprep.subr.bf16.mxu0 %v10111_v20  ;;  %v4832_v23 = vld [vmem:[#allocation2 + $0x53] ss:$2 sm:$0xff]  ;;  %v10134_v58 = vld [vmem:[#allocation7 + $0x490] sm:$0xff]  }
 0x833   : > { %v4837_v25 = vpack.c.bf16 %v4832_v23, %v11207_v43  ;;  %v10137_v43 = vld [vmem:[#allocation7 + $0x4a8] sm:$0xff]   ;;  %v10144_v60 = vld [vmem:[#allocation7 + $0x520] sm:$0xff]  }
 0x834   : > { %v4684_v40 = vld [vmem:[#allocation2 + $0x72] ss:$2 sm:$0xff]  ;;  %v4834_v21 = vld [vmem:[#allocation2 + $0x73] ss:$2 sm:$0xff]  ;;  %9222 = vmatprep.subr.bf16.mxu1 %v10144_v60 }
 0x835   : > { %9125 = vmatpush3.bf16.msra.mxu0 %v10111_v20  ;;  %v4428_v46 = vld [vmem:[#allocation2 + $0x61] ss:$2 sm:$0xff]  ;;  %v4429_v22 = vld [vmem:[#allocation2 + $0x71] ss:$2 sm:$0xff]  ;;  %v4399_v1 = vld [vmem:[#allocation2 + $0x60] ss:$2 sm:$0xff]  ;;  %v4836_v20 = vpack.c.bf16 %v4830_v18, %v4829_v10  ;;  %9223 = vmatpush3.bf16.msra.mxu1 %v10144_v60 }
 0x836   : > { %9126 = vmatprep.subr.bf16.mxu0 %v10112_v39  ;;  %v4433_v47 = vpack.c.bf16 %v4429_v22, %v4428_v46  ;;  %v4400_v54 = vld [vmem:[#allocation2 + $0x70] ss:$2 sm:$0xff]  ;;  %v4833_v42 = vld [vmem:[#allocation2 + $0x63] ss:$2 sm:$0xff] }
 0x837   : > { %v4404_v2 = vpack.c.bf16 %v4400_v54, %v4399_v1  ;;  %v4683_v44 = vld [vmem:[#allocation2 + $0x62] ss:$2 sm:$0xff]  ;;  %v4838_v38 = vpack.c.bf16 %v4834_v21, %v4833_v42  ;;  %v10136_v46 = vld [vmem:[#allocation7 + $0x4a0] sm:$0xff]  }
 0x838   : > { %9115 = vmatmul.mubr.bf16.gmra.mrb[84].mxu0 %v4433_v47  ;;  %v4688_v4 = vpack.c.bf16 %v4684_v40, %v4683_v44  ;;  %v10138_v22 = vld [vmem:[#allocation7 + $0x4b0] sm:$0xff]   ;;  %v10139_v47 = vld [vmem:[#allocation7 + $0x4b8] sm:$0xff]   ;;  %v10156_v18 = vld [vmem:[#allocation7 + $0x540] sm:$0xff]  }
 0x839   : > { %9127 = vmatpush3.bf16.msra.mxu0 %v10112_v39  ;;  %9134 = vmatprep.mubr.bf16.mxu0 %v4401_v51  ;;  %v4978_v39 = vld [vmem:[#allocation2 + $0x4] ss:$2 sm:$0xff]  ;;  %v4992_v53 = vld [vmem:[#allocation2 + $0x74] ss:$2 sm:$0xff] }
 0x83a   : > { %9128 = vmatprep.subr.bf16.mxu0 %v10113_v33  ;;  %v4993_v45 = vpack.c.bf16 %v4980_v37, %v4978_v39  ;;  %v4982_v51 = vld [vmem:[#allocation2 + $0x24] ss:$2 sm:$0xff] }
 0x83b   : > { %v4994_v50 = vpack.c.bf16 %v11203_v41, %v4982_v51  ;;  %v10148_v41 = vld [vmem:[#allocation7 + $0x4c0] sm:$0xff]   ;;  %v10155_v10 = vld [vmem:[#allocation7 + $0x4f8] sm:$0xff]   ;;  %v10158_v21 = vld [vmem:[#allocation7 + $0x550] sm:$0xff]  }
 0x83c   : > { %v10163_v51 = vld [vmem:[#allocation7 + $0x578] sm:$0xff]  }
 0x83d   : > { %9129 = vmatpush3.bf16.msra.mxu0 %v10113_v33  ;;  %v4988_v33 = vld [vmem:[#allocation2 + $0x54] ss:$2 sm:$0xff] }
 0x83e   : > { %9130 = vmatprep.subr.bf16.mxu0 %v10114_v28 }
 0x841   : > { %9131 = vmatpush3.bf16.msra.mxu0 %v10114_v28  ;;  %v4986_v28 = vld [vmem:[#allocation2 + $0x44] ss:$2 sm:$0xff] }
 0x842   : > { %9132 = vmatprep.subr.bf16.mxu0 %v10115_v24 }
 0x845   : > { %9133 = vmatpush3.bf16.msra.mxu0 %v10115_v24  ;;  %v4995_v24 = vpack.c.bf16 %v4988_v33, %v4986_v28  ;;  %v10162_v33 = vld [vmem:[#allocation7 + $0x570] sm:$0xff]  }
 0x846   : > { %9142 = vmatprep.subr.bf16.mxu0 %v10116_v52 }
 0x848   : > { %9135 = vmatmul.mubr.bf16.vlgmr.msra.gmra.mrb[80].mxu0 %v4402_v0  ;;  %v10145_v0 = vld [vmem:[#allocation7 + $0x528] sm:$0xff]  }
 0x849   : > { %9138 = vmatprep.mubr.bf16.mxu0 %v4403_v29  ;;  %9143 = vmatpush3.bf16.msra.mxu0 %v10116_v52  ;;  %v4990_v52 = vld [vmem:[#allocation2 + $0x64] ss:$2 sm:$0xff] }
 0x84a   : > { %9144 = vmatprep.subr.bf16.mxu0 %v10117_v14  ;;  %v4996_v59 = vpack.c.bf16 %v4992_v53, %v4990_v52  ;;  %9224 = vmatprep.subr.bf16.mxu1 %v10145_v0  ;;  %v10147_v29 = vld [vmem:[#allocation7 + $0x538] sm:$0xff]  }
 0x84b   : > { %9225 = vmatpush3.bf16.msra.mxu1 %v10145_v0  ;;  %v10166_v0 = vld [vmem:[#allocation7 + $0x5d0] sm:$0xff]  }
 0x84d   : > { %9145 = vmatpush3.bf16.msra.mxu0 %v10117_v14  ;;  %v10146_v14 = vld [vmem:[#allocation7 + $0x530] sm:$0xff]  }
 0x84e   : > { %9146 = vmatprep.subr.bf16.mxu0 %v10118_v3  ;;  %9226 = vmatprep.subr.bf16.mxu1 %v10146_v14 }
 0x84f   : > { %9227 = vmatpush3.bf16.msra.mxu1 %v10146_v14 }
 0x850   : > { %9139 = vmatmul.mubr.bf16.gmra.mrb[84].mxu0 %v4404_v2  ;;  %9228 = vmatprep.subr.bf16.mxu1 %v10147_v29 }
 0x851   : > { %9147 = vmatpush3.bf16.msra.mxu0 %v10118_v3  ;;  %9158 = vmatprep.mubr.bf16.mxu0 %v4685_v19  ;;  %v7814_v3 = vld [vmem:[#allocation9 + $0x5] ss:$0 sm:$0xff] }
 0x852   : > { %9148 = vmatprep.subr.bf16.mxu0 %v10119_v56 }
 0x853   : > { %9229 = vmatpush3.bf16.msra.mxu1 %v10147_v29 }
 0x854   : > { %9238 = vmatprep.subr.bf16.mxu1 %v10148_v41 }
 0x855   : > { %9149 = vmatpush3.bf16.msra.mxu0 %v10119_v56 }
 0x856   : > { %9150 = vmatprep.subr.bf16.mxu0 %v10120_v32 }
 0x859   : > { %9151 = vmatpush3.bf16.msra.mxu0 %v10120_v32 }
 0x85a   : > { %9152 = vmatprep.subr.bf16.mxu0 %v10121_v12 }
 0x85d   : > { %9153 = vmatpush3.bf16.msra.mxu0 %v10121_v12 }
 0x85e   : > { %9154 = vmatprep.subr.bf16.mxu0 %v10122_v55 }
 0x861   : > { %9155 = vmatpush3.bf16.msra.mxu0 %v10122_v55 }
 0x862   : > { %9156 = vmatprep.subr.bf16.mxu0 %v10123_v6 }
 0x865   : > { %9157 = vmatpush3.bf16.msra.mxu0 %v10123_v6  ;;  %v10149_v6 = vld [vmem:[#allocation7 + $0x4c8] sm:$0xff]  }
 0x866   : > { %9166 = vmatprep.subr.bf16.mxu0 %v10124_v13 }
 0x868   : > { %9159 = vmatmul.mubr.bf16.vlgmr.msra.gmra.mrb[80].mxu0 %v4686_v15 }
 0x869   : > { %9162 = vmatprep.mubr.bf16.mxu0 %v4687_v26  ;;  %9167 = vmatpush3.bf16.msra.mxu0 %v10124_v13 }
 0x86a   : > { %9168 = vmatprep.subr.bf16.mxu0 %v10125_v49 }
 0x86d   : > { %9169 = vmatpush3.bf16.msra.mxu0 %v10125_v49 }
 0x86e   : > { %9170 = vmatprep.subr.bf16.mxu0 %v10126_v11 }
 0x870   : > { %9163 = vmatmul.mubr.bf16.gmra.mrb[84].mxu0 %v4688_v4 }
 0x871   : > { %9171 = vmatpush3.bf16.msra.mxu0 %v10126_v11  ;;  %9182 = vmatprep.mubr.bf16.mxu0 %v4835_v5  ;;  %v10150_v11 = vld [vmem:[#allocation7 + $0x4d0] sm:$0xff]  }
 0x872   : > { %9172 = vmatprep.subr.bf16.mxu0 %v10127_v61 }
 0x875   : > { %9173 = vmatpush3.bf16.msra.mxu0 %v10127_v61  ;;  %v10151_v61 = vld [vmem:[#allocation7 + $0x4d8] sm:$0xff]  }
 0x876   : > { %9174 = vmatprep.subr.bf16.mxu0 %v10128_v57 }
 0x879   : > { %9175 = vmatpush3.bf16.msra.mxu0 %v10128_v57  ;;  %v10152_v57 = vld [vmem:[#allocation7 + $0x4e0] sm:$0xff]  }
 0x87a   : > { %9176 = vmatprep.subr.bf16.mxu0 %v10129_v31 }
 0x87d   : > { %9177 = vmatpush3.bf16.msra.mxu0 %v10129_v31 }
 0x87e   : > { %9178 = vmatprep.subr.bf16.mxu0 %v10130_v27 }
 0x881   : > { %9179 = vmatpush3.bf16.msra.mxu0 %v10130_v27 }
 0x882   : > { %9180 = vmatprep.subr.bf16.mxu0 %v10131_v36 }
 0x885   : > { %9181 = vmatpush3.bf16.msra.mxu0 %v10131_v36  ;;  %v10153_v36 = vld [vmem:[#allocation7 + $0x4e8] sm:$0xff]  }
 0x886   : > { %9190 = vmatprep.subr.bf16.mxu0 %v10132_v7 }
 0x888   : > { %9183 = vmatmul.mubr.bf16.vlgmr.msra.gmra.mrb[80].mxu0 %v4836_v20 }
 0x889   : > { %9186 = vmatprep.mubr.bf16.mxu0 %v4837_v25  ;;  %9191 = vmatpush3.bf16.msra.mxu0 %v10132_v7  ;;  %v10154_v7 = vld [vmem:[#allocation7 + $0x4f0] sm:$0xff]  }
 0x88a   : > { %9192 = vmatprep.subr.bf16.mxu0 %v10133_v17 }
 0x88d   : > { %9193 = vmatpush3.bf16.msra.mxu0 %v10133_v17 }
 0x88e   : > { %9194 = vmatprep.subr.bf16.mxu0 %v10134_v58 }
 0x890   : > { %9187 = vmatmul.mubr.bf16.gmra.mrb[84].mxu0 %v4838_v38 }
 0x891   : > { %9195 = vmatpush3.bf16.msra.mxu0 %v10134_v58  ;;  %9206 = vmatprep.mubr.bf16.mxu0 %v4993_v45  ;;  %v10157_v58 = vld [vmem:[#allocation7 + $0x548] sm:$0xff]  }
 0x892   : > { %9196 = vmatprep.subr.bf16.mxu0 %v10135_v48 }
 0x895   : > { %9197 = vmatpush3.bf16.msra.mxu0 %v10135_v48 }
 0x896   : > { %9198 = vmatprep.subr.bf16.mxu0 %v10136_v46 }
 0x899   : > { %9199 = vmatpush3.bf16.msra.mxu0 %v10136_v46  ;;  %v10159_v46 = vld [vmem:[#allocation7 + $0x558] sm:$0xff]  }
 0x89a   : > { %9200 = vmatprep.subr.bf16.mxu0 %v10137_v43 }
 0x89d   : > { %9201 = vmatpush3.bf16.msra.mxu0 %v10137_v43 }
 0x89e   : > { %9202 = vmatprep.subr.bf16.mxu0 %v10138_v22 }
 0x8a1   : > { %9203 = vmatpush3.bf16.msra.mxu0 %v10138_v22  ;;  %v10160_v22 = vld [vmem:[#allocation7 + $0x560] sm:$0xff]  }
 0x8a2   : > { %9204 = vmatprep.subr.bf16.mxu0 %v10139_v47 }
 0x8a5   : > { %9205 = vmatpush3.bf16.msra.mxu0 %v10139_v47  ;;  %v10161_v47 = vld [vmem:[#allocation7 + $0x568] sm:$0xff]  }
 0x8a8   : > { %9207 = vmatmul.mubr.bf16.vlgmr.msra.gmra.mrb[80].mxu0 %v4994_v50  ;;  %v10164_v50 = vld [vmem:[#allocation7 + $0x5c0] sm:$0xff]  }
 0x8a9   : > { %9210 = vmatprep.mubr.bf16.mxu0 %v4995_v24 }
 0x8b0   : > { %9211 = vmatmul.mubr.bf16.gmra.mrb[84].mxu0 %v4996_v59  ;;  %v10165_v59 = vld [vmem:[#allocation7 + $0x5c8] sm:$0xff]  }
 0x97b   : > { %v9208_v1 = vpop.f32.mrb[80].mxu0 }
 0x97c   : > { %v5142_v54 = vadd.f32 %v9208_v1, %v7814_v3  ;;  %v5096_v63 = vpop.f32.mrb[81].mxu0  ;;  %v10168_v1 = vld [vmem:[#allocation7 + $0x5e0] sm:$0xff]  }
 0x97d   : > { %v5140_v30 = vadd.f32 %v7814_v3, %v5096_v63  ;;  %v9209_v2 = vpop.f32.mrb[82].mxu0  ;;  %v10170_v63 = vld [vmem:[#allocation7 + $0x5f0] sm:$0xff]  }
 0x97e   : > { %5152 = vst [vmem:[#allocation3 + $0x11] sm:$0xff] %v5142_v54  ;;  %v5143_v56 = vadd.f32 %v9209_v2, %v7814_v3  ;;  %v5099_v19 = vpop.f32.mrb[83].mxu0  ;;  %v10172_v2 = vld [vmem:[#allocation7 + $0x580] sm:$0xff]  }
 0x97f   : > { %5150 = vst [vmem:[#allocation3 + $0x1] sm:$0xff] %v5140_v30  ;;  %v5141_v32 = vadd.f32 %v7814_v3, %v5099_v19 }
 0x980   : > { %5153 = vst [vmem:[#allocation3 + $0x19] sm:$0xff] %v5143_v56  ;;  %v5196_v12 = vpack.c.bf16 %v5143_v56, %v5142_v54  ;;  %v10169_v54 = vld [vmem:[#allocation7 + $0x5e8] sm:$0xff]   ;;  %v7839_v56 = vld [vmem:[#allocation9 + $0x6] ss:$0 sm:$0xff] }
 0x981   : > { %5151 = vst [vmem:[#allocation3 + $0x9] sm:$0xff] %v5141_v32  ;;  %v5195_v55 = vpack.c.bf16 %v5141_v32, %v5140_v30  ;;  %v10171_v30 = vld [vmem:[#allocation7 + $0x5f8] sm:$0xff]  }
 0x983   : > { %v9212_v13 = vpop.f32.mrb[84].mxu0  ;;  %9230 = vmatprep.mubr.bf16.mxu1 %v5195_v55 }
 0x984   : > { %v5146_v9 = vadd.f32 %v9212_v13, %v7814_v3  ;;  %v5112_v35 = vpop.f32.mrb[85].mxu0  ;;  %9231 = vmatmul.mubr.bf16.vlgmr.msra.gmra.mrb[48].mxu1 %v5196_v12 }
 0x985   : > { %v5144_v62 = vadd.f32 %v7814_v3, %v5112_v35  ;;  %v9213_v15 = vpop.f32.mrb[86].mxu0  ;;  %9239 = vmatpush3.bf16.msra.mxu1 %v10148_v41 }
 0x986   : > { %5156 = vst [vmem:[#allocation3 + $0x31] sm:$0xff] %v5146_v9  ;;  %v5147_v49 = vadd.f32 %v9213_v15, %v7814_v3  ;;  %v5115_v26 = vpop.f32.mrb[87].mxu0  ;;  %9240 = vmatprep.subr.bf16.mxu1 %v10149_v6  ;;  %v5158_v44 = vld [vmem:[#allocation3] sm:$0xff] }
 0x987   : > { %5154 = vst [vmem:[#allocation3 + $0x21] sm:$0xff] %v5144_v62  ;;  %v5145_v40 = vadd.f32 %v7814_v3, %v5115_v26  ;;  %6236 = vst [vmem:[#allocation3] sm:$0x1] %v10492_v16  ;;  %v5161_v20 = vld [vmem:[#allocation3 + $0x18] sm:$0xff]  ;;  %v10167_v3 = vld [vmem:[#allocation7 + $0x5d8] sm:$0xff]  }
 0x988   : > { %5157 = vst [vmem:[#allocation3 + $0x39] sm:$0xff] %v5147_v49  ;;  %v5198_v8 = vpack.c.bf16 %v5147_v49, %v5146_v9  ;;  %v5159_v34 = vld [vmem:[#allocation3 + $0x8] sm:$0xff]  ;;  %v5160_v23 = vld [vmem:[#allocation3 + $0x10] sm:$0xff] }
 0x989   : > { %5155 = vst [vmem:[#allocation3 + $0x29] sm:$0xff] %v5145_v40  ;;  %9241 = vmatpush3.bf16.msra.mxu1 %v10149_v6  ;;  %v5197_v4 = vpack.c.bf16 %v5145_v40, %v5144_v62  ;;  %v5166_v5 = vpack.c.bf16 %v5159_v34, %v5158_v44  ;;  %v5167_v25 = vpack.c.bf16 %v5161_v20, %v5160_v23  ;;  %v5442_v39 = vld [vmem:[#allocation3 + $0x2] sm:$0xff]  ;;  %v5443_v48 = vld [vmem:[#allocation3 + $0xa] sm:$0xff]  ;;  %v5444_v52 = vld [vmem:[#allocation3 + $0x12] sm:$0xff] }
 0x98a   : > { %9242 = vmatprep.subr.bf16.mxu1 %v10150_v11  ;;  %v5450_v43 = vpack.c.bf16 %v5443_v48, %v5442_v39  ;;  %v10176_v39 = vld [vmem:[#allocation7 + $0x5a0] sm:$0xff]   ;;  %v10177_v48 = vld [vmem:[#allocation7 + $0x5a8] sm:$0xff]  }
 0x98b   : > { %9234 = vmatprep.mubr.bf16.mxu1 %v5197_v4 }
 0x98c   : > { %9235 = vmatmul.mubr.bf16.gmra.mrb[52].mxu1 %v5198_v8 }
 0x98d   : > { %9243 = vmatpush3.bf16.msra.mxu1 %v10150_v11  ;;  %9254 = vmatprep.mubr.bf16.mxu1 %v5166_v5 }
 0x98e   : > { %9244 = vmatprep.subr.bf16.mxu1 %v10151_v61  ;;  %v5162_v31 = vld [vmem:[#allocation3 + $0x20] sm:$0xff] }
 0x98f   : > { %v5445_v27 = vld [vmem:[#allocation3 + $0x1a] sm:$0xff]  ;;  %v5448_v14 = vld [vmem:[#allocation3 + $0x32] sm:$0xff] }
 0x990   : > { %6237 = vst [vmem:[#allocation3 + $0x21] sm:$0x1] %v10492_v16  ;;  %v5163_v17 = vld [vmem:[#allocation3 + $0x28] sm:$0xff]  ;;  %v5164_v37 = vld [vmem:[#allocation3 + $0x30] sm:$0xff]  ;;  %v5165_v38 = vld [vmem:[#allocation3 + $0x38] sm:$0xff]  ;;  %v5451_v53 = vpack.c.bf16 %v5445_v27, %v5444_v52 }
 0x991   : > { %9245 = vmatpush3.bf16.msra.mxu1 %v10151_v61  ;;  %v5168_v42 = vpack.c.bf16 %v5163_v17, %v5162_v31  ;;  %v5169_v45 = vpack.c.bf16 %v5165_v38, %v5164_v37  ;;  %v5446_v28 = vld [vmem:[#allocation3 + $0x22] sm:$0xff]  ;;  %v5447_v24 = vld [vmem:[#allocation3 + $0x2a] sm:$0xff]  ;;  %v5449_v29 = vld [vmem:[#allocation3 + $0x3a] sm:$0xff] }
 0x992   : > { %9246 = vmatprep.subr.bf16.mxu1 %v10152_v57  ;;  %v5452_v60 = vpack.c.bf16 %v5447_v24, %v5446_v28  ;;  %v5453_v41 = vpack.c.bf16 %v5449_v29, %v5448_v14  ;;  %v10173_v31 = vld [vmem:[#allocation7 + $0x588] sm:$0xff]   ;;  %v10175_v37 = vld [vmem:[#allocation7 + $0x598] sm:$0xff]   ;;  %v10182_v24 = vld [vmem:[#allocation7 + $0x610] sm:$0xff]  }
 0x993   : > { %v10207_v38 = vld [vmem:[#allocation7 + $0x718] sm:$0xff]   ;;  %v10188_v14 = vld [vmem:[#allocation7 + $0x640] sm:$0xff]  }
 0x994   : > { %v10183_v52 = vld [vmem:[#allocation7 + $0x618] sm:$0xff]  }
 0x995   : > { %9247 = vmatpush3.bf16.msra.mxu1 %v10152_v57 }
 0x996   : > { %9248 = vmatprep.subr.bf16.mxu1 %v10153_v36 }
 0x999   : > { %9249 = vmatpush3.bf16.msra.mxu1 %v10153_v36 }
 0x99a   : > { %9250 = vmatprep.subr.bf16.mxu1 %v10154_v7 }
 0x99d   : > { %9251 = vmatpush3.bf16.msra.mxu1 %v10154_v7 }
 0x99e   : > { %9252 = vmatprep.subr.bf16.mxu1 %v10155_v10 }
 0x9a1   : > { %9253 = vmatpush3.bf16.msra.mxu1 %v10155_v10 }
 0x9a2   : > { %9262 = vmatprep.subr.bf16.mxu1 %v10156_v18 }
 0x9a4   : > { %9255 = vmatmul.mubr.bf16.vlgmr.msra.gmra.mrb[48].mxu1 %v5167_v25  ;;  %v10204_v25 = vld [vmem:[#allocation7 + $0x700] sm:$0xff]  }
 0x9a5   : > { %9258 = vmatprep.mubr.bf16.mxu1 %v5168_v42  ;;  %9263 = vmatpush3.bf16.msra.mxu1 %v10156_v18  ;;  %v10174_v42 = vld [vmem:[#allocation7 + $0x590] sm:$0xff]  }
 0x9a6   : > { %9264 = vmatprep.subr.bf16.mxu1 %v10157_v58  ;;  %9386 = vmatprep.subr.bf16.mxu0 %v10204_v25 }
 0x9a7   : > { %9387 = vmatpush3.bf16.msra.mxu0 %v10204_v25 }
 0x9a9   : > { %9265 = vmatpush3.bf16.msra.mxu1 %v10157_v58  ;;  %v10205_v58 = vld [vmem:[#allocation7 + $0x708] sm:$0xff]  }
 0x9aa   : > { %9266 = vmatprep.subr.bf16.mxu1 %v10158_v21  ;;  %9388 = vmatprep.subr.bf16.mxu0 %v10205_v58 }
 0x9ab   : > { %9389 = vmatpush3.bf16.msra.mxu0 %v10205_v58 }
 0x9ac   : > { %9259 = vmatmul.mubr.bf16.gmra.mrb[52].mxu1 %v5169_v45  ;;  %v10178_v45 = vld [vmem:[#allocation7 + $0x5b0] sm:$0xff]  }
 0x9ad   : > { %9267 = vmatpush3.bf16.msra.mxu1 %v10158_v21  ;;  %9278 = vmatprep.mubr.bf16.mxu1 %v5450_v43  ;;  %v10206_v21 = vld [vmem:[#allocation7 + $0x710] sm:$0xff]   ;;  %v10180_v43 = vld [vmem:[#allocation7 + $0x600] sm:$0xff]  }
 0x9ae   : > { %9268 = vmatprep.subr.bf16.mxu1 %v10159_v46  ;;  %9390 = vmatprep.subr.bf16.mxu0 %v10206_v21 }
 0x9af   : > { %9391 = vmatpush3.bf16.msra.mxu0 %v10206_v21 }
 0x9b0   : > { %9392 = vmatprep.subr.bf16.mxu0 %v10207_v38 }
 0x9b1   : > { %9269 = vmatpush3.bf16.msra.mxu1 %v10159_v46  ;;  %v10179_v46 = vld [vmem:[#allocation7 + $0x5b8] sm:$0xff]  }
 0x9b2   : > { %9270 = vmatprep.subr.bf16.mxu1 %v10160_v22 }
 0x9b3   : > { %9393 = vmatpush3.bf16.msra.mxu0 %v10207_v38 }
 0x9b5   : > { %9271 = vmatpush3.bf16.msra.mxu1 %v10160_v22 }
 0x9b6   : > { %9272 = vmatprep.subr.bf16.mxu1 %v10161_v47 }
 0x9b9   : > { %9273 = vmatpush3.bf16.msra.mxu1 %v10161_v47 }
 0x9ba   : > { %9274 = vmatprep.subr.bf16.mxu1 %v10162_v33 }
 0x9bd   : > { %9275 = vmatpush3.bf16.msra.mxu1 %v10162_v33 }
 0x9be   : > { %9276 = vmatprep.subr.bf16.mxu1 %v10163_v51 }
 0x9c1   : > { %9277 = vmatpush3.bf16.msra.mxu1 %v10163_v51 }
 0x9c2   : > { %9286 = vmatprep.subr.bf16.mxu1 %v10164_v50 }
 0x9c4   : > { %9279 = vmatmul.mubr.bf16.vlgmr.msra.gmra.mrb[48].mxu1 %v5451_v53  ;;  %v10184_v53 = vld [vmem:[#allocation7 + $0x620] sm:$0xff]  }
 0x9c5   : > { %9282 = vmatprep.mubr.bf16.mxu1 %v5452_v60  ;;  %9287 = vmatpush3.bf16.msra.mxu1 %v10164_v50  ;;  %v10181_v50 = vld [vmem:[#allocation7 + $0x608] sm:$0xff]   ;;  %v10186_v60 = vld [vmem:[#allocation7 + $0x630] sm:$0xff]  }
 0x9c6   : > { %9288 = vmatprep.subr.bf16.mxu1 %v10165_v59 }
 0x9c9   : > { %9289 = vmatpush3.bf16.msra.mxu1 %v10165_v59  ;;  %v10185_v59 = vld [vmem:[#allocation7 + $0x628] sm:$0xff]  }
 0x9ca   : > { %9290 = vmatprep.subr.bf16.mxu1 %v10166_v0 }
 0x9cc   : > { %9283 = vmatmul.mubr.bf16.gmra.mrb[52].mxu1 %v5453_v41 }
 0x9cd   : > { %9291 = vmatpush3.bf16.msra.mxu1 %v10166_v0  ;;  %v10187_v0 = vld [vmem:[#allocation7 + $0x638] sm:$0xff]  }
 0x9ce   : > { %9292 = vmatprep.subr.bf16.mxu1 %v10167_v3 }
 0x9d1   : > { %9293 = vmatpush3.bf16.msra.mxu1 %v10167_v3 }
 0x9d2   : > { %9294 = vmatprep.subr.bf16.mxu1 %v10168_v1 }
 0x9d5   : > { %9295 = vmatpush3.bf16.msra.mxu1 %v10168_v1 }
 0x9d6   : > { %9296 = vmatprep.subr.bf16.mxu1 %v10169_v54 }
 0x9d9   : > { %9297 = vmatpush3.bf16.msra.mxu1 %v10169_v54  ;;  %v10189_v54 = vld [vmem:[#allocation7 + $0x648] sm:$0xff]  }
 0x9da   : > { %9298 = vmatprep.subr.bf16.mxu1 %v10170_v63 }
 0x9dd   : > { %9299 = vmatpush3.bf16.msra.mxu1 %v10170_v63 }
 0x9de   : > { %9300 = vmatprep.subr.bf16.mxu1 %v10171_v30 }
 0x9e1   : > { %9301 = vmatpush3.bf16.msra.mxu1 %v10171_v30  ;;  %v10190_v30 = vld [vmem:[#allocation7 + $0x650] sm:$0xff]  }
 0x9e2   : > { %9306 = vmatprep.subr.bf16.mxu1 %v10172_v2 }
 0xa97   : > { %v9280_v19 = vpop.f32.mrb[48].mxu1 }
 0xa98   : > { %v5599_v32 = vadd.f32 %v9280_v19, %v7839_v56  ;;  %v5553_v12 = vpop.f32.mrb[49].mxu1  ;;  %v10193_v19 = vld [vmem:[#allocation7 + $0x668] sm:$0xff]  }
 0xa99   : > { %v5597_v55 = vadd.f32 %v7839_v56, %v5553_v12  ;;  %v9281_v6 = vpop.f32.mrb[50].mxu1  ;;  %v10195_v12 = vld [vmem:[#allocation7 + $0x678] sm:$0xff]  }
 0xa9a   : > { %5609 = vst [vmem:[#allocation2 + $0x12] sm:$0xff] %v5599_v32  ;;  %v5600_v13 = vadd.f32 %v9281_v6, %v7839_v56  ;;  %v5556_v9 = vpop.f32.mrb[51].mxu1  ;;  %v10194_v32 = vld [vmem:[#allocation7 + $0x670] sm:$0xff]  }
 0xa9b   : > { %5607 = vst [vmem:[#allocation2 + $0x2] sm:$0xff] %v5597_v55  ;;  %v5598_v35 = vadd.f32 %v7839_v56, %v5556_v9  ;;  %v10196_v55 = vld [vmem:[#allocation7 + $0x680] sm:$0xff]  }
 0xa9c   : > { %5610 = vst [vmem:[#allocation2 + $0x1a] sm:$0xff] %v5600_v13 }
 0xa9d   : > { %5608 = vst [vmem:[#allocation2 + $0xa] sm:$0xff] %v5598_v35  ;;  %v10197_v35 = vld [vmem:[#allocation7 + $0x688] sm:$0xff]  }
 0xa9f   : > { %v9284_v62 = vpop.f32.mrb[52].mxu1 }
 0xaa0   : > { %v5603_v15 = vadd.f32 %v9284_v62, %v7839_v56  ;;  %v5569_v49 = vpop.f32.mrb[53].mxu1 }
 0xaa1   : > { %v5601_v26 = vadd.f32 %v7839_v56, %v5569_v49  ;;  %v9285_v11 = vpop.f32.mrb[54].mxu1  ;;  %v10199_v49 = vld [vmem:[#allocation7 + $0x698] sm:$0xff]  }
 0xaa2   : > { %5613 = vst [vmem:[#allocation2 + $0x32] sm:$0xff] %v5603_v15  ;;  %v5604_v44 = vadd.f32 %v9285_v11, %v7839_v56  ;;  %v5572_v40 = vpop.f32.mrb[55].mxu1  ;;  %v10198_v15 = vld [vmem:[#allocation7 + $0x690] sm:$0xff]   ;;  %v10201_v11 = vld [vmem:[#allocation7 + $0x6a8] sm:$0xff]  }
 0xaa3   : > { %5611 = vst [vmem:[#allocation2 + $0x22] sm:$0xff] %v5601_v26  ;;  %v5602_v8 = vadd.f32 %v7839_v56, %v5572_v40  ;;  %v5856_v33 = vld [vmem:[#allocation2 + $0x12] ss:$2 sm:$0xff]  ;;  %v5980_v3 = vld [vmem:[#allocation2 + $0x13] ss:$2 sm:$0xff]  ;;  %v10203_v40 = vld [vmem:[#allocation7 + $0x6b8] sm:$0xff]  }
 0xaa4   : > { %5614 = vst [vmem:[#allocation2 + $0x3a] sm:$0xff] %v5604_v44  ;;  %v5638_v34 = vld [vmem:[#allocation2 + $0x1] ss:$2 sm:$0xff]  ;;  %v5639_v4 = vld [vmem:[#allocation2 + $0x11] ss:$2 sm:$0xff] }
 0xaa5   : > { %v5615_v61 = vld [vmem:[#allocation2] ss:$2 sm:$0xff]  ;;  %5612 = vst [vmem:[#allocation2 + $0x2a] sm:$0xff] %v5602_v8  ;;  %v5642_v5 = vpack.c.bf16 %v5639_v4, %v5638_v34  ;;  %v5616_v57 = vld [vmem:[#allocation2 + $0x10] ss:$2 sm:$0xff] }
 0xaa6   : > { %6615 = vst [vmem:[#allocation2] sm:$0x3] %v10492_v16  ;;  %v5619_v17 = vpack.c.bf16 %v5616_v57, %v5615_v61  ;;  %v5855_v47 = vld [vmem:[#allocation2 + $0x2] ss:$2 sm:$0xff]  ;;  %v5979_v41 = vld [vmem:[#allocation2 + $0x3] ss:$2 sm:$0xff] }
 0xaa7   : > { %9302 = vmatprep.mubr.bf16.mxu1 %v5642_v5  ;;  %v5859_v28 = vpack.c.bf16 %v5856_v33, %v5855_v47  ;;  %v5983_v63 = vpack.c.bf16 %v5980_v3, %v5979_v41  ;;  %v10192_v56 = vld [vmem:[#allocation7 + $0x660] sm:$0xff]   ;;  %v10202_v44 = vld [vmem:[#allocation7 + $0x6b0] sm:$0xff]   ;;  %v10209_v5 = vld [vmem:[#allocation7 + $0x728] sm:$0xff]  }
 0xaa8   : > { %v6103_v9 = vld [vmem:[#allocation2 + $0x4] ss:$2 sm:$0xff] }
 0xaa9   : > { %v10200_v26 = vld [vmem:[#allocation7 + $0x6a0] sm:$0xff]   ;;  %v10210_v57 = vld [vmem:[#allocation7 + $0x730] sm:$0xff]  }
 0xaaa   : > { %v11217_v7 = vld [vmem:[#allocation2 + $0x14] ss:$2 sm:$0xff] }
 0xaab   : > { %v5858_v29 = vld [vmem:[#allocation2 + $0x32] ss:$2 sm:$0xff]  ;;  %v5982_v6 = vld [vmem:[#allocation2 + $0x33] ss:$2 sm:$0xff]  ;;  %v6107_v62 = vpack.c.bf16 %v11217_v7, %v6103_v9  ;;  %v10222_v3 = vld [vmem:[#allocation7 + $0x750] sm:$0xff]  }
 0xaac   : > { %v5640_v27 = vld [vmem:[#allocation2 + $0x21] ss:$2 sm:$0xff]  ;;  %v5641_v36 = vld [vmem:[#allocation2 + $0x31] ss:$2 sm:$0xff]  ;;  %v5617_v18 = vld [vmem:[#allocation2 + $0x20] ss:$2 sm:$0xff] }
 0xaad   : > { %v5643_v10 = vpack.c.bf16 %v5641_v36, %v5640_v27  ;;  %v11219_v23 = vld [vmem:[#allocation2 + $0x22] ss:$2 sm:$0xff]  ;;  %v11221_v20 = vld [vmem:[#allocation2 + $0x23] ss:$2 sm:$0xff]  ;;  %v10208_v61 = vld [vmem:[#allocation7 + $0x720] sm:$0xff]  }
 0xaae   : > { %6616 = vst [vmem:[#allocation2 + $0x22] sm:$0x3] %v10492_v16  ;;  %v5618_v22 = vld [vmem:[#allocation2 + $0x30] ss:$2 sm:$0xff]  ;;  %v5860_v1 = vpack.c.bf16 %v5858_v29, %v11219_v23  ;;  %v5984_v13 = vpack.c.bf16 %v5982_v6, %v11221_v20  ;;  %9394 = vmatprep.subr.bf16.mxu0 %v10208_v61  ;;  %v7880_v23 = vld [vmem:[#allocation9 + $0x7] ss:$0 sm:$0xff] }
 0xaaf   : > { %9303 = vmatmul.mubr.bf16.vlgmr.msra.gmra.mrb[56].mxu1 %v5643_v10  ;;  %v5620_v51 = vpack.c.bf16 %v5618_v22, %v5617_v18  ;;  %v6105_v8 = vld [vmem:[#allocation2 + $0x24] ss:$2 sm:$0xff]  ;;  %v6106_v34 = vld [vmem:[#allocation2 + $0x34] ss:$2 sm:$0xff]  ;;  %9395 = vmatpush3.bf16.msra.mxu0 %v10208_v61 }
 0xab0   : > { %9307 = vmatpush3.bf16.msra.mxu1 %v10172_v2  ;;  %9322 = vmatprep.mubr.bf16.mxu1 %v5619_v17  ;;  %v10191_v2 = vld [vmem:[#allocation7 + $0x658] sm:$0xff]   ;;  %v6108_v4 = vpack.c.bf16 %v6106_v34, %v6105_v8  ;;  %v10212_v27 = vld [vmem:[#allocation7 + $0x6c0] sm:$0xff]   ;;  %v10231_v7 = vld [vmem:[#allocation7 + $0x788] sm:$0xff]  }
 0xab1   : > { %9308 = vmatprep.subr.bf16.mxu1 %v10173_v31  ;;  %9396 = vmatprep.subr.bf16.mxu0 %v10209_v5  ;;  %v10229_v36 = vld [vmem:[#allocation7 + $0x780] sm:$0xff]   ;;  %v10233_v10 = vld [vmem:[#allocation7 + $0x790] sm:$0xff]   ;;  %v10235_v18 = vld [vmem:[#allocation7 + $0x798] sm:$0xff]  }
 0xab2   : > { %v10221_v29 = vld [vmem:[#allocation7 + $0x748] sm:$0xff]   ;;  %v10232_v6 = vld [vmem:[#allocation7 + $0x7d0] sm:$0xff]   ;;  %v10236_v9 = vld [vmem:[#allocation7 + $0x7e0] sm:$0xff]  }
 0xab3   : > { %9397 = vmatpush3.bf16.msra.mxu0 %v10209_v5 }
 0xab4   : > { %9309 = vmatpush3.bf16.msra.mxu1 %v10173_v31  ;;  %v10211_v31 = vld [vmem:[#allocation7 + $0x738] sm:$0xff]   ;;  %9398 = vmatprep.subr.bf16.mxu0 %v10210_v57 }
 0xab5   : > { %9310 = vmatprep.subr.bf16.mxu1 %v10174_v42 }
 0xab7   : > { %9399 = vmatpush3.bf16.msra.mxu0 %v10210_v57 }
 0xab8   : > { %9311 = vmatpush3.bf16.msra.mxu1 %v10174_v42  ;;  %9400 = vmatprep.subr.bf16.mxu0 %v10211_v31 }
 0xab9   : > { %9312 = vmatprep.subr.bf16.mxu1 %v10175_v37 }
 0xabb   : > { %9401 = vmatpush3.bf16.msra.mxu0 %v10211_v31 }
 0xabc   : > { %9313 = vmatpush3.bf16.msra.mxu1 %v10175_v37  ;;  %9406 = vmatprep.subr.bf16.mxu0 %v10212_v27 }
 0xabd   : > { %9314 = vmatprep.subr.bf16.mxu1 %v10176_v39 }
 0xac0   : > { %9315 = vmatpush3.bf16.msra.mxu1 %v10176_v39 }
 0xac1   : > { %9316 = vmatprep.subr.bf16.mxu1 %v10177_v48 }
 0xac4   : > { %9317 = vmatpush3.bf16.msra.mxu1 %v10177_v48 }
 0xac5   : > { %9318 = vmatprep.subr.bf16.mxu1 %v10178_v45 }
 0xac8   : > { %9319 = vmatpush3.bf16.msra.mxu1 %v10178_v45  ;;  %v10213_v45 = vld [vmem:[#allocation7 + $0x6c8] sm:$0xff]  }
 0xac9   : > { %9320 = vmatprep.subr.bf16.mxu1 %v10179_v46 }
 0xacc   : > { %9321 = vmatpush3.bf16.msra.mxu1 %v10179_v46 }
 0xacd   : > { %9326 = vmatprep.subr.bf16.mxu1 %v10180_v43 }
 0xacf   : > { %9323 = vmatmul.mubr.bf16.vlgmr.msra.gmra.mrb[56].mxu1 %v5620_v51 }
 0xad0   : > { %9327 = vmatpush3.bf16.msra.mxu1 %v10180_v43  ;;  %9342 = vmatprep.mubr.bf16.mxu1 %v5859_v28  ;;  %v10214_v43 = vld [vmem:[#allocation7 + $0x6d0] sm:$0xff]   ;;  %v10216_v28 = vld [vmem:[#allocation7 + $0x6e0] sm:$0xff]  }
 0xad1   : > { %9328 = vmatprep.subr.bf16.mxu1 %v10181_v50 }
 0xad4   : > { %9329 = vmatpush3.bf16.msra.mxu1 %v10181_v50  ;;  %v10215_v50 = vld [vmem:[#allocation7 + $0x6d8] sm:$0xff]  }
 0xad5   : > { %9330 = vmatprep.subr.bf16.mxu1 %v10182_v24 }
 0xad8   : > { %9331 = vmatpush3.bf16.msra.mxu1 %v10182_v24  ;;  %v10217_v24 = vld [vmem:[#allocation7 + $0x6e8] sm:$0xff]  }
 0xad9   : > { %9332 = vmatprep.subr.bf16.mxu1 %v10183_v52 }
 0xadc   : > { %9333 = vmatpush3.bf16.msra.mxu1 %v10183_v52  ;;  %v10218_v52 = vld [vmem:[#allocation7 + $0x6f0] sm:$0xff]  }
 0xadd   : > { %9334 = vmatprep.subr.bf16.mxu1 %v10184_v53 }
 0xae0   : > { %9335 = vmatpush3.bf16.msra.mxu1 %v10184_v53  ;;  %v10219_v53 = vld [vmem:[#allocation7 + $0x6f8] sm:$0xff]  }
 0xae1   : > { %9336 = vmatprep.subr.bf16.mxu1 %v10185_v59 }
 0xae4   : > { %9337 = vmatpush3.bf16.msra.mxu1 %v10185_v59  ;;  %v10220_v59 = vld [vmem:[#allocation7 + $0x740] sm:$0xff]  }
 0xae5   : > { %9338 = vmatprep.subr.bf16.mxu1 %v10186_v60 }
 0xae8   : > { %9339 = vmatpush3.bf16.msra.mxu1 %v10186_v60 }
 0xae9   : > { %9340 = vmatprep.subr.bf16.mxu1 %v10187_v0 }
 0xaec   : > { %9341 = vmatpush3.bf16.msra.mxu1 %v10187_v0 }
 0xaed   : > { %9346 = vmatprep.subr.bf16.mxu1 %v10188_v14 }
 0xaef   : > { %9343 = vmatmul.mubr.bf16.vlgmr.msra.gmra.mrb[56].mxu1 %v5860_v1  ;;  %v10223_v1 = vld [vmem:[#allocation7 + $0x758] sm:$0xff]  }
 0xaf0   : > { %9347 = vmatpush3.bf16.msra.mxu1 %v10188_v14  ;;  %9362 = vmatprep.mubr.bf16.mxu1 %v5983_v63  ;;  %v10225_v63 = vld [vmem:[#allocation7 + $0x768] sm:$0xff]  }
 0xaf1   : > { %9348 = vmatprep.subr.bf16.mxu1 %v10189_v54 }
 0xaf4   : > { %9349 = vmatpush3.bf16.msra.mxu1 %v10189_v54  ;;  %v10224_v54 = vld [vmem:[#allocation7 + $0x760] sm:$0xff]  }
 0xaf5   : > { %9350 = vmatprep.subr.bf16.mxu1 %v10190_v30 }
 0xaf8   : > { %9351 = vmatpush3.bf16.msra.mxu1 %v10190_v30  ;;  %v10226_v30 = vld [vmem:[#allocation7 + $0x770] sm:$0xff]  }
 0xaf9   : > { %9352 = vmatprep.subr.bf16.mxu1 %v10191_v2 }
 0xafc   : > { %9353 = vmatpush3.bf16.msra.mxu1 %v10191_v2  ;;  %v10227_v2 = vld [vmem:[#allocation7 + $0x778] sm:$0xff]  }
 0xafd   : > { %9354 = vmatprep.subr.bf16.mxu1 %v10192_v56 }
 0xb00   : > { %9355 = vmatpush3.bf16.msra.mxu1 %v10192_v56 }
 0xb01   : > { %9356 = vmatprep.subr.bf16.mxu1 %v10193_v19 }
 0xb04   : > { %9357 = vmatpush3.bf16.msra.mxu1 %v10193_v19 }
 0xb05   : > { %9358 = vmatprep.subr.bf16.mxu1 %v10194_v32 }
 0xb08   : > { %9359 = vmatpush3.bf16.msra.mxu1 %v10194_v32  ;;  %v10228_v32 = vld [vmem:[#allocation7 + $0x7c0] sm:$0xff]  }
 0xb09   : > { %9360 = vmatprep.subr.bf16.mxu1 %v10195_v12 }
 0xb0c   : > { %9361 = vmatpush3.bf16.msra.mxu1 %v10195_v12 }
 0xb0d   : > { %9366 = vmatprep.subr.bf16.mxu1 %v10196_v55 }
 0xb0f   : > { %9363 = vmatmul.mubr.bf16.vlgmr.msra.gmra.mrb[56].mxu1 %v5984_v13  ;;  %v10234_v13 = vld [vmem:[#allocation7 + $0x7d8] sm:$0xff]  }
 0xb10   : > { %9367 = vmatpush3.bf16.msra.mxu1 %v10196_v55  ;;  %9382 = vmatprep.mubr.bf16.mxu1 %v6107_v62  ;;  %v10230_v55 = vld [vmem:[#allocation7 + $0x7c8] sm:$0xff]  }
 0xb11   : > { %9368 = vmatprep.subr.bf16.mxu1 %v10197_v35  ;;  %v10238_v62 = vld [vmem:[#allocation7 + $0x7e8] sm:$0xff]  }
 0xb14   : > { %9369 = vmatpush3.bf16.msra.mxu1 %v10197_v35  ;;  %v10237_v35 = vld [vmem:[#allocation7 + $0x7a0] sm:$0xff]  }
 0xb15   : > { %9370 = vmatprep.subr.bf16.mxu1 %v10198_v15 }
 0xb18   : > { %9371 = vmatpush3.bf16.msra.mxu1 %v10198_v15  ;;  %v10239_v15 = vld [vmem:[#allocation7 + $0x7a8] sm:$0xff]  }
 0xb19   : > { %9372 = vmatprep.subr.bf16.mxu1 %v10199_v49 }
 0xb1c   : > { %9373 = vmatpush3.bf16.msra.mxu1 %v10199_v49  ;;  %v10240_v49 = vld [vmem:[#allocation7 + $0x7f0] sm:$0xff]  }
 0xb1d   : > { %9374 = vmatprep.subr.bf16.mxu1 %v10200_v26 }
 0xb20   : > { %9375 = vmatpush3.bf16.msra.mxu1 %v10200_v26  ;;  %v10241_v26 = vld [vmem:[#allocation7 + $0x7b0] sm:$0xff]  }
 0xb21   : > { %9376 = vmatprep.subr.bf16.mxu1 %v10201_v11 }
 0xb24   : > { %9377 = vmatpush3.bf16.msra.mxu1 %v10201_v11  ;;  %v10242_v11 = vld [vmem:[#allocation7 + $0x7f8] sm:$0xff]  }
 0xb25   : > { %9378 = vmatprep.subr.bf16.mxu1 %v10202_v44 }
 0xb28   : > { %9379 = vmatpush3.bf16.msra.mxu1 %v10202_v44  ;;  %v10243_v44 = vld [vmem:[#allocation7 + $0x7b8] sm:$0xff]  }
 0xb29   : > { %9380 = vmatprep.subr.bf16.mxu1 %v10203_v40 }
 0xb2c   : > { %9381 = vmatpush3.bf16.msra.mxu1 %v10203_v40  ;;  %v7905_v40 = vld [vmem:[#allocation9 + $0x8] ss:$0 sm:$0xff] }
 0xb2d   : > { %9466 = vmatprep.subr.bf16.mxu1 %v10492_v16 }
 0xb2f   : > { %9383 = vmatmul.mubr.bf16.vlgmr.msra.gmra.mrb[56].mxu1 %v6108_v4 }
 0xb30   : > { %9467 = vmatpush3.bf16.msra.mxu1 %v10229_v36  ;;  %9482 = vmatprep.mubr.msk.bf16.mxu1 %vm10493_vm4, %v10492_v16  ;;  %v10244_v36 = vld [vmem:[#allocation7 + $0x800] sm:$0xff]  }
 0xb31   : > { %9468 = vmatprep.subr.bf16.mxu1 %v10492_v16 }
 0xb34   : > { %9469 = vmatpush3.bf16.msra.mxu1 %v10231_v7 }
 0xb35   : > { %9470 = vmatprep.subr.bf16.mxu1 %v10492_v16 }
 0xb38   : > { %9471 = vmatpush3.bf16.msra.mxu1 %v10233_v10 }
 0xb39   : > { %9472 = vmatprep.subr.bf16.mxu1 %v10492_v16 }
 0xb3c   : > { %9473 = vmatpush3.bf16.msra.mxu1 %v10235_v18 }
 0xb3d   : > { %9474 = vmatprep.subr.bf16.mxu1 %v10492_v16 }
 0xb40   : > { %9475 = vmatpush3.bf16.msra.mxu1 %v10237_v35  ;;  %v10276_v35 = vld [vmem:[#allocation7 + $0x920] sm:$0xff]  }
 0xb41   : > { %9476 = vmatprep.subr.bf16.mxu1 %v10492_v16 }
 0xb44   : > { %9477 = vmatpush3.bf16.msra.mxu1 %v10239_v15  ;;  %v10280_v15 = vld [vmem:[#allocation7 + $0x930] sm:$0xff]  }
 0xb45   : > { %9478 = vmatprep.subr.bf16.mxu1 %v10492_v16 }
 0xb48   : > { %9479 = vmatpush3.bf16.msra.mxu1 %v10241_v26  ;;  %v10279_v26 = vld [vmem:[#allocation7 + $0x8e8] sm:$0xff]  }
 0xb49   : > { %9480 = vmatprep.subr.bf16.mxu1 %v10492_v16 }
 0xb4c   : > { %9481 = vmatpush3.bf16.msra.mxu1 %v10243_v44  ;;  %v10281_v44 = vld [vmem:[#allocation7 + $0x8f0] sm:$0xff]  }
 0xb4d   : > { %9506 = vmatprep.subr.bf16.mxu1 %v10492_v16 }
 0xc02   : > { %v9384_v20 = vpop.f32.mrb[56].mxu1 }
 0xc03   : > { %v6234_v17 = vadd.f32 %v9384_v20, %v7880_v23  ;;  %v6208_v25 = vpop.f32.mrb[57].mxu1 }
 0xc04   : > { %v6232_v58 = vadd.f32 %v7880_v23, %v6208_v25  ;;  %v9385_v42 = vpop.f32.mrb[58].mxu1 }
 0xc05   : > { %6240 = vst [vmem:[#allocation3 + $0x11] sm:$0xff] %v6234_v17  ;;  %v6235_v21 = vadd.f32 %v9385_v42, %v7880_v23  ;;  %v6211_v37 = vpop.f32.mrb[59].mxu1  ;;  %v10247_v42 = vld [vmem:[#allocation7 + $0x848] sm:$0xff]  }
 0xc06   : > { %6238 = vst [vmem:[#allocation3 + $0x1] sm:$0xff] %v6232_v58  ;;  %v6233_v38 = vadd.f32 %v7880_v23, %v6211_v37  ;;  %v10249_v37 = vld [vmem:[#allocation7 + $0x850] sm:$0xff]  }
 0xc07   : > { %6241 = vst [vmem:[#allocation3 + $0x19] sm:$0xff] %v6235_v21  ;;  %v6270_v39 = vpack.c.bf16 %v6235_v21, %v6234_v17  ;;  %v10245_v17 = vld [vmem:[#allocation7 + $0x840] sm:$0xff]   ;;  %v10248_v21 = vld [vmem:[#allocation7 + $0x810] sm:$0xff]  }
 0xc08   : > { %6239 = vst [vmem:[#allocation3 + $0x9] sm:$0xff] %v6233_v38  ;;  %v6269_v48 = vpack.c.bf16 %v6233_v38, %v6232_v58  ;;  %v10246_v58 = vld [vmem:[#allocation7 + $0x808] sm:$0xff]   ;;  %v10250_v38 = vld [vmem:[#allocation7 + $0x818] sm:$0xff]  }
 0xc0a   : > { %9402 = vmatprep.mubr.bf16.mxu0 %v6269_v48  ;;  %v10252_v48 = vld [vmem:[#allocation7 + $0x820] sm:$0xff]  }
 0xc0b   : > { %9403 = vmatmul.mubr.bf16.vlgmr.msra.gmra.mrb[88].mxu0 %v6270_v39  ;;  %v10251_v39 = vld [vmem:[#allocation7 + $0x858] sm:$0xff]  }
 0xc0c   : > { %9407 = vmatpush3.bf16.msra.mxu0 %v10212_v27 }
 0xc0d   : > { %v6242_v46 = vld [vmem:[#allocation3] sm:$0xff]  ;;  %9408 = vmatprep.subr.bf16.mxu0 %v10213_v45 }
 0xc0e   : > { %7179 = vst [vmem:[#allocation3] sm:$0x1] %v10492_v16  ;;  %v6245_v60 = vld [vmem:[#allocation3 + $0x18] sm:$0xff] }
 0xc0f   : > { %v6243_v22 = vld [vmem:[#allocation3 + $0x8] sm:$0xff]  ;;  %v6244_v33 = vld [vmem:[#allocation3 + $0x10] sm:$0xff]  ;;  %v6485_v19 = vld [vmem:[#allocation3 + $0x1a] sm:$0xff] }
 0xc10   : > { %v6246_v47 = vpack.c.bf16 %v6243_v22, %v6242_v46  ;;  %9409 = vmatpush3.bf16.msra.mxu0 %v10213_v45  ;;  %v6483_v51 = vld [vmem:[#allocation3 + $0xa] sm:$0xff]  ;;  %v6482_v0 = vld [vmem:[#allocation3 + $0x2] sm:$0xff]  ;;  %v6247_v14 = vpack.c.bf16 %v6245_v60, %v6244_v33  ;;  %v6484_v56 = vld [vmem:[#allocation3 + $0x12] sm:$0xff] }
 0xc11   : > { %9410 = vmatprep.subr.bf16.mxu0 %v10214_v43  ;;  %7180 = vst [vmem:[#allocation3 + $0x11] sm:$0x1] %v10492_v16  ;;  %v6486_v41 = vpack.c.bf16 %v6483_v51, %v6482_v0  ;;  %v6487_v12 = vpack.c.bf16 %v6485_v19, %v6484_v56  ;;  %v10253_v45 = vld [vmem:[#allocation7 + $0x860] sm:$0xff]   ;;  %v10254_v46 = vld [vmem:[#allocation7 + $0x828] sm:$0xff]   ;;  %v10256_v22 = vld [vmem:[#allocation7 + $0x830] sm:$0xff]  }
 0xc12   : > { %9422 = vmatprep.mubr.bf16.mxu0 %v6246_v47  ;;  %v10257_v47 = vld [vmem:[#allocation7 + $0x870] sm:$0xff]   ;;  %v10258_v33 = vld [vmem:[#allocation7 + $0x838] sm:$0xff]   ;;  %v10261_v0 = vld [vmem:[#allocation7 + $0x888] sm:$0xff]  }
 0xc13   : > { %v10259_v51 = vld [vmem:[#allocation7 + $0x878] sm:$0xff]   ;;  %v10268_v56 = vld [vmem:[#allocation7 + $0x900] sm:$0xff]  }
 0xc14   : > { %9411 = vmatpush3.bf16.msra.mxu0 %v10214_v43  ;;  %v10255_v43 = vld [vmem:[#allocation7 + $0x868] sm:$0xff]   ;;  %v10269_v19 = vld [vmem:[#allocation7 + $0x8c0] sm:$0xff]  }
 0xc15   : > { %9412 = vmatprep.subr.bf16.mxu0 %v10215_v50 }
 0xc18   : > { %9413 = vmatpush3.bf16.msra.mxu0 %v10215_v50 }
 0xc19   : > { %9414 = vmatprep.subr.bf16.mxu0 %v10216_v28 }
 0xc1c   : > { %9415 = vmatpush3.bf16.msra.mxu0 %v10216_v28 }
 0xc1d   : > { %9416 = vmatprep.subr.bf16.mxu0 %v10217_v24 }
 0xc20   : > { %9417 = vmatpush3.bf16.msra.mxu0 %v10217_v24 }
 0xc21   : > { %9418 = vmatprep.subr.bf16.mxu0 %v10218_v52 }
 0xc24   : > { %9419 = vmatpush3.bf16.msra.mxu0 %v10218_v52 }
 0xc25   : > { %9420 = vmatprep.subr.bf16.mxu0 %v10219_v53 }
 0xc28   : > { %9421 = vmatpush3.bf16.msra.mxu0 %v10219_v53  ;;  %v10260_v53 = vld [vmem:[#allocation7 + $0x880] sm:$0xff]  }
 0xc29   : > { %9426 = vmatprep.subr.bf16.mxu0 %v10220_v59 }
 0xc2b   : > { %9423 = vmatmul.mubr.bf16.vlgmr.msra.gmra.mrb[88].mxu0 %v6247_v14  ;;  %v10262_v14 = vld [vmem:[#allocation7 + $0x890] sm:$0xff]  }
 0xc2c   : > { %9427 = vmatpush3.bf16.msra.mxu0 %v10220_v59  ;;  %9442 = vmatprep.mubr.bf16.mxu0 %v6486_v41  ;;  %v10264_v41 = vld [vmem:[#allocation7 + $0x8a0] sm:$0xff]  }
 0xc2d   : > { %9428 = vmatprep.subr.bf16.mxu0 %v10221_v29 }
 0xc30   : > { %9429 = vmatpush3.bf16.msra.mxu0 %v10221_v29  ;;  %v10263_v29 = vld [vmem:[#allocation7 + $0x898] sm:$0xff]  }
 0xc31   : > { %9430 = vmatprep.subr.bf16.mxu0 %v10222_v3 }
 0xc34   : > { %9431 = vmatpush3.bf16.msra.mxu0 %v10222_v3  ;;  %v10265_v3 = vld [vmem:[#allocation7 + $0x8a8] sm:$0xff]  }
 0xc35   : > { %9432 = vmatprep.subr.bf16.mxu0 %v10223_v1 }
 0xc38   : > { %9433 = vmatpush3.bf16.msra.mxu0 %v10223_v1  ;;  %v10266_v1 = vld [vmem:[#allocation7 + $0x8b0] sm:$0xff]  }
 0xc39   : > { %9434 = vmatprep.subr.bf16.mxu0 %v10224_v54 }
 0xc3c   : > { %9435 = vmatpush3.bf16.msra.mxu0 %v10224_v54  ;;  %v10267_v54 = vld [vmem:[#allocation7 + $0x8b8] sm:$0xff]  }
 0xc3d   : > { %9436 = vmatprep.subr.bf16.mxu0 %v10225_v63 }
 0xc40   : > { %9437 = vmatpush3.bf16.msra.mxu0 %v10225_v63 }
 0xc41   : > { %9438 = vmatprep.subr.bf16.mxu0 %v10226_v30 }
 0xc44   : > { %9439 = vmatpush3.bf16.msra.mxu0 %v10226_v30 }
 0xc45   : > { %9440 = vmatprep.subr.bf16.mxu0 %v10227_v2 }
 0xc48   : > { %9441 = vmatpush3.bf16.msra.mxu0 %v10227_v2 }
 0xc49   : > { %9446 = vmatprep.subr.bf16.mxu0 %v10492_v16 }
 0xc4b   : > { %9443 = vmatmul.mubr.bf16.vlgmr.msra.gmra.mrb[88].mxu0 %v6487_v12  ;;  %v10271_v12 = vld [vmem:[#allocation7 + $0x8c8] sm:$0xff]  }
 0xc4c   : > { %9447 = vmatpush3.bf16.msra.mxu0 %v10228_v32  ;;  %9462 = vmatprep.mubr.msk.bf16.mxu0 %vm10493_vm4, %v10492_v16  ;;  %v10270_v32 = vld [vmem:[#allocation7 + $0x908] sm:$0xff]  }
 0xc4d   : > { %9448 = vmatprep.subr.bf16.mxu0 %v10492_v16 }
 0xc50   : > { %9449 = vmatpush3.bf16.msra.mxu0 %v10230_v55  ;;  %v10272_v55 = vld [vmem:[#allocation7 + $0x910] sm:$0xff]  }
 0xc51   : > { %9450 = vmatprep.subr.bf16.mxu0 %v10492_v16 }
 0xc54   : > { %9451 = vmatpush3.bf16.msra.mxu0 %v10232_v6  ;;  %v10273_v6 = vld [vmem:[#allocation7 + $0x8d0] sm:$0xff]  }
 0xc55   : > { %9452 = vmatprep.subr.bf16.mxu0 %v10492_v16 }
 0xc58   : > { %9453 = vmatpush3.bf16.msra.mxu0 %v10234_v13  ;;  %v10274_v13 = vld [vmem:[#allocation7 + $0x918] sm:$0xff]  }
 0xc59   : > { %9454 = vmatprep.subr.bf16.mxu0 %v10492_v16 }
 0xc5c   : > { %9455 = vmatpush3.bf16.msra.mxu0 %v10236_v9  ;;  %v10275_v9 = vld [vmem:[#allocation7 + $0x8d8] sm:$0xff]  }
 0xc5d   : > { %9456 = vmatprep.subr.bf16.mxu0 %v10492_v16 }
 0xc60   : > { %9457 = vmatpush3.bf16.msra.mxu0 %v10238_v62  ;;  %v10278_v62 = vld [vmem:[#allocation7 + $0x928] sm:$0xff]  }
 0xc61   : > { %9458 = vmatprep.subr.bf16.mxu0 %v10492_v16 }
 0xc64   : > { %9459 = vmatpush3.bf16.msra.mxu0 %v10240_v49  ;;  %v10277_v49 = vld [vmem:[#allocation7 + $0x8e0] sm:$0xff]  }
 0xc65   : > { %9460 = vmatprep.subr.bf16.mxu0 %v10492_v16 }
 0xc68   : > { %9461 = vmatpush3.bf16.msra.mxu0 %v10242_v11  ;;  %v10282_v11 = vld [vmem:[#allocation7 + $0x938] sm:$0xff]  }
 0xc69   : > { %9486 = vmatprep.subr.bf16.mxu0 %v10492_v16 }
 0xd1e   : > { %v9444_v8 = vpop.f32.mrb[88].mxu0 }
 0xd1f   : > { %v6613_v34 = vadd.f32 %v9444_v8, %v7905_v40  ;;  %v6587_v4 = vpop.f32.mrb[89].mxu0 }
 0xd20   : > { %v6611_v61 = vadd.f32 %v7905_v40, %v6587_v4  ;;  %v9445_v5 = vpop.f32.mrb[90].mxu0 }
 0xd21   : > { %6619 = vst [vmem:[#allocation2 + $0x12] sm:$0xff] %v6613_v34  ;;  %v6614_v57 = vadd.f32 %v9445_v5, %v7905_v40  ;;  %v6590_v31 = vpop.f32.mrb[91].mxu0 }
 0xd22   : > { %6617 = vst [vmem:[#allocation2 + $0x2] sm:$0xff] %v6611_v61  ;;  %v6612_v27 = vadd.f32 %v7905_v40, %v6590_v31  ;;  %v10283_v40 = vld [vmem:[#allocation7 + $0x8f8] sm:$0xff]  }
 0xd23   : > { %6620 = vst [vmem:[#allocation2 + $0x1a] sm:$0xff] %v6614_v57 }
 0xd24   : > { %6618 = vst [vmem:[#allocation2 + $0xa] sm:$0xff] %v6612_v27 }
 0xd2a   : > { %v6840_v28 = vld [vmem:[#allocation2 + $0x12] ss:$2 sm:$0xff]  ;;  %v6951_v52 = vld [vmem:[#allocation2 + $0x13] ss:$2 sm:$0xff] }
 0xd2b   : > { %v6641_v7 = vld [vmem:[#allocation2 + $0x1] ss:$2 sm:$0xff]  ;;  %v6642_v10 = vld [vmem:[#allocation2 + $0x11] ss:$2 sm:$0xff]  ;;  %v6621_v18 = vld [vmem:[#allocation2] ss:$2 sm:$0xff] }
 0xd2c   : > { %v6643_v23 = vpack.c.bf16 %v6642_v10, %v6641_v7  ;;  %v6622_v20 = vld [vmem:[#allocation2 + $0x10] ss:$2 sm:$0xff]  ;;  %v6950_v24 = vld [vmem:[#allocation2 + $0x3] ss:$2 sm:$0xff] }
 0xd2d   : > { %v6623_v25 = vpack.c.bf16 %v6622_v20, %v6621_v18  ;;  %v6839_v50 = vld [vmem:[#allocation2 + $0x2] ss:$2 sm:$0xff]  ;;  %v6952_v60 = vpack.c.bf16 %v6951_v52, %v6950_v24  ;;  %v10285_v52 = vld [vmem:[#allocation7 + $0x948] sm:$0xff]  }
 0xd2e   : > { %9463 = vmatmul.mubr.bf16.vlgmr.msra.gmra.mrb[92].mxu0 %v6643_v23  ;;  %v6841_v59 = vpack.c.bf16 %v6840_v28, %v6839_v50  ;;  %v7061_v63 = vld [vmem:[#allocation2 + $0x4] ss:$2 sm:$0xff]  ;;  %v7062_v30 = vld [vmem:[#allocation2 + $0x14] ss:$2 sm:$0xff] }
 0xd2f   : > { %9483 = vmatmul.mubr.bf16.vlgmr.msra.gmra.mrb[60].mxu1 %v6623_v25  ;;  %9487 = vmatpush3.bf16.msra.mxu0 %v10244_v36  ;;  %v7063_v2 = vpack.c.bf16 %v7062_v30, %v7061_v63  ;;  %v10284_v28 = vld [vmem:[#allocation7 + $0x940] sm:$0xff]  }
 0xd30   : > { %9507 = vmatpush3.bf16.msra.mxu1 %v10245_v17  ;;  %9488 = vmatprep.subr.bf16.mxu0 %v10492_v16 }
 0xd31   : > { %9508 = vmatprep.subr.bf16.mxu1 %v10492_v16  ;;  %9502 = vmatprep.mubr.msk.bf16.mxu0 %vm10493_vm4, %v10492_v16 }
 0xd32   : > { %9522 = vmatprep.mubr.msk.bf16.mxu1 %vm10493_vm4, %v10492_v16 }
 0xd33   : > { %9489 = vmatpush3.bf16.msra.mxu0 %v10246_v58 }
 0xd34   : > { %9509 = vmatpush3.bf16.msra.mxu1 %v10247_v42  ;;  %9490 = vmatprep.subr.bf16.mxu0 %v10492_v16 }
 0xd35   : > { %9510 = vmatprep.subr.bf16.mxu1 %v10492_v16 }
 0xd37   : > { %9491 = vmatpush3.bf16.msra.mxu0 %v10248_v21 }
 0xd38   : > { %9511 = vmatpush3.bf16.msra.mxu1 %v10249_v37  ;;  %9492 = vmatprep.subr.bf16.mxu0 %v10492_v16 }
 0xd39   : > { %9512 = vmatprep.subr.bf16.mxu1 %v10492_v16 }
 0xd3b   : > { %9493 = vmatpush3.bf16.msra.mxu0 %v10250_v38 }
 0xd3c   : > { %9513 = vmatpush3.bf16.msra.mxu1 %v10251_v39  ;;  %9494 = vmatprep.subr.bf16.mxu0 %v10492_v16 }
 0xd3d   : > { %9514 = vmatprep.subr.bf16.mxu1 %v10492_v16 }
 0xd3f   : > { %9495 = vmatpush3.bf16.msra.mxu0 %v10252_v48 }
 0xd40   : > { %9515 = vmatpush3.bf16.msra.mxu1 %v10253_v45  ;;  %9496 = vmatprep.subr.bf16.mxu0 %v10492_v16  ;;  %v7946_v45 = vld [vmem:[#allocation9 + $0x9] ss:$0 sm:$0xff] }
 0xd41   : > { %9516 = vmatprep.subr.bf16.mxu1 %v10492_v16 }
 0xd43   : > { %9497 = vmatpush3.bf16.msra.mxu0 %v10254_v46 }
 0xd44   : > { %9517 = vmatpush3.bf16.msra.mxu1 %v10255_v43  ;;  %9498 = vmatprep.subr.bf16.mxu0 %v10492_v16 }
 0xd45   : > { %9518 = vmatprep.subr.bf16.mxu1 %v10492_v16 }
 0xd47   : > { %9499 = vmatpush3.bf16.msra.mxu0 %v10256_v22 }
 0xd48   : > { %9519 = vmatpush3.bf16.msra.mxu1 %v10257_v47  ;;  %9500 = vmatprep.subr.bf16.mxu0 %v10492_v16 }
 0xd49   : > { %9520 = vmatprep.subr.bf16.mxu1 %v10492_v16 }
 0xd4b   : > { %9501 = vmatpush3.bf16.msra.mxu0 %v10258_v33 }
 0xd4c   : > { %9521 = vmatpush3.bf16.msra.mxu1 %v10259_v51  ;;  %9526 = vmatprep.subr.bf16.mxu0 %v10492_v16 }
 0xd4d   : > { %9546 = vmatprep.subr.bf16.mxu1 %v10492_v16 }
 0xd4e   : > { %9503 = vmatmul.mubr.bf16.vlgmr.msra.gmra.mrb[96].mxu0 %v6841_v59 }
 0xd4f   : > { %9523 = vmatmul.mubr.bf16.vlgmr.msra.gmra.mrb[64].mxu1 %v6952_v60  ;;  %9527 = vmatpush3.bf16.msra.mxu0 %v10260_v53  ;;  %v10286_v60 = vld [vmem:[#allocation7 + $0x950] sm:$0xff]  }
 0xd50   : > { %9528 = vmatprep.subr.bf16.mxu0 %v10492_v16  ;;  %9542 = vmatprep.mubr.msk.bf16.mxu0 %vm10493_vm4, %v10492_v16 }
 0xd51   : > { %9562 = vmatprep.mubr.msk.bf16.mxu1 %vm10493_vm4, %v10492_v16  ;;  %9547 = vmatpush3.bf16.msra.mxu1 %v10268_v56 }
 0xd52   : > { %9548 = vmatprep.subr.bf16.mxu1 %v10492_v16 }
 0xd53   : > { %9529 = vmatpush3.bf16.msra.mxu0 %v10261_v0 }
 0xd54   : > { %9530 = vmatprep.subr.bf16.mxu0 %v10492_v16 }
 0xd55   : > { %9549 = vmatpush3.bf16.msra.mxu1 %v10270_v32 }
 0xd56   : > { %9550 = vmatprep.subr.bf16.mxu1 %v10492_v16 }
 0xd57   : > { %9531 = vmatpush3.bf16.msra.mxu0 %v10262_v14  ;;  %v10287_v14 = vld [vmem:[#allocation7 + $0x958] sm:$0xff]  }
 0xd58   : > { %9532 = vmatprep.subr.bf16.mxu0 %v10492_v16 }
 0xd59   : > { %9551 = vmatpush3.bf16.msra.mxu1 %v10272_v55 }
 0xd5a   : > { %9552 = vmatprep.subr.bf16.mxu1 %v10492_v16 }
 0xd5b   : > { %9533 = vmatpush3.bf16.msra.mxu0 %v10263_v29  ;;  %v10288_v29 = vld [vmem:[#allocation7 + $0x960] sm:$0xff]  }
 0xd5c   : > { %9534 = vmatprep.subr.bf16.mxu0 %v10492_v16 }
 0xd5d   : > { %9553 = vmatpush3.bf16.msra.mxu1 %v10274_v13 }
 0xd5e   : > { %9554 = vmatprep.subr.bf16.mxu1 %v10492_v16 }
 0xd5f   : > { %9535 = vmatpush3.bf16.msra.mxu0 %v10264_v41  ;;  %v10289_v41 = vld [vmem:[#allocation7 + $0x968] sm:$0xff]  }
 0xd60   : > { %9536 = vmatprep.subr.bf16.mxu0 %v10492_v16 }
 0xd61   : > { %9555 = vmatpush3.bf16.msra.mxu1 %v10276_v35 }
 0xd62   : > { %9556 = vmatprep.subr.bf16.mxu1 %v10492_v16 }
 0xd63   : > { %9537 = vmatpush3.bf16.msra.mxu0 %v10265_v3  ;;  %v10290_v3 = vld [vmem:[#allocation7 + $0x970] sm:$0xff]  }
 0xd64   : > { %9538 = vmatprep.subr.bf16.mxu0 %v10492_v16 }
 0xd65   : > { %9557 = vmatpush3.bf16.msra.mxu1 %v10278_v62  ;;  %v7971_v62 = vld [vmem:[#allocation9 + $0xa] ss:$0 sm:$0xff] }
 0xd66   : > { %9558 = vmatprep.subr.bf16.mxu1 %v10492_v16 }
 0xd67   : > { %9539 = vmatpush3.bf16.msra.mxu0 %v10266_v1  ;;  %v10291_v1 = vld [vmem:[#allocation7 + $0x978] sm:$0xff]  }
 0xd68   : > { %9540 = vmatprep.subr.bf16.mxu0 %v10492_v16 }
 0xd69   : > { %9559 = vmatpush3.bf16.msra.mxu1 %v10280_v15 }
 0xd6a   : > { %9560 = vmatprep.subr.bf16.mxu1 %v10492_v16 }
 0xd6b   : > { %9541 = vmatpush3.bf16.msra.mxu0 %v10267_v54 }
 0xd6c   : > { %9566 = vmatprep.subr.bf16.mxu0 %v10492_v16 }
 0xd6d   : > { %9561 = vmatpush3.bf16.msra.mxu1 %v10282_v11 }
 0xd6e   : > { %9543 = vmatmul.mubr.bf16.vlgmr.msra.gmra.mrb[100].mxu0 %v7063_v2  ;;  %9586 = vmatprep.subr.bf16.mxu1 %v10492_v16 }
 0xd6f   : > { %9582 = vmatprep.mubr.msk.bf16.mxu0 %vm10493_vm4, %v10492_v16  ;;  %9567 = vmatpush3.bf16.msra.mxu0 %v10269_v19 }
 0xd70   : > { %9568 = vmatprep.subr.bf16.mxu0 %v10492_v16 }
 0xd73   : > { %9569 = vmatpush3.bf16.msra.mxu0 %v10271_v12 }
 0xd74   : > { %9570 = vmatprep.subr.bf16.mxu0 %v10492_v16 }
 0xd77   : > { %9571 = vmatpush3.bf16.msra.mxu0 %v10273_v6 }
 0xd78   : > { %9572 = vmatprep.subr.bf16.mxu0 %v10492_v16 }
 0xd7b   : > { %9573 = vmatpush3.bf16.msra.mxu0 %v10275_v9 }
 0xd7c   : > { %9574 = vmatprep.subr.bf16.mxu0 %v10492_v16 }
 0xd7f   : > { %9575 = vmatpush3.bf16.msra.mxu0 %v10277_v49 }
 0xd80   : > { %9576 = vmatprep.subr.bf16.mxu0 %v10492_v16 }
 0xd83   : > { %9577 = vmatpush3.bf16.msra.mxu0 %v10279_v26 }
 0xd84   : > { %9578 = vmatprep.subr.bf16.mxu0 %v10492_v16 }
 0xd87   : > { %9579 = vmatpush3.bf16.msra.mxu0 %v10281_v44 }
 0xd88   : > { %9580 = vmatprep.subr.bf16.mxu0 %v10492_v16 }
 0xd8b   : > { %9581 = vmatpush3.bf16.msra.mxu0 %v10283_v40 }
 0xe01   : > { %v6743_v8 = vpop.f32.mrb[92].mxu0 }
 0xe02   : > { %v6832_v34 = vpop.f32.mrb[60].mxu1  ;;  %v9464_v4 = vpop.f32.mrb[93].mxu0 }
 0xe03   : > { %v6833_v61 = vadd.f32 %v6832_v34, %v6743_v8  ;;  %v9484_v5 = vpop.f32.mrb[61].mxu1  ;;  %v6746_v57 = vpop.f32.mrb[94].mxu0 }
 0xe04   : > { %v6835_v31 = vpop.f32.mrb[62].mxu1  ;;  %v9465_v27 = vpop.f32.mrb[95].mxu0 }
 0xe05   : > { %v6836_v36 = vadd.f32 %v6835_v31, %v6746_v57  ;;  %v9485_v7 = vpop.f32.mrb[63].mxu1 }
 0xe21   : > { %v6941_v10 = vpop.f32.mrb[96].mxu0 }
 0xe22   : > { %v6948_v18 = vadd.f32 %v6941_v10, %v6833_v61  ;;  %v7052_v23 = vpop.f32.mrb[64].mxu1  ;;  %v9504_v20 = vpop.f32.mrb[97].mxu0 }
 0xe23   : > { %v9524_v17 = vpop.f32.mrb[65].mxu1  ;;  %v6944_v25 = vpop.f32.mrb[98].mxu0 }
 0xe24   : > { %v7059_v58 = vadd.f32 %v7052_v23, %v6948_v18  ;;  %v6949_v42 = vadd.f32 %v6944_v25, %v6836_v36  ;;  %v7055_v21 = vpop.f32.mrb[66].mxu1  ;;  %v9505_v37 = vpop.f32.mrb[99].mxu0 }
 0xe25   : > { %v9525_v38 = vpop.f32.mrb[67].mxu1 }
 0xe26   : > { %v7060_v39 = vadd.f32 %v7055_v21, %v6949_v42 }
 0xe41   : > { %v7163_v48 = vpop.f32.mrb[100].mxu0 }
 0xe42   : > { %v7170_v46 = vadd.f32 %v7163_v48, %v7059_v58  ;;  %v9544_v43 = vpop.f32.mrb[101].mxu0 }
 0xe43   : > { %v7166_v22 = vpop.f32.mrb[102].mxu0 }
 0xe44   : > { %v7177_v47 = vadd.f32 %v7946_v45, %v7170_v46  ;;  %v7171_v33 = vadd.f32 %v7166_v22, %v7060_v39  ;;  %v9545_v51 = vpop.f32.mrb[103].mxu0 }
 0xe46   : > { %7181 = vst [vmem:[#allocation3 + $0x1] sm:$0xff] %v7177_v47  ;;  %v7178_v50 = vadd.f32 %v7946_v45, %v7171_v33 }
 0xe48   : > { %7182 = vst [vmem:[#allocation3 + $0x9] sm:$0xff] %v7178_v50  ;;  %v7205_v24 = vpack.c.bf16 %v7178_v50, %v7177_v47 }
 0xe4a   : > { %9563 = vmatmul.mubr.bf16.vlgmr.msra.gmra.mrb[68].mxu1 %v7205_v24 }
 0xe4b   : > { %9587 = vmatpush3.bf16.msra.mxu1 %v10284_v28  ;;  %9602 = vmatprep.mubr.msk.bf16.mxu1 %vm10493_vm4, %v10492_v16 }
 0xe4c   : > { %9588 = vmatprep.subr.bf16.mxu1 %v10492_v16 }
 0xe4d   : > { %v7183_v53 = vld [vmem:[#allocation3] sm:$0xff] }
 0xe4f   : > { %v7184_v59 = vld [vmem:[#allocation3 + $0x8] sm:$0xff]  ;;  %9589 = vmatpush3.bf16.msra.mxu1 %v10285_v52 }
 0xe50   : > { %v7185_v0 = vpack.c.bf16 %v7184_v59, %v7183_v53  ;;  %9590 = vmatprep.subr.bf16.mxu1 %v10492_v16  ;;  %v7401_v54 = vld [vmem:[#allocation3 + $0x2] sm:$0xff]  ;;  %v7402_v63 = vld [vmem:[#allocation3 + $0xa] sm:$0xff] }
 0xe51   : > { %v7403_v30 = vpack.c.bf16 %v7402_v63, %v7401_v54 }
 0xe52   : > { %9583 = vmatmul.mubr.bf16.vlgmr.msra.gmra.mrb[104].mxu0 %v7185_v0 }
 0xe53   : > { %9591 = vmatpush3.bf16.msra.mxu1 %v10286_v60 }
 0xe54   : > { %9592 = vmatprep.subr.bf16.mxu1 %v10492_v16 }
 0xe57   : > { %9593 = vmatpush3.bf16.msra.mxu1 %v10287_v14 }
 0xe58   : > { %9594 = vmatprep.subr.bf16.mxu1 %v10492_v16 }
 0xe5b   : > { %9595 = vmatpush3.bf16.msra.mxu1 %v10288_v29 }
 0xe5c   : > { %9596 = vmatprep.subr.bf16.mxu1 %v10492_v16 }
 0xe5f   : > { %9597 = vmatpush3.bf16.msra.mxu1 %v10289_v41 }
 0xe60   : > { %9598 = vmatprep.subr.bf16.mxu1 %v10492_v16 }
 0xe63   : > { %9599 = vmatpush3.bf16.msra.mxu1 %v10290_v3 }
 0xe64   : > { %9600 = vmatprep.subr.bf16.mxu1 %v10492_v16 }
 0xe67   : > { %9601 = vmatpush3.bf16.msra.mxu1 %v10291_v1 }
 0xe6a   : > { %9603 = vmatmul.mubr.bf16.vlgmr.msra.gmra.mrb[72].mxu1 %v7403_v30 }
 0xf1d   : > { %v7305_v2 = vpop.f32.mrb[68].mxu1 }
 0xf1e   : > { %v9564_v56 = vpop.f32.mrb[69].mxu1 }
 0xf1f   : > { %v7308_v19 = vpop.f32.mrb[70].mxu1 }
 0xf20   : > { %v9565_v32 = vpop.f32.mrb[71].mxu1 }
 0xf25   : > { %v7394_v12 = vpop.f32.mrb[104].mxu0 }
 0xf26   : > { %v7395_v55 = vadd.f32 %v7394_v12, %v7305_v2  ;;  %v9584_v6 = vpop.f32.mrb[105].mxu0 }
 0xf27   : > { %v7397_v13 = vpop.f32.mrb[106].mxu0 }
 0xf28   : > { %v7398_v9 = vadd.f32 %v7397_v13, %v7308_v19  ;;  %v9585_v35 = vpop.f32.mrb[107].mxu0 }
 0xf3d   : > { %v7503_v16 = vpop.f32.mrb[72].mxu1 }
 0xf3e   : > { %v7510_v15 = vadd.f32 %v7503_v16, %v7395_v55  ;;  %v9604_v49 = vpop.f32.mrb[73].mxu1 }
 0xf3f   : > { %v7506_v26 = vpop.f32.mrb[74].mxu1 }
 0xf40   : > { %v7517_v11 = vadd.f32 %v7971_v62, %v7510_v15  ;;  %v7511_v44 = vadd.f32 %v7506_v26, %v7398_v9  ;;  %v9605_v40 = vpop.f32.mrb[75].mxu1 }
 0xf42   : > { %7519 = vst [vmem:[%s232_s30] sm:$0xff] %v7517_v11  ;;  %v7518_v8 = vadd.f32 %v7971_v62, %v7511_v44 }
 0xf44   : > { %7520 = vst [vmem:[%s232_s30 + $0x8] sm:$0xff] %v7518_v8 }
 0xf45   : > { %10425 = shalt.err (!%p10422_p9)
}
 0xf46   : > { %s10426_s13 = scalar_lea.hbm %s11316_s7, 256  ;;  %s10430_s6 = scalar_lea.hbm %s11363_s4, 512 }
 0xf47   : > { %p10427_p2 = scmp.ne.s32.totalorder %s11316_s7, %s10426_s13  ;;  %p10431_p5 = scmp.lt.u32.totalorder %s11316_s7, %s11363_s4 }
 0xf48   : > { %p10432_p10 = scmp.lt.u32.totalorder %s10430_s6, %s10426_s13  ;;  %p10434_p12 = scmp.lt.u32.totalorder %s10426_s13, %s11316_s7 }
 0xf49   : > { %p10428_p3 = pnand %p10427_p2, %p11401_p7 }
 0xf4a   : > { %p10433_p4 = por %p10432_p10, %p10431_p5 }
 0xf4b   : > { %p10429_p0 = pneg %p10428_p3 }
 0xf4c   : > { %p10435_p8 = por %p10434_p12, %p10433_p4 }
 0xf4e   : > { %p10436_p11 = pnand %p10435_p8, %p10429_p0 }
 0xf50   : > { %10439 = shalt.err (!%p10436_p11)
}
 0xf51   : > { %s10495_s28 = smov 128   ;;  %s10496_s30 = smov 8  }
 0xf52   : > { %9921 = dma.vmem_to_hbm [thread:$0]  (%p11401_p7), %s11311_s8, 256, %s11316_s7, %s11318_s9, %s10495_s28, %s10495_s28, %s10496_s30  }
 0xf53 PF: > { %p9943_p13 = scmp.ge.s32.totalorder %s10482_s18, 2  ;;  %s7550_s14 = sand.u32 1, %s10470_s15  }
 0xf54   : > { %p11402_p1 = scmp.ne.s32.totalorder %s11368_s26, 0  ;;  %s7551_s27 = scalar_lea.sflag [#allocation6], %s7550_s14 }
 0xf56   : > { %p9934_p6 = pnand %p9943_p13, %p11402_p1 }
 0xf58   : > { %10465 = dma.done.wait (!%p9934_p6), %s7551_s27, 256  }
 0xf59   : > { %10467 = vsyncadd (!%p9934_p6), %s7551_s27, 4294967040  ;;  %p16_p9 = scmp.ge.s32.totalorder %s10547_s21, 4   ;;  %s11403_s15 = smov %s10474_s16 }
 0xf5a   : > { %s11404_s16 = smov %s10478_s17  ;;  %s11405_s17 = smov %s10558_s24 }
 0xf5b   : > { %s11406_s18 = smov %s10547_s21  ;;  %18 = sbr.rel (!%p16_p9) target bundleno = 5 (0x5), region = 208 }
 0xf62   :  { %7556 = vsyncpa [#allocation5], 1 }
 0xf63   :  { %7558 = vsyncpa [#allocation5 + $0x1], 1 }
 0xf64   :  { %7559 = vsyncpa [#allocation8], 1 }
 0xf65   :  { %7560 = vsyncpa [#allocation6], 1 }
 0xf66   :  { %7562 = vsyncpa [#allocation6 + $0x1], 1 }

</bundles_post_ra>
